<compile_context>
chip_gen: v5e
topology: v5e:2x2
jax: 0.10.0
libtpu: 0.0.40
codegen_flags: <defaults>
</compile_context>

<pallas_src>
import functools
import math

import jax
import jax.numpy as jnp
from jax.experimental import pallas as pl
from jax.experimental.pallas import tpu as pltpu


# --------------------------- in-kernel helper math ---------------------------
def _erf(x):
    # Abramowitz & Stegun 7.1.26 rational approximation, max abs error ~1.5e-7.
    p = 0.3275911
    a1, a2, a3, a4, a5 = (0.254829592, -0.284496736, 1.421413741,
                          -1.453152027, 1.061405429)
    sign = jnp.where(x >= 0, 1.0, -1.0)
    ax = jnp.abs(x)
    t = 1.0 / (1.0 + p * ax)
    poly = ((((a5 * t + a4) * t + a3) * t + a2) * t + a1) * t
    return sign * (1.0 - poly * jnp.exp(-ax * ax))


def _gelu_exact(x):
    # Matches torch.nn.functional.gelu default (erf-based) to ~1e-7.
    return 0.5 * x * (1.0 + _erf(x * (1.0 / math.sqrt(2.0))))


# --------------------------------- kernel ------------------------------------
def decoder_kernel(x_ref, wq_ref, wk_ref, wv_ref, wo_ref, w1_ref, b1_ref,
                   w2_ref, b2_ref, wvoc_ref, bvoc_ref, o_ref, *,
                   heads, head_dim, num_blocks, nb, seq, approx_recip):
    # x_ref block: (nb, S, E) for one batch tile; residual stream kept in f32.
    cdt = x_ref.dtype
    rows = nb * seq
    xf = x_ref[...].reshape(rows, -1).astype(jnp.float32)      # (nb*S, E)

    # TODO(synk): switch to lax.fori_loop over blocks (w*_ref[blk] dynamic index) once
    # num_blocks grows beyond a handful; at 2 blocks the unroll is cheapest.
    for blk in range(num_blocks):
        xl = xf.astype(cdt)                                     # one cast per block
        # ------------- attention: per-head projections, no lane slicing ----------
        for h in range(heads):
            q = jnp.dot(xl, wq_ref[blk, h], preferred_element_type=jnp.float32)
            k = jnp.dot(xl, wk_ref[blk, h], preferred_element_type=jnp.float32)
            v = jnp.dot(xl, wv_ref[blk, h], preferred_element_type=jnp.float32)
            q = q.reshape(nb, seq, head_dim)                    # scale already folded in
            k = k.reshape(nb, seq, head_dim)
            v = v.reshape(nb, seq, head_dim)
            s = jnp.einsum("bqd,bkd->bqk", q, k,
                           preferred_element_type=jnp.float32)  # (nb, S, S)
            s = s - jnp.max(s, axis=-1, keepdims=True)
            p = jnp.exp(s)
            denom = jnp.sum(p, axis=-1, keepdims=True)
            if approx_recip:
                p = p * pl.reciprocal(denom, approx=True)       # EUP slot
            else:
                p = p / denom                                   # exact for f32 parity
            o = jnp.einsum("bqk,bkd->bqd", p, v,
                           preferred_element_type=jnp.float32)  # (nb, S, hd)
            o = o.reshape(rows, head_dim).astype(cdt)
            # per-head accumulation of the output projection (replaces concat @ wo)
            xf = xf + jnp.dot(o, wo_ref[blk, h],
                              preferred_element_type=jnp.float32)

        # --------------------------------- MLP -----------------------------------
        xl = xf.astype(cdt)
        h1 = jnp.dot(xl, w1_ref[blk], preferred_element_type=jnp.float32) + b1_ref[blk]
        h1 = _gelu_exact(h1)
        xf = xf + (jnp.dot(h1.astype(cdt), w2_ref[blk],
                           preferred_element_type=jnp.float32) + b2_ref[blk])

    # -------------------- final vocab projection + log_softmax -------------------
    logits = jnp.dot(xf.astype(cdt), wvoc_ref[...],
                     preferred_element_type=jnp.float32) + bvoc_ref[...]
    z = logits - jnp.max(logits, axis=-1, keepdims=True)
    lse = jnp.log(jnp.sum(jnp.exp(z), axis=-1, keepdims=True))
    o_ref[...] = (z - lse).reshape(nb, seq, -1)                 # lane-dense (V mult of 128)


# --------------------------------- wrapper -----------------------------------
def decoder_forward(x, block_params, wvoc, bvoc, *, heads, batch_tile=8,
                    compute_dtype=jnp.bfloat16):
    """x: (N, S, E) f32. block_params: list of dicts with torch-shaped weights:
         wqkv (3E,E), wo (E,E), w1 (4E,E), b1 (4E,), w2 (E,4E), b2 (E,)
       wvoc: (V, E), bvoc: (V,).  Returns log-probs (N, S, V) in float32."""
    N, S, E = x.shape
    V = wvoc.shape[0]
    B = len(block_params)
    assert E % heads == 0
    hd = E // heads
    nb = min(batch_tile, N)
    while N % nb:            # largest divisor of N that is <= batch_tile
        nb -= 1
    num_tiles = N // nb
    cdt = compute_dtype
    f32 = jnp.float32
    scale = 1.0 / math.sqrt(hd)

    # ---- host-side weight prep: per-head splits, (in, out) layout, scale folded ----
    # wqkv rows are ordered (k, h, e): reshape -> (3, H, hd, E), transpose -> (3, H, E, hd)
    qkv = jnp.stack([p["wqkv"].reshape(3, heads, hd, E) for p in block_params])
    qkv = jnp.transpose(qkv, (0, 1, 2, 4, 3))                       # (B, 3, H, E, hd)
    wq_all = (qkv[:, 0] * scale).astype(cdt)                        # 1/sqrt(hd) folded in
    wk_all = qkv[:, 1].astype(cdt)
    wval_all = qkv[:, 2].astype(cdt)
    # output projection split per head: wo[:, h*hd:(h+1)*hd].T -> (hd, E)
    wo_all = jnp.stack([p["wo"].reshape(E, heads, hd) for p in block_params])
    wo_all = jnp.transpose(wo_all, (0, 2, 3, 1)).astype(cdt)        # (B, H, hd, E)
    w1_all = jnp.stack([p["w1"].T for p in block_params]).astype(cdt)        # (B, E, 4E)
    b1_all = jnp.stack([p["b1"].reshape(1, -1) for p in block_params]).astype(f32)
    w2_all = jnp.stack([p["w2"].T for p in block_params]).astype(cdt)        # (B, 4E, E)
    b2_all = jnp.stack([p["b2"].reshape(1, -1) for p in block_params]).astype(f32)
    wvoc_t = wvoc.T.astype(cdt)                                     # (E, V)
    bvoc_r = bvoc.reshape(1, V).astype(f32)
    x_in = x.astype(cdt)

    kernel = functools.partial(decoder_kernel, heads=heads, head_dim=hd,
                               num_blocks=B, nb=nb, seq=S,
                               approx_recip=(cdt != jnp.float32))

    # Only split across TensorCores when each core gets real work (>= 2 tiles per core).
    sem = ("parallel",) if num_tiles >= 4 else ("arbitrary",)
    cparams = pltpu.CompilerParams(dimension_semantics=sem,
                                   vmem_limit_bytes=32 * 1024 * 1024)

    def build(single_buffer_weights):
        def resident(shape):
            # Full-array block, constant index -> stays in VMEM across grid steps.
            kw = ({"pipeline_mode": pl.Buffered(1)}
                  if single_buffer_weights else {})
            return pl.BlockSpec(shape, lambda n: (0,) * len(shape), **kw)

        return pl.pallas_call(
            kernel,
            out_shape=jax.ShapeDtypeStruct((N, S, V), jnp.float32),
            grid=(num_tiles,),
            in_specs=[
                pl.BlockSpec((nb, S, E), lambda n: (n, 0, 0)),
                resident((B, heads, E, hd)),    # wq (scaled)
                resident((B, heads, E, hd)),    # wk
                resident((B, heads, E, hd)),    # wv (values)
                resident((B, heads, hd, E)),    # wo per head
                resident((B, E, 4 * E)),        # w1
                resident((B, 1, 4 * E)),        # b1
                resident((B, 4 * E, E)),        # w2
                resident((B, 1, E)),            # b2
                resident((E, V)),               # vocab proj
                resident((1, V)),               # vocab bias
            ],
            out_specs=pl.BlockSpec((nb, S, V), lambda n: (n, 0, 0)),
            compiler_params=cparams,
        )

    args = (x_in, wq_all, wk_all, wval_all, wo_all, w1_all, b1_all, w2_all,
            b2_all, wvoc_t, bvoc_r)
    try:
        return build(True)(*args)
    except Exception:
        # pipeline_mode=pl.Buffered(1) (single-buffered resident weights) is a newer
        # knob; fall back to default double-buffering if this build rejects it.
        return build(False)(*args)


# ------------------------------ plain-JAX reference ---------------------------
def reference(x, block_params, wvoc, bvoc, *, heads):
    N, S, E = x.shape
    hd = E // heads
    for p in block_params:
        qkv = x @ p["wqkv"].T                              # (N, S, 3E)
        qkv = qkv.reshape(N, S, 3, heads, hd)              # split as (k h e)
        q = jnp.transpose(qkv[:, :, 0], (0, 2, 1, 3))      # (N, H, S, hd)
        k = jnp.transpose(qkv[:, :, 1], (0, 2, 1, 3))
        v = jnp.transpose(qkv[:, :, 2], (0, 2, 1, 3))
        s = jnp.einsum("nhqd,nhkd->nhqk", q, k) / jnp.sqrt(jnp.float32(hd))
        a = jax.nn.softmax(s, axis=-1)
        o = jnp.einsum("nhqk,nhkd->nhqd", a, v)
        o = jnp.transpose(o, (0, 2, 1, 3)).reshape(N, S, E)   # 'b h s e -> b s (h e)'
        x = x + o @ p["wo"].T
        h1 = x @ p["w1"].T + p["b1"]
        h1 = jax.nn.gelu(h1, approximate=False)               # torch default (erf)
        x = x + h1 @ p["w2"].T + p["b2"]
    logits = x @ wvoc.T + bvoc
    return jax.nn.log_softmax(logits, axis=-1)


if __name__ == "__main__":
    # Decoder(embedding_channels=32, vocabulary_size=128, heads=2, blocks=...):
    # the Chain uses arguments=(1,)*(heads+1) so the number of DecoderBlocks == heads.
    N, S, E, heads, V = 2, 8, 32, 2, 128
    num_blocks = heads

    key = jax.random.PRNGKey(0)
    keys = jax.random.split(key, 2 + num_blocks)
    x = jax.random.normal(keys[0], (N, S, E), dtype=jnp.float32)

    def linear_w(k, out_f, in_f):
        return jax.random.normal(k, (out_f, in_f), dtype=jnp.float32) / jnp.sqrt(
            jnp.float32(in_f))

    block_params = []
    for i in range(num_blocks):
        bk = jax.random.split(keys[2 + i], 6)
        block_params.append(dict(
            wqkv=linear_w(bk[0], 3 * E, E),
            wo=linear_w(bk[1], E, E),
            w1=linear_w(bk[2], 4 * E, E),
            b1=0.1 * jax.random.normal(bk[3], (4 * E,), dtype=jnp.float32),
            w2=linear_w(bk[4], E, 4 * E),
            b2=0.1 * jax.random.normal(bk[5], (E,), dtype=jnp.float32),
        ))
    kv = jax.random.split(keys[1], 2)
    wv = linear_w(kv[0], V, E)
    bv = 0.1 * jax.random.normal(kv[1], (V,), dtype=jnp.float32)

    ref = jax.block_until_ready(reference(x, block_params, wv, bv, heads=heads))

    # Production config (perf feedback): bf16 operands, f32 accumulation, approx recip.
    out_bf16 = jax.block_until_ready(
        decoder_forward(x, block_params, wv, bv, heads=heads,
                        compute_dtype=jnp.bfloat16))
    # Numerics-parity config: f32 operands end-to-end, exact softmax divide.
    out_f32 = jax.block_until_ready(
        decoder_forward(x, block_params, wv, bv, heads=heads,
                        compute_dtype=jnp.float32))

    assert out_bf16.shape == (N, S, V), out_bf16.shape
    assert out_f32.shape == (N, S, V), out_f32.shape

    err_f32 = float(jnp.max(jnp.abs(out_f32 - ref)))
    err_bf16 = float(jnp.max(jnp.abs(out_bf16 - ref)))
    # f32 path tracks the erf-exact f32 reference tightly; bf16 operand rounding
    # (~2^-8 rel per operand) through two residual blocks yields O(1e-2) log-prob
    # error, so it is gated at the bf16 envelope (as flagged in the perf review).
    assert err_f32 < 2e-3, err_f32
    assert err_bf16 < 2e-1, err_bf16

    print("KERNEL_OK")
</pallas_src>

<mosaic_0001>
module attributes {stable_mosaic.version = 11 : i64} {
  func.func @decoder_kernel(%arg0: i32, %arg1: memref<2x8x32xbf16, #tpu.memory_space<vmem>>, %arg2: memref<2x2x32x16xbf16, #tpu.memory_space<vmem>>, %arg3: memref<2x2x32x16xbf16, #tpu.memory_space<vmem>>, %arg4: memref<2x2x32x16xbf16, #tpu.memory_space<vmem>>, %arg5: memref<2x2x16x32xbf16, #tpu.memory_space<vmem>>, %arg6: memref<2x32x128xbf16, #tpu.memory_space<vmem>>, %arg7: memref<2x1x128xf32, #tpu.memory_space<vmem>>, %arg8: memref<2x128x32xbf16, #tpu.memory_space<vmem>>, %arg9: memref<2x1x32xf32, #tpu.memory_space<vmem>>, %arg10: memref<32x128xbf16, #tpu.memory_space<vmem>>, %arg11: memref<1x128xf32, #tpu.memory_space<vmem>>, %arg12: memref<2x8x128xf32, #tpu.memory_space<vmem>>) attributes {dimension_semantics = [#tpu.dimension_semantics<arbitrary>], iteration_bounds = array<i64: 1>, scalar_prefetch = 0 : i64, scratch_operands = 0 : i64, tpu.core_type = #tpu.core_type<tc>, window_params = [{transform_indices = @transform_0, window_bounds = array<i64: 2, 8, 32>}, {pipeline_mode = #tpu.pipeline_mode<synchronous>, transform_indices = @transform_1, window_bounds = array<i64: 2, 2, 32, 16>}, {pipeline_mode = #tpu.pipeline_mode<synchronous>, transform_indices = @transform_2, window_bounds = array<i64: 2, 2, 32, 16>}, {pipeline_mode = #tpu.pipeline_mode<synchronous>, transform_indices = @transform_3, window_bounds = array<i64: 2, 2, 32, 16>}, {pipeline_mode = #tpu.pipeline_mode<synchronous>, transform_indices = @transform_4, window_bounds = array<i64: 2, 2, 16, 32>}, {pipeline_mode = #tpu.pipeline_mode<synchronous>, transform_indices = @transform_5, window_bounds = array<i64: 2, 32, 128>}, {pipeline_mode = #tpu.pipeline_mode<synchronous>, transform_indices = @transform_6, window_bounds = array<i64: 2, 1, 128>}, {pipeline_mode = #tpu.pipeline_mode<synchronous>, transform_indices = @transform_7, window_bounds = array<i64: 2, 128, 32>}, {pipeline_mode = #tpu.pipeline_mode<synchronous>, transform_indices = @transform_8, window_bounds = array<i64: 2, 1, 32>}, {pipeline_mode = #tpu.pipeline_mode<synchronous>, transform_indices = @transform_9, window_bounds = array<i64: 32, 128>}, {pipeline_mode = #tpu.pipeline_mode<synchronous>, transform_indices = @transform_10, window_bounds = array<i64: 1, 128>}, {transform_indices = @transform_11, window_bounds = array<i64: 2, 8, 128>}]} {
    %c0 = arith.constant 0 : index
    %c0_0 = arith.constant 0 : index
    %c0_1 = arith.constant 0 : index
    %0 = vector.load %arg1[%c0, %c0_0, %c0_1] : memref<2x8x32xbf16, #tpu.memory_space<vmem>>, vector<2x8x32xbf16>
    %1 = vector.shape_cast %0 : vector<2x8x32xbf16> to vector<16x32xbf16>
    %2 = arith.extf %1 : vector<16x32xbf16> to vector<16x32xf32>
    %3 = arith.truncf %2 : vector<16x32xf32> to vector<16x32xbf16>
    %c0_2 = arith.constant 0 : index
    %c0_3 = arith.constant 0 : index
    %c0_4 = arith.constant 0 : index
    %c0_5 = arith.constant 0 : index
    %4 = vector.load %arg2[%c0_2, %c0_3, %c0_4, %c0_5] : memref<2x2x32x16xbf16, #tpu.memory_space<vmem>>, vector<1x1x32x16xbf16>
    %5 = vector.shape_cast %4 : vector<1x1x32x16xbf16> to vector<32x16xbf16>
    %cst = arith.constant dense<0.000000e+00> : vector<16x16xf32>
    %6 = tpu.matmul %3, %5, %cst {dimension_numbers = #tpu.dot_dimension_numbers<[1], [0], [0], [1], [0, 0, 1, 1], [], []>} : vector<16x32xbf16>, vector<32x16xbf16>, vector<16x16xf32> -> vector<16x16xf32>
    %c0_6 = arith.constant 0 : index
    %c0_7 = arith.constant 0 : index
    %c0_8 = arith.constant 0 : index
    %c0_9 = arith.constant 0 : index
    %7 = vector.load %arg3[%c0_6, %c0_7, %c0_8, %c0_9] : memref<2x2x32x16xbf16, #tpu.memory_space<vmem>>, vector<1x1x32x16xbf16>
    %8 = vector.shape_cast %7 : vector<1x1x32x16xbf16> to vector<32x16xbf16>
    %cst_10 = arith.constant dense<0.000000e+00> : vector<16x16xf32>
    %9 = tpu.matmul %3, %8, %cst_10 {dimension_numbers = #tpu.dot_dimension_numbers<[1], [0], [0], [1], [0, 0, 1, 1], [], []>} : vector<16x32xbf16>, vector<32x16xbf16>, vector<16x16xf32> -> vector<16x16xf32>
    %c0_11 = arith.constant 0 : index
    %c0_12 = arith.constant 0 : index
    %c0_13 = arith.constant 0 : index
    %c0_14 = arith.constant 0 : index
    %10 = vector.load %arg4[%c0_11, %c0_12, %c0_13, %c0_14] : memref<2x2x32x16xbf16, #tpu.memory_space<vmem>>, vector<1x1x32x16xbf16>
    %11 = vector.shape_cast %10 : vector<1x1x32x16xbf16> to vector<32x16xbf16>
    %cst_15 = arith.constant dense<0.000000e+00> : vector<16x16xf32>
    %12 = tpu.matmul %3, %11, %cst_15 {dimension_numbers = #tpu.dot_dimension_numbers<[1], [0], [0], [1], [0, 0, 1, 1], [], []>} : vector<16x32xbf16>, vector<32x16xbf16>, vector<16x16xf32> -> vector<16x16xf32>
    %13 = vector.shape_cast %6 : vector<16x16xf32> to vector<2x8x16xf32>
    %14 = vector.shape_cast %9 : vector<16x16xf32> to vector<2x8x16xf32>
    %15 = vector.shape_cast %12 : vector<16x16xf32> to vector<2x8x16xf32>
    "tpu.trace_start"() <{level = 10 : i32, message = "bqd,bkd->bqk"}> : () -> ()
    %cst_16 = arith.constant dense<0.000000e+00> : vector<2x8x8xf32>
    %16 = tpu.matmul %13, %14, %cst_16 {dimension_numbers = #tpu.dot_dimension_numbers<[2], [2], [1], [1], [0, 0, 0, 1, 1, 1], [0], [0]>} : vector<2x8x16xf32>, vector<2x8x16xf32>, vector<2x8x8xf32> -> vector<2x8x8xf32>
    "tpu.trace_stop"() : () -> ()
    %cst_17 = arith.constant dense<0xFF800000> : vector<2x8xf32>
    %17 = vector.multi_reduction <maximumf>, %16, %cst_17 [2] : vector<2x8x8xf32> to vector<2x8xf32>
    %18 = vector.shape_cast %17 : vector<2x8xf32> to vector<2x8x1xf32>
    %19 = vector.broadcast %18 : vector<2x8x1xf32> to vector<2x8x8xf32>
    %20 = arith.subf %16, %19 : vector<2x8x8xf32>
    %21 = math.exp %20 : vector<2x8x8xf32>
    %cst_18 = arith.constant dense<0.000000e+00> : vector<2x8xf32>
    %22 = vector.multi_reduction <add>, %21, %cst_18 [2] : vector<2x8x8xf32> to vector<2x8xf32>
    %23 = vector.shape_cast %22 : vector<2x8xf32> to vector<2x8x1xf32>
    %24 = tpu.reciprocal %23 {approx = true} : vector<2x8x1xf32> -> vector<2x8x1xf32>
    %25 = vector.broadcast %24 : vector<2x8x1xf32> to vector<2x8x8xf32>
    %26 = arith.mulf %21, %25 : vector<2x8x8xf32>
    "tpu.trace_start"() <{level = 10 : i32, message = "bqk,bkd->bqd"}> : () -> ()
    %cst_19 = arith.constant dense<0.000000e+00> : vector<2x8x16xf32>
    %27 = tpu.matmul %26, %15, %cst_19 {dimension_numbers = #tpu.dot_dimension_numbers<[2], [1], [1], [2], [0, 0, 0, 1, 1, 2], [0], [0]>} : vector<2x8x8xf32>, vector<2x8x16xf32>, vector<2x8x16xf32> -> vector<2x8x16xf32>
    "tpu.trace_stop"() : () -> ()
    %28 = vector.shape_cast %27 : vector<2x8x16xf32> to vector<16x16xf32>
    %29 = arith.truncf %28 : vector<16x16xf32> to vector<16x16xbf16>
    %c0_20 = arith.constant 0 : index
    %c0_21 = arith.constant 0 : index
    %c0_22 = arith.constant 0 : index
    %c0_23 = arith.constant 0 : index
    %30 = vector.load %arg5[%c0_20, %c0_21, %c0_22, %c0_23] : memref<2x2x16x32xbf16, #tpu.memory_space<vmem>>, vector<1x1x16x32xbf16>
    %31 = vector.shape_cast %30 : vector<1x1x16x32xbf16> to vector<16x32xbf16>
    %cst_24 = arith.constant dense<0.000000e+00> : vector<16x32xf32>
    %32 = tpu.matmul %29, %31, %cst_24 {dimension_numbers = #tpu.dot_dimension_numbers<[1], [0], [0], [1], [0, 0, 1, 1], [], []>} : vector<16x16xbf16>, vector<16x32xbf16>, vector<16x32xf32> -> vector<16x32xf32>
    %33 = arith.addf %2, %32 : vector<16x32xf32>
    %c0_25 = arith.constant 0 : index
    %c1 = arith.constant 1 : index
    %c0_26 = arith.constant 0 : index
    %c0_27 = arith.constant 0 : index
    %34 = vector.load %arg2[%c0_25, %c1, %c0_26, %c0_27] : memref<2x2x32x16xbf16, #tpu.memory_space<vmem>>, vector<1x1x32x16xbf16>
    %35 = vector.shape_cast %34 : vector<1x1x32x16xbf16> to vector<32x16xbf16>
    %cst_28 = arith.constant dense<0.000000e+00> : vector<16x16xf32>
    %36 = tpu.matmul %3, %35, %cst_28 {dimension_numbers = #tpu.dot_dimension_numbers<[1], [0], [0], [1], [0, 0, 1, 1], [], []>} : vector<16x32xbf16>, vector<32x16xbf16>, vector<16x16xf32> -> vector<16x16xf32>
    %c0_29 = arith.constant 0 : index
    %c1_30 = arith.constant 1 : index
    %c0_31 = arith.constant 0 : index
    %c0_32 = arith.constant 0 : index
    %37 = vector.load %arg3[%c0_29, %c1_30, %c0_31, %c0_32] : memref<2x2x32x16xbf16, #tpu.memory_space<vmem>>, vector<1x1x32x16xbf16>
    %38 = vector.shape_cast %37 : vector<1x1x32x16xbf16> to vector<32x16xbf16>
    %cst_33 = arith.constant dense<0.000000e+00> : vector<16x16xf32>
    %39 = tpu.matmul %3, %38, %cst_33 {dimension_numbers = #tpu.dot_dimension_numbers<[1], [0], [0], [1], [0, 0, 1, 1], [], []>} : vector<16x32xbf16>, vector<32x16xbf16>, vector<16x16xf32> -> vector<16x16xf32>
    %c0_34 = arith.constant 0 : index
    %c1_35 = arith.constant 1 : index
    %c0_36 = arith.constant 0 : index
    %c0_37 = arith.constant 0 : index
    %40 = vector.load %arg4[%c0_34, %c1_35, %c0_36, %c0_37] : memref<2x2x32x16xbf16, #tpu.memory_space<vmem>>, vector<1x1x32x16xbf16>
    %41 = vector.shape_cast %40 : vector<1x1x32x16xbf16> to vector<32x16xbf16>
    %cst_38 = arith.constant dense<0.000000e+00> : vector<16x16xf32>
    %42 = tpu.matmul %3, %41, %cst_38 {dimension_numbers = #tpu.dot_dimension_numbers<[1], [0], [0], [1], [0, 0, 1, 1], [], []>} : vector<16x32xbf16>, vector<32x16xbf16>, vector<16x16xf32> -> vector<16x16xf32>
    %43 = vector.shape_cast %36 : vector<16x16xf32> to vector<2x8x16xf32>
    %44 = vector.shape_cast %39 : vector<16x16xf32> to vector<2x8x16xf32>
    %45 = vector.shape_cast %42 : vector<16x16xf32> to vector<2x8x16xf32>
    "tpu.trace_start"() <{level = 10 : i32, message = "bqd,bkd->bqk"}> : () -> ()
    %cst_39 = arith.constant dense<0.000000e+00> : vector<2x8x8xf32>
    %46 = tpu.matmul %43, %44, %cst_39 {dimension_numbers = #tpu.dot_dimension_numbers<[2], [2], [1], [1], [0, 0, 0, 1, 1, 1], [0], [0]>} : vector<2x8x16xf32>, vector<2x8x16xf32>, vector<2x8x8xf32> -> vector<2x8x8xf32>
    "tpu.trace_stop"() : () -> ()
    %cst_40 = arith.constant dense<0xFF800000> : vector<2x8xf32>
    %47 = vector.multi_reduction <maximumf>, %46, %cst_40 [2] : vector<2x8x8xf32> to vector<2x8xf32>
    %48 = vector.shape_cast %47 : vector<2x8xf32> to vector<2x8x1xf32>
    %49 = vector.broadcast %48 : vector<2x8x1xf32> to vector<2x8x8xf32>
    %50 = arith.subf %46, %49 : vector<2x8x8xf32>
    %51 = math.exp %50 : vector<2x8x8xf32>
    %cst_41 = arith.constant dense<0.000000e+00> : vector<2x8xf32>
    %52 = vector.multi_reduction <add>, %51, %cst_41 [2] : vector<2x8x8xf32> to vector<2x8xf32>
    %53 = vector.shape_cast %52 : vector<2x8xf32> to vector<2x8x1xf32>
    %54 = tpu.reciprocal %53 {approx = true} : vector<2x8x1xf32> -> vector<2x8x1xf32>
    %55 = vector.broadcast %54 : vector<2x8x1xf32> to vector<2x8x8xf32>
    %56 = arith.mulf %51, %55 : vector<2x8x8xf32>
    "tpu.trace_start"() <{level = 10 : i32, message = "bqk,bkd->bqd"}> : () -> ()
    %cst_42 = arith.constant dense<0.000000e+00> : vector<2x8x16xf32>
    %57 = tpu.matmul %56, %45, %cst_42 {dimension_numbers = #tpu.dot_dimension_numbers<[2], [1], [1], [2], [0, 0, 0, 1, 1, 2], [0], [0]>} : vector<2x8x8xf32>, vector<2x8x16xf32>, vector<2x8x16xf32> -> vector<2x8x16xf32>
    "tpu.trace_stop"() : () -> ()
    %58 = vector.shape_cast %57 : vector<2x8x16xf32> to vector<16x16xf32>
    %59 = arith.truncf %58 : vector<16x16xf32> to vector<16x16xbf16>
    %c0_43 = arith.constant 0 : index
    %c1_44 = arith.constant 1 : index
    %c0_45 = arith.constant 0 : index
    %c0_46 = arith.constant 0 : index
    %60 = vector.load %arg5[%c0_43, %c1_44, %c0_45, %c0_46] : memref<2x2x16x32xbf16, #tpu.memory_space<vmem>>, vector<1x1x16x32xbf16>
    %61 = vector.shape_cast %60 : vector<1x1x16x32xbf16> to vector<16x32xbf16>
    %cst_47 = arith.constant dense<0.000000e+00> : vector<16x32xf32>
    %62 = tpu.matmul %59, %61, %cst_47 {dimension_numbers = #tpu.dot_dimension_numbers<[1], [0], [0], [1], [0, 0, 1, 1], [], []>} : vector<16x16xbf16>, vector<16x32xbf16>, vector<16x32xf32> -> vector<16x32xf32>
    %63 = arith.addf %33, %62 : vector<16x32xf32>
    %64 = arith.truncf %63 : vector<16x32xf32> to vector<16x32xbf16>
    %c0_48 = arith.constant 0 : index
    %c0_49 = arith.constant 0 : index
    %c0_50 = arith.constant 0 : index
    %65 = vector.load %arg6[%c0_48, %c0_49, %c0_50] : memref<2x32x128xbf16, #tpu.memory_space<vmem>>, vector<1x32x128xbf16>
    %66 = vector.shape_cast %65 : vector<1x32x128xbf16> to vector<32x128xbf16>
    %cst_51 = arith.constant dense<0.000000e+00> : vector<16x128xf32>
    %67 = tpu.matmul %64, %66, %cst_51 {dimension_numbers = #tpu.dot_dimension_numbers<[1], [0], [0], [1], [0, 0, 1, 1], [], []>} : vector<16x32xbf16>, vector<32x128xbf16>, vector<16x128xf32> -> vector<16x128xf32>
    %c0_52 = arith.constant 0 : index
    %c0_53 = arith.constant 0 : index
    %c0_54 = arith.constant 0 : index
    %68 = vector.load %arg7[%c0_52, %c0_53, %c0_54] : memref<2x1x128xf32, #tpu.memory_space<vmem>>, vector<1x1x128xf32>
    %69 = vector.shape_cast %68 : vector<1x1x128xf32> to vector<1x128xf32>
    %70 = vector.broadcast %69 : vector<1x128xf32> to vector<16x128xf32>
    %71 = arith.addf %67, %70 : vector<16x128xf32>
    %cst_55 = arith.constant 5.000000e-01 : f32
    %72 = vector.broadcast %cst_55 : f32 to vector<16x128xf32>
    %73 = arith.mulf %72, %71 : vector<16x128xf32>
    %cst_56 = arith.constant 0.707106769 : f32
    %74 = vector.broadcast %cst_56 : f32 to vector<16x128xf32>
    %75 = arith.mulf %71, %74 : vector<16x128xf32>
    %cst_57 = arith.constant 0.000000e+00 : f32
    %76 = vector.broadcast %cst_57 : f32 to vector<16x128xf32>
    %77 = arith.cmpf oge, %75, %76 : vector<16x128xf32>
    %cst_58 = arith.constant 1.000000e+00 : f32
    %cst_59 = arith.constant -1.000000e+00 : f32
    %78 = vector.broadcast %cst_58 : f32 to vector<16x128xf32>
    %79 = vector.broadcast %cst_59 : f32 to vector<16x128xf32>
    %80 = arith.select %77, %78, %79 : vector<16x128xi1>, vector<16x128xf32>
    %81 = math.absf %75 : vector<16x128xf32>
    %cst_60 = arith.constant 0.327591091 : f32
    %82 = vector.broadcast %cst_60 : f32 to vector<16x128xf32>
    %83 = arith.mulf %82, %81 : vector<16x128xf32>
    %cst_61 = arith.constant 1.000000e+00 : f32
    %84 = vector.broadcast %cst_61 : f32 to vector<16x128xf32>
    %85 = arith.addf %84, %83 : vector<16x128xf32>
    %cst_62 = arith.constant 1.000000e+00 : f32
    %86 = vector.broadcast %cst_62 : f32 to vector<16x128xf32>
    %87 = arith.divf %86, %85 : vector<16x128xf32>
    %cst_63 = arith.constant 1.06140542 : f32
    %88 = vector.broadcast %cst_63 : f32 to vector<16x128xf32>
    %89 = arith.mulf %88, %87 : vector<16x128xf32>
    %cst_64 = arith.constant -1.45315206 : f32
    %90 = vector.broadcast %cst_64 : f32 to vector<16x128xf32>
    %91 = arith.addf %89, %90 : vector<16x128xf32>
    %92 = arith.mulf %91, %87 : vector<16x128xf32>
    %cst_65 = arith.constant 1.42141378 : f32
    %93 = vector.broadcast %cst_65 : f32 to vector<16x128xf32>
    %94 = arith.addf %92, %93 : vector<16x128xf32>
    %95 = arith.mulf %94, %87 : vector<16x128xf32>
    %cst_66 = arith.constant -0.284496725 : f32
    %96 = vector.broadcast %cst_66 : f32 to vector<16x128xf32>
    %97 = arith.addf %95, %96 : vector<16x128xf32>
    %98 = arith.mulf %97, %87 : vector<16x128xf32>
    %cst_67 = arith.constant 0.254829586 : f32
    %99 = vector.broadcast %cst_67 : f32 to vector<16x128xf32>
    %100 = arith.addf %98, %99 : vector<16x128xf32>
    %101 = arith.mulf %100, %87 : vector<16x128xf32>
    %cst_68 = arith.constant 0.000000e+00 : f32
    %102 = vector.broadcast %cst_68 : f32 to vector<16x128xf32>
    %103 = arith.subf %102, %81 : vector<16x128xf32>
    %104 = arith.mulf %103, %81 : vector<16x128xf32>
    %105 = math.exp %104 : vector<16x128xf32>
    %106 = arith.mulf %101, %105 : vector<16x128xf32>
    %cst_69 = arith.constant 1.000000e+00 : f32
    %107 = vector.broadcast %cst_69 : f32 to vector<16x128xf32>
    %108 = arith.subf %107, %106 : vector<16x128xf32>
    %109 = arith.mulf %80, %108 : vector<16x128xf32>
    %cst_70 = arith.constant 1.000000e+00 : f32
    %110 = vector.broadcast %cst_70 : f32 to vector<16x128xf32>
    %111 = arith.addf %110, %109 : vector<16x128xf32>
    %112 = arith.mulf %73, %111 : vector<16x128xf32>
    %113 = arith.truncf %112 : vector<16x128xf32> to vector<16x128xbf16>
    %c0_71 = arith.constant 0 : index
    %c0_72 = arith.constant 0 : index
    %c0_73 = arith.constant 0 : index
    %114 = vector.load %arg8[%c0_71, %c0_72, %c0_73] : memref<2x128x32xbf16, #tpu.memory_space<vmem>>, vector<1x128x32xbf16>
    %115 = vector.shape_cast %114 : vector<1x128x32xbf16> to vector<128x32xbf16>
    %cst_74 = arith.constant dense<0.000000e+00> : vector<16x32xf32>
    %116 = tpu.matmul %113, %115, %cst_74 {dimension_numbers = #tpu.dot_dimension_numbers<[1], [0], [0], [1], [0, 0, 1, 1], [], []>} : vector<16x128xbf16>, vector<128x32xbf16>, vector<16x32xf32> -> vector<16x32xf32>
    %c0_75 = arith.constant 0 : index
    %c0_76 = arith.constant 0 : index
    %c0_77 = arith.constant 0 : index
    %117 = vector.load %arg9[%c0_75, %c0_76, %c0_77] : memref<2x1x32xf32, #tpu.memory_space<vmem>>, vector<1x1x32xf32>
    %118 = vector.shape_cast %117 : vector<1x1x32xf32> to vector<1x32xf32>
    %119 = vector.broadcast %118 : vector<1x32xf32> to vector<16x32xf32>
    %120 = arith.addf %116, %119 : vector<16x32xf32>
    %121 = arith.addf %63, %120 : vector<16x32xf32>
    %122 = arith.truncf %121 : vector<16x32xf32> to vector<16x32xbf16>
    %c1_78 = arith.constant 1 : index
    %c0_79 = arith.constant 0 : index
    %c0_80 = arith.constant 0 : index
    %c0_81 = arith.constant 0 : index
    %123 = vector.load %arg2[%c1_78, %c0_79, %c0_80, %c0_81] : memref<2x2x32x16xbf16, #tpu.memory_space<vmem>>, vector<1x1x32x16xbf16>
    %124 = vector.shape_cast %123 : vector<1x1x32x16xbf16> to vector<32x16xbf16>
    %cst_82 = arith.constant dense<0.000000e+00> : vector<16x16xf32>
    %125 = tpu.matmul %122, %124, %cst_82 {dimension_numbers = #tpu.dot_dimension_numbers<[1], [0], [0], [1], [0, 0, 1, 1], [], []>} : vector<16x32xbf16>, vector<32x16xbf16>, vector<16x16xf32> -> vector<16x16xf32>
    %c1_83 = arith.constant 1 : index
    %c0_84 = arith.constant 0 : index
    %c0_85 = arith.constant 0 : index
    %c0_86 = arith.constant 0 : index
    %126 = vector.load %arg3[%c1_83, %c0_84, %c0_85, %c0_86] : memref<2x2x32x16xbf16, #tpu.memory_space<vmem>>, vector<1x1x32x16xbf16>
    %127 = vector.shape_cast %126 : vector<1x1x32x16xbf16> to vector<32x16xbf16>
    %cst_87 = arith.constant dense<0.000000e+00> : vector<16x16xf32>
    %128 = tpu.matmul %122, %127, %cst_87 {dimension_numbers = #tpu.dot_dimension_numbers<[1], [0], [0], [1], [0, 0, 1, 1], [], []>} : vector<16x32xbf16>, vector<32x16xbf16>, vector<16x16xf32> -> vector<16x16xf32>
    %c1_88 = arith.constant 1 : index
    %c0_89 = arith.constant 0 : index
    %c0_90 = arith.constant 0 : index
    %c0_91 = arith.constant 0 : index
    %129 = vector.load %arg4[%c1_88, %c0_89, %c0_90, %c0_91] : memref<2x2x32x16xbf16, #tpu.memory_space<vmem>>, vector<1x1x32x16xbf16>
    %130 = vector.shape_cast %129 : vector<1x1x32x16xbf16> to vector<32x16xbf16>
    %cst_92 = arith.constant dense<0.000000e+00> : vector<16x16xf32>
    %131 = tpu.matmul %122, %130, %cst_92 {dimension_numbers = #tpu.dot_dimension_numbers<[1], [0], [0], [1], [0, 0, 1, 1], [], []>} : vector<16x32xbf16>, vector<32x16xbf16>, vector<16x16xf32> -> vector<16x16xf32>
    %132 = vector.shape_cast %125 : vector<16x16xf32> to vector<2x8x16xf32>
    %133 = vector.shape_cast %128 : vector<16x16xf32> to vector<2x8x16xf32>
    %134 = vector.shape_cast %131 : vector<16x16xf32> to vector<2x8x16xf32>
    "tpu.trace_start"() <{level = 10 : i32, message = "bqd,bkd->bqk"}> : () -> ()
    %cst_93 = arith.constant dense<0.000000e+00> : vector<2x8x8xf32>
    %135 = tpu.matmul %132, %133, %cst_93 {dimension_numbers = #tpu.dot_dimension_numbers<[2], [2], [1], [1], [0, 0, 0, 1, 1, 1], [0], [0]>} : vector<2x8x16xf32>, vector<2x8x16xf32>, vector<2x8x8xf32> -> vector<2x8x8xf32>
    "tpu.trace_stop"() : () -> ()
    %cst_94 = arith.constant dense<0xFF800000> : vector<2x8xf32>
    %136 = vector.multi_reduction <maximumf>, %135, %cst_94 [2] : vector<2x8x8xf32> to vector<2x8xf32>
    %137 = vector.shape_cast %136 : vector<2x8xf32> to vector<2x8x1xf32>
    %138 = vector.broadcast %137 : vector<2x8x1xf32> to vector<2x8x8xf32>
    %139 = arith.subf %135, %138 : vector<2x8x8xf32>
    %140 = math.exp %139 : vector<2x8x8xf32>
    %cst_95 = arith.constant dense<0.000000e+00> : vector<2x8xf32>
    %141 = vector.multi_reduction <add>, %140, %cst_95 [2] : vector<2x8x8xf32> to vector<2x8xf32>
    %142 = vector.shape_cast %141 : vector<2x8xf32> to vector<2x8x1xf32>
    %143 = tpu.reciprocal %142 {approx = true} : vector<2x8x1xf32> -> vector<2x8x1xf32>
    %144 = vector.broadcast %143 : vector<2x8x1xf32> to vector<2x8x8xf32>
    %145 = arith.mulf %140, %144 : vector<2x8x8xf32>
    "tpu.trace_start"() <{level = 10 : i32, message = "bqk,bkd->bqd"}> : () -> ()
    %cst_96 = arith.constant dense<0.000000e+00> : vector<2x8x16xf32>
    %146 = tpu.matmul %145, %134, %cst_96 {dimension_numbers = #tpu.dot_dimension_numbers<[2], [1], [1], [2], [0, 0, 0, 1, 1, 2], [0], [0]>} : vector<2x8x8xf32>, vector<2x8x16xf32>, vector<2x8x16xf32> -> vector<2x8x16xf32>
    "tpu.trace_stop"() : () -> ()
    %147 = vector.shape_cast %146 : vector<2x8x16xf32> to vector<16x16xf32>
    %148 = arith.truncf %147 : vector<16x16xf32> to vector<16x16xbf16>
    %c1_97 = arith.constant 1 : index
    %c0_98 = arith.constant 0 : index
    %c0_99 = arith.constant 0 : index
    %c0_100 = arith.constant 0 : index
    %149 = vector.load %arg5[%c1_97, %c0_98, %c0_99, %c0_100] : memref<2x2x16x32xbf16, #tpu.memory_space<vmem>>, vector<1x1x16x32xbf16>
    %150 = vector.shape_cast %149 : vector<1x1x16x32xbf16> to vector<16x32xbf16>
    %cst_101 = arith.constant dense<0.000000e+00> : vector<16x32xf32>
    %151 = tpu.matmul %148, %150, %cst_101 {dimension_numbers = #tpu.dot_dimension_numbers<[1], [0], [0], [1], [0, 0, 1, 1], [], []>} : vector<16x16xbf16>, vector<16x32xbf16>, vector<16x32xf32> -> vector<16x32xf32>
    %152 = arith.addf %121, %151 : vector<16x32xf32>
    %c1_102 = arith.constant 1 : index
    %c1_103 = arith.constant 1 : index
    %c0_104 = arith.constant 0 : index
    %c0_105 = arith.constant 0 : index
    %153 = vector.load %arg2[%c1_102, %c1_103, %c0_104, %c0_105] : memref<2x2x32x16xbf16, #tpu.memory_space<vmem>>, vector<1x1x32x16xbf16>
    %154 = vector.shape_cast %153 : vector<1x1x32x16xbf16> to vector<32x16xbf16>
    %cst_106 = arith.constant dense<0.000000e+00> : vector<16x16xf32>
    %155 = tpu.matmul %122, %154, %cst_106 {dimension_numbers = #tpu.dot_dimension_numbers<[1], [0], [0], [1], [0, 0, 1, 1], [], []>} : vector<16x32xbf16>, vector<32x16xbf16>, vector<16x16xf32> -> vector<16x16xf32>
    %c1_107 = arith.constant 1 : index
    %c1_108 = arith.constant 1 : index
    %c0_109 = arith.constant 0 : index
    %c0_110 = arith.constant 0 : index
    %156 = vector.load %arg3[%c1_107, %c1_108, %c0_109, %c0_110] : memref<2x2x32x16xbf16, #tpu.memory_space<vmem>>, vector<1x1x32x16xbf16>
    %157 = vector.shape_cast %156 : vector<1x1x32x16xbf16> to vector<32x16xbf16>
    %cst_111 = arith.constant dense<0.000000e+00> : vector<16x16xf32>
    %158 = tpu.matmul %122, %157, %cst_111 {dimension_numbers = #tpu.dot_dimension_numbers<[1], [0], [0], [1], [0, 0, 1, 1], [], []>} : vector<16x32xbf16>, vector<32x16xbf16>, vector<16x16xf32> -> vector<16x16xf32>
    %c1_112 = arith.constant 1 : index
    %c1_113 = arith.constant 1 : index
    %c0_114 = arith.constant 0 : index
    %c0_115 = arith.constant 0 : index
    %159 = vector.load %arg4[%c1_112, %c1_113, %c0_114, %c0_115] : memref<2x2x32x16xbf16, #tpu.memory_space<vmem>>, vector<1x1x32x16xbf16>
    %160 = vector.shape_cast %159 : vector<1x1x32x16xbf16> to vector<32x16xbf16>
    %cst_116 = arith.constant dense<0.000000e+00> : vector<16x16xf32>
    %161 = tpu.matmul %122, %160, %cst_116 {dimension_numbers = #tpu.dot_dimension_numbers<[1], [0], [0], [1], [0, 0, 1, 1], [], []>} : vector<16x32xbf16>, vector<32x16xbf16>, vector<16x16xf32> -> vector<16x16xf32>
    %162 = vector.shape_cast %155 : vector<16x16xf32> to vector<2x8x16xf32>
    %163 = vector.shape_cast %158 : vector<16x16xf32> to vector<2x8x16xf32>
    %164 = vector.shape_cast %161 : vector<16x16xf32> to vector<2x8x16xf32>
    "tpu.trace_start"() <{level = 10 : i32, message = "bqd,bkd->bqk"}> : () -> ()
    %cst_117 = arith.constant dense<0.000000e+00> : vector<2x8x8xf32>
    %165 = tpu.matmul %162, %163, %cst_117 {dimension_numbers = #tpu.dot_dimension_numbers<[2], [2], [1], [1], [0, 0, 0, 1, 1, 1], [0], [0]>} : vector<2x8x16xf32>, vector<2x8x16xf32>, vector<2x8x8xf32> -> vector<2x8x8xf32>
    "tpu.trace_stop"() : () -> ()
    %cst_118 = arith.constant dense<0xFF800000> : vector<2x8xf32>
    %166 = vector.multi_reduction <maximumf>, %165, %cst_118 [2] : vector<2x8x8xf32> to vector<2x8xf32>
    %167 = vector.shape_cast %166 : vector<2x8xf32> to vector<2x8x1xf32>
    %168 = vector.broadcast %167 : vector<2x8x1xf32> to vector<2x8x8xf32>
    %169 = arith.subf %165, %168 : vector<2x8x8xf32>
    %170 = math.exp %169 : vector<2x8x8xf32>
    %cst_119 = arith.constant dense<0.000000e+00> : vector<2x8xf32>
    %171 = vector.multi_reduction <add>, %170, %cst_119 [2] : vector<2x8x8xf32> to vector<2x8xf32>
    %172 = vector.shape_cast %171 : vector<2x8xf32> to vector<2x8x1xf32>
    %173 = tpu.reciprocal %172 {approx = true} : vector<2x8x1xf32> -> vector<2x8x1xf32>
    %174 = vector.broadcast %173 : vector<2x8x1xf32> to vector<2x8x8xf32>
    %175 = arith.mulf %170, %174 : vector<2x8x8xf32>
    "tpu.trace_start"() <{level = 10 : i32, message = "bqk,bkd->bqd"}> : () -> ()
    %cst_120 = arith.constant dense<0.000000e+00> : vector<2x8x16xf32>
    %176 = tpu.matmul %175, %164, %cst_120 {dimension_numbers = #tpu.dot_dimension_numbers<[2], [1], [1], [2], [0, 0, 0, 1, 1, 2], [0], [0]>} : vector<2x8x8xf32>, vector<2x8x16xf32>, vector<2x8x16xf32> -> vector<2x8x16xf32>
    "tpu.trace_stop"() : () -> ()
    %177 = vector.shape_cast %176 : vector<2x8x16xf32> to vector<16x16xf32>
    %178 = arith.truncf %177 : vector<16x16xf32> to vector<16x16xbf16>
    %c1_121 = arith.constant 1 : index
    %c1_122 = arith.constant 1 : index
    %c0_123 = arith.constant 0 : index
    %c0_124 = arith.constant 0 : index
    %179 = vector.load %arg5[%c1_121, %c1_122, %c0_123, %c0_124] : memref<2x2x16x32xbf16, #tpu.memory_space<vmem>>, vector<1x1x16x32xbf16>
    %180 = vector.shape_cast %179 : vector<1x1x16x32xbf16> to vector<16x32xbf16>
    %cst_125 = arith.constant dense<0.000000e+00> : vector<16x32xf32>
    %181 = tpu.matmul %178, %180, %cst_125 {dimension_numbers = #tpu.dot_dimension_numbers<[1], [0], [0], [1], [0, 0, 1, 1], [], []>} : vector<16x16xbf16>, vector<16x32xbf16>, vector<16x32xf32> -> vector<16x32xf32>
    %182 = arith.addf %152, %181 : vector<16x32xf32>
    %183 = arith.truncf %182 : vector<16x32xf32> to vector<16x32xbf16>
    %c1_126 = arith.constant 1 : index
    %c0_127 = arith.constant 0 : index
    %c0_128 = arith.constant 0 : index
    %184 = vector.load %arg6[%c1_126, %c0_127, %c0_128] : memref<2x32x128xbf16, #tpu.memory_space<vmem>>, vector<1x32x128xbf16>
    %185 = vector.shape_cast %184 : vector<1x32x128xbf16> to vector<32x128xbf16>
    %cst_129 = arith.constant dense<0.000000e+00> : vector<16x128xf32>
    %186 = tpu.matmul %183, %185, %cst_129 {dimension_numbers = #tpu.dot_dimension_numbers<[1], [0], [0], [1], [0, 0, 1, 1], [], []>} : vector<16x32xbf16>, vector<32x128xbf16>, vector<16x128xf32> -> vector<16x128xf32>
    %c1_130 = arith.constant 1 : index
    %c0_131 = arith.constant 0 : index
    %c0_132 = arith.constant 0 : index
    %187 = vector.load %arg7[%c1_130, %c0_131, %c0_132] : memref<2x1x128xf32, #tpu.memory_space<vmem>>, vector<1x1x128xf32>
    %188 = vector.shape_cast %187 : vector<1x1x128xf32> to vector<1x128xf32>
    %189 = vector.broadcast %188 : vector<1x128xf32> to vector<16x128xf32>
    %190 = arith.addf %186, %189 : vector<16x128xf32>
    %cst_133 = arith.constant 5.000000e-01 : f32
    %191 = vector.broadcast %cst_133 : f32 to vector<16x128xf32>
    %192 = arith.mulf %191, %190 : vector<16x128xf32>
    %cst_134 = arith.constant 0.707106769 : f32
    %193 = vector.broadcast %cst_134 : f32 to vector<16x128xf32>
    %194 = arith.mulf %190, %193 : vector<16x128xf32>
    %cst_135 = arith.constant 0.000000e+00 : f32
    %195 = vector.broadcast %cst_135 : f32 to vector<16x128xf32>
    %196 = arith.cmpf oge, %194, %195 : vector<16x128xf32>
    %cst_136 = arith.constant 1.000000e+00 : f32
    %cst_137 = arith.constant -1.000000e+00 : f32
    %197 = vector.broadcast %cst_136 : f32 to vector<16x128xf32>
    %198 = vector.broadcast %cst_137 : f32 to vector<16x128xf32>
    %199 = arith.select %196, %197, %198 : vector<16x128xi1>, vector<16x128xf32>
    %200 = math.absf %194 : vector<16x128xf32>
    %cst_138 = arith.constant 0.327591091 : f32
    %201 = vector.broadcast %cst_138 : f32 to vector<16x128xf32>
    %202 = arith.mulf %201, %200 : vector<16x128xf32>
    %cst_139 = arith.constant 1.000000e+00 : f32
    %203 = vector.broadcast %cst_139 : f32 to vector<16x128xf32>
    %204 = arith.addf %203, %202 : vector<16x128xf32>
    %cst_140 = arith.constant 1.000000e+00 : f32
    %205 = vector.broadcast %cst_140 : f32 to vector<16x128xf32>
    %206 = arith.divf %205, %204 : vector<16x128xf32>
    %cst_141 = arith.constant 1.06140542 : f32
    %207 = vector.broadcast %cst_141 : f32 to vector<16x128xf32>
    %208 = arith.mulf %207, %206 : vector<16x128xf32>
    %cst_142 = arith.constant -1.45315206 : f32
    %209 = vector.broadcast %cst_142 : f32 to vector<16x128xf32>
    %210 = arith.addf %208, %209 : vector<16x128xf32>
    %211 = arith.mulf %210, %206 : vector<16x128xf32>
    %cst_143 = arith.constant 1.42141378 : f32
    %212 = vector.broadcast %cst_143 : f32 to vector<16x128xf32>
    %213 = arith.addf %211, %212 : vector<16x128xf32>
    %214 = arith.mulf %213, %206 : vector<16x128xf32>
    %cst_144 = arith.constant -0.284496725 : f32
    %215 = vector.broadcast %cst_144 : f32 to vector<16x128xf32>
    %216 = arith.addf %214, %215 : vector<16x128xf32>
    %217 = arith.mulf %216, %206 : vector<16x128xf32>
    %cst_145 = arith.constant 0.254829586 : f32
    %218 = vector.broadcast %cst_145 : f32 to vector<16x128xf32>
    %219 = arith.addf %217, %218 : vector<16x128xf32>
    %220 = arith.mulf %219, %206 : vector<16x128xf32>
    %cst_146 = arith.constant 0.000000e+00 : f32
    %221 = vector.broadcast %cst_146 : f32 to vector<16x128xf32>
    %222 = arith.subf %221, %200 : vector<16x128xf32>
    %223 = arith.mulf %222, %200 : vector<16x128xf32>
    %224 = math.exp %223 : vector<16x128xf32>
    %225 = arith.mulf %220, %224 : vector<16x128xf32>
    %cst_147 = arith.constant 1.000000e+00 : f32
    %226 = vector.broadcast %cst_147 : f32 to vector<16x128xf32>
    %227 = arith.subf %226, %225 : vector<16x128xf32>
    %228 = arith.mulf %199, %227 : vector<16x128xf32>
    %cst_148 = arith.constant 1.000000e+00 : f32
    %229 = vector.broadcast %cst_148 : f32 to vector<16x128xf32>
    %230 = arith.addf %229, %228 : vector<16x128xf32>
    %231 = arith.mulf %192, %230 : vector<16x128xf32>
    %232 = arith.truncf %231 : vector<16x128xf32> to vector<16x128xbf16>
    %c1_149 = arith.constant 1 : index
    %c0_150 = arith.constant 0 : index
    %c0_151 = arith.constant 0 : index
    %233 = vector.load %arg8[%c1_149, %c0_150, %c0_151] : memref<2x128x32xbf16, #tpu.memory_space<vmem>>, vector<1x128x32xbf16>
    %234 = vector.shape_cast %233 : vector<1x128x32xbf16> to vector<128x32xbf16>
    %cst_152 = arith.constant dense<0.000000e+00> : vector<16x32xf32>
    %235 = tpu.matmul %232, %234, %cst_152 {dimension_numbers = #tpu.dot_dimension_numbers<[1], [0], [0], [1], [0, 0, 1, 1], [], []>} : vector<16x128xbf16>, vector<128x32xbf16>, vector<16x32xf32> -> vector<16x32xf32>
    %c1_153 = arith.constant 1 : index
    %c0_154 = arith.constant 0 : index
    %c0_155 = arith.constant 0 : index
    %236 = vector.load %arg9[%c1_153, %c0_154, %c0_155] : memref<2x1x32xf32, #tpu.memory_space<vmem>>, vector<1x1x32xf32>
    %237 = vector.shape_cast %236 : vector<1x1x32xf32> to vector<1x32xf32>
    %238 = vector.broadcast %237 : vector<1x32xf32> to vector<16x32xf32>
    %239 = arith.addf %235, %238 : vector<16x32xf32>
    %240 = arith.addf %182, %239 : vector<16x32xf32>
    %241 = arith.truncf %240 : vector<16x32xf32> to vector<16x32xbf16>
    %c0_156 = arith.constant 0 : index
    %c0_157 = arith.constant 0 : index
    %242 = vector.load %arg10[%c0_156, %c0_157] : memref<32x128xbf16, #tpu.memory_space<vmem>>, vector<32x128xbf16>
    %cst_158 = arith.constant dense<0.000000e+00> : vector<16x128xf32>
    %243 = tpu.matmul %241, %242, %cst_158 {dimension_numbers = #tpu.dot_dimension_numbers<[1], [0], [0], [1], [0, 0, 1, 1], [], []>} : vector<16x32xbf16>, vector<32x128xbf16>, vector<16x128xf32> -> vector<16x128xf32>
    %c0_159 = arith.constant 0 : index
    %c0_160 = arith.constant 0 : index
    %244 = vector.load %arg11[%c0_159, %c0_160] : memref<1x128xf32, #tpu.memory_space<vmem>>, vector<1x128xf32>
    %245 = vector.broadcast %244 : vector<1x128xf32> to vector<16x128xf32>
    %246 = arith.addf %243, %245 : vector<16x128xf32>
    %cst_161 = arith.constant dense<0xFF800000> : vector<16xf32>
    %247 = vector.multi_reduction <maximumf>, %246, %cst_161 [1] : vector<16x128xf32> to vector<16xf32>
    %248 = vector.shape_cast %247 : vector<16xf32> to vector<16x1xf32>
    %249 = vector.broadcast %248 : vector<16x1xf32> to vector<16x128xf32>
    %250 = arith.subf %246, %249 : vector<16x128xf32>
    %251 = math.exp %250 : vector<16x128xf32>
    %cst_162 = arith.constant dense<0.000000e+00> : vector<16xf32>
    %252 = vector.multi_reduction <add>, %251, %cst_162 [1] : vector<16x128xf32> to vector<16xf32>
    %253 = vector.shape_cast %252 : vector<16xf32> to vector<16x1xf32>
    %254 = math.log %253 : vector<16x1xf32>
    %255 = vector.broadcast %254 : vector<16x1xf32> to vector<16x128xf32>
    %256 = arith.subf %250, %255 : vector<16x128xf32>
    %257 = vector.shape_cast %256 : vector<16x128xf32> to vector<2x8x128xf32>
    %c0_163 = arith.constant 0 : index
    %c0_164 = arith.constant 0 : index
    %c0_165 = arith.constant 0 : index
    %258 = vector.load %arg12[%c0_163, %c0_164, %c0_165] : memref<2x8x128xf32, #tpu.memory_space<vmem>>, vector<2x8x128xf32>
    tpu.vector_store %arg12[%c0_163, %c0_164, %c0_165], %257 {strides = array<i32>} : memref<2x8x128xf32, #tpu.memory_space<vmem>>, vector<2x8x128xf32>,
    return
  }
  func.func @transform_0(%arg0: i32) -> (i32, i32, i32) {
    %c0_i32 = arith.constant 0 : i32
    %c0_i32_0 = arith.constant 0 : i32
    %c0_i32_1 = arith.constant 0 : i32
    return %arg0, %c0_i32, %c0_i32_0 : i32, i32, i32
  }
  func.func @transform_1(%arg0: i32) -> (i32, i32, i32, i32) {
    %c0_i32 = arith.constant 0 : i32
    %c0_i32_0 = arith.constant 0 : i32
    %c0_i32_1 = arith.constant 0 : i32
    %c0_i32_2 = arith.constant 0 : i32
    %c0_i32_3 = arith.constant 0 : i32
    return %c0_i32, %c0_i32_0, %c0_i32_1, %c0_i32_2 : i32, i32, i32, i32
  }
  func.func @transform_2(%arg0: i32) -> (i32, i32, i32, i32) {
    %c0_i32 = arith.constant 0 : i32
    %c0_i32_0 = arith.constant 0 : i32
    %c0_i32_1 = arith.constant 0 : i32
    %c0_i32_2 = arith.constant 0 : i32
    %c0_i32_3 = arith.constant 0 : i32
    return %c0_i32, %c0_i32_0, %c0_i32_1, %c0_i32_2 : i32, i32, i32, i32
  }
  func.func @transform_3(%arg0: i32) -> (i32, i32, i32, i32) {
    %c0_i32 = arith.constant 0 : i32
    %c0_i32_0 = arith.constant 0 : i32
    %c0_i32_1 = arith.constant 0 : i32
    %c0_i32_2 = arith.constant 0 : i32
    %c0_i32_3 = arith.constant 0 : i32
    return %c0_i32, %c0_i32_0, %c0_i32_1, %c0_i32_2 : i32, i32, i32, i32
  }
  func.func @transform_4(%arg0: i32) -> (i32, i32, i32, i32) {
    %c0_i32 = arith.constant 0 : i32
    %c0_i32_0 = arith.constant 0 : i32
    %c0_i32_1 = arith.constant 0 : i32
    %c0_i32_2 = arith.constant 0 : i32
    %c0_i32_3 = arith.constant 0 : i32
    return %c0_i32, %c0_i32_0, %c0_i32_1, %c0_i32_2 : i32, i32, i32, i32
  }
  func.func @transform_5(%arg0: i32) -> (i32, i32, i32) {
    %c0_i32 = arith.constant 0 : i32
    %c0_i32_0 = arith.constant 0 : i32
    %c0_i32_1 = arith.constant 0 : i32
    %c0_i32_2 = arith.constant 0 : i32
    return %c0_i32, %c0_i32_0, %c0_i32_1 : i32, i32, i32
  }
  func.func @transform_6(%arg0: i32) -> (i32, i32, i32) {
    %c0_i32 = arith.constant 0 : i32
    %c0_i32_0 = arith.constant 0 : i32
    %c0_i32_1 = arith.constant 0 : i32
    %c0_i32_2 = arith.constant 0 : i32
    return %c0_i32, %c0_i32_0, %c0_i32_1 : i32, i32, i32
  }
  func.func @transform_7(%arg0: i32) -> (i32, i32, i32) {
    %c0_i32 = arith.constant 0 : i32
    %c0_i32_0 = arith.constant 0 : i32
    %c0_i32_1 = arith.constant 0 : i32
    %c0_i32_2 = arith.constant 0 : i32
    return %c0_i32, %c0_i32_0, %c0_i32_1 : i32, i32, i32
  }
  func.func @transform_8(%arg0: i32) -> (i32, i32, i32) {
    %c0_i32 = arith.constant 0 : i32
    %c0_i32_0 = arith.constant 0 : i32
    %c0_i32_1 = arith.constant 0 : i32
    %c0_i32_2 = arith.constant 0 : i32
    return %c0_i32, %c0_i32_0, %c0_i32_1 : i32, i32, i32
  }
  func.func @transform_9(%arg0: i32) -> (i32, i32) {
    %c0_i32 = arith.constant 0 : i32
    %c0_i32_0 = arith.constant 0 : i32
    %c0_i32_1 = arith.constant 0 : i32
    return %c0_i32, %c0_i32_0 : i32, i32
  }
  func.func @transform_10(%arg0: i32) -> (i32, i32) {
    %c0_i32 = arith.constant 0 : i32
    %c0_i32_0 = arith.constant 0 : i32
    %c0_i32_1 = arith.constant 0 : i32
    return %c0_i32, %c0_i32_0 : i32, i32
  }
  func.func @transform_11(%arg0: i32) -> (i32, i32, i32) {
    %c0_i32 = arith.constant 0 : i32
    %c0_i32_0 = arith.constant 0 : i32
    %c0_i32_1 = arith.constant 0 : i32
    return %arg0, %c0_i32, %c0_i32_0 : i32, i32, i32
  }
}

module attributes {stable_mosaic.version = 11 : i64} {
  func.func @decoder_kernel(%arg0: i32, %arg1: memref<2x8x32xbf16, #tpu.memory_space<vmem>>, %arg2: memref<2x2x32x16xbf16, #tpu.memory_space<vmem>>, %arg3: memref<2x2x32x16xbf16, #tpu.memory_space<vmem>>, %arg4: memref<2x2x32x16xbf16, #tpu.memory_space<vmem>>, %arg5: memref<2x2x16x32xbf16, #tpu.memory_space<vmem>>, %arg6: memref<2x32x128xbf16, #tpu.memory_space<vmem>>, %arg7: memref<2x1x128xf32, #tpu.memory_space<vmem>>, %arg8: memref<2x128x32xbf16, #tpu.memory_space<vmem>>, %arg9: memref<2x1x32xf32, #tpu.memory_space<vmem>>, %arg10: memref<32x128xbf16, #tpu.memory_space<vmem>>, %arg11: memref<1x128xf32, #tpu.memory_space<vmem>>, %arg12: memref<2x8x128xf32, #tpu.memory_space<vmem>>) attributes {dimension_semantics = [#tpu.dimension_semantics<arbitrary>], iteration_bounds = array<i64: 1>, scalar_prefetch = 0 : i64, scratch_operands = 0 : i64, tpu.core_type = #tpu.core_type<tc>, window_params = [{transform_indices = @transform_0, window_bounds = array<i64: 2, 8, 32>}, {pipeline_mode = #tpu.pipeline_mode<synchronous>, transform_indices = @transform_1, window_bounds = array<i64: 2, 2, 32, 16>}, {pipeline_mode = #tpu.pipeline_mode<synchronous>, transform_indices = @transform_2, window_bounds = array<i64: 2, 2, 32, 16>}, {pipeline_mode = #tpu.pipeline_mode<synchronous>, transform_indices = @transform_3, window_bounds = array<i64: 2, 2, 32, 16>}, {pipeline_mode = #tpu.pipeline_mode<synchronous>, transform_indices = @transform_4, window_bounds = array<i64: 2, 2, 16, 32>}, {pipeline_mode = #tpu.pipeline_mode<synchronous>, transform_indices = @transform_5, window_bounds = array<i64: 2, 32, 128>}, {pipeline_mode = #tpu.pipeline_mode<synchronous>, transform_indices = @transform_6, window_bounds = array<i64: 2, 1, 128>}, {pipeline_mode = #tpu.pipeline_mode<synchronous>, transform_indices = @transform_7, window_bounds = array<i64: 2, 128, 32>}, {pipeline_mode = #tpu.pipeline_mode<synchronous>, transform_indices = @transform_8, window_bounds = array<i64: 2, 1, 32>}, {pipeline_mode = #tpu.pipeline_mode<synchronous>, transform_indices = @transform_9, window_bounds = array<i64: 32, 128>}, {pipeline_mode = #tpu.pipeline_mode<synchronous>, transform_indices = @transform_10, window_bounds = array<i64: 1, 128>}, {transform_indices = @transform_11, window_bounds = array<i64: 2, 8, 128>}]} {
    %c0 = arith.constant 0 : index
    %c0_0 = arith.constant 0 : index
    %c0_1 = arith.constant 0 : index
    %0 = vector.load %arg1[%c0, %c0_0, %c0_1] : memref<2x8x32xbf16, #tpu.memory_space<vmem>>, vector<2x8x32xbf16>
    %1 = vector.shape_cast %0 : vector<2x8x32xbf16> to vector<16x32xbf16>
    %2 = arith.extf %1 : vector<16x32xbf16> to vector<16x32xf32>
    %3 = arith.truncf %2 : vector<16x32xf32> to vector<16x32xbf16>
    %c0_2 = arith.constant 0 : index
    %c0_3 = arith.constant 0 : index
    %c0_4 = arith.constant 0 : index
    %c0_5 = arith.constant 0 : index
    %4 = vector.load %arg2[%c0_2, %c0_3, %c0_4, %c0_5] : memref<2x2x32x16xbf16, #tpu.memory_space<vmem>>, vector<1x1x32x16xbf16>
    %5 = vector.shape_cast %4 : vector<1x1x32x16xbf16> to vector<32x16xbf16>
    %cst = arith.constant dense<0.000000e+00> : vector<16x16xf32>
    %6 = tpu.matmul %3, %5, %cst {dimension_numbers = #tpu.dot_dimension_numbers<[1], [0], [0], [1], [0, 0, 1, 1], [], []>} : vector<16x32xbf16>, vector<32x16xbf16>, vector<16x16xf32> -> vector<16x16xf32>
    %c0_6 = arith.constant 0 : index
    %c0_7 = arith.constant 0 : index
    %c0_8 = arith.constant 0 : index
    %c0_9 = arith.constant 0 : index
    %7 = vector.load %arg3[%c0_6, %c0_7, %c0_8, %c0_9] : memref<2x2x32x16xbf16, #tpu.memory_space<vmem>>, vector<1x1x32x16xbf16>
    %8 = vector.shape_cast %7 : vector<1x1x32x16xbf16> to vector<32x16xbf16>
    %cst_10 = arith.constant dense<0.000000e+00> : vector<16x16xf32>
    %9 = tpu.matmul %3, %8, %cst_10 {dimension_numbers = #tpu.dot_dimension_numbers<[1], [0], [0], [1], [0, 0, 1, 1], [], []>} : vector<16x32xbf16>, vector<32x16xbf16>, vector<16x16xf32> -> vector<16x16xf32>
    %c0_11 = arith.constant 0 : index
    %c0_12 = arith.constant 0 : index
    %c0_13 = arith.constant 0 : index
    %c0_14 = arith.constant 0 : index
    %10 = vector.load %arg4[%c0_11, %c0_12, %c0_13, %c0_14] : memref<2x2x32x16xbf16, #tpu.memory_space<vmem>>, vector<1x1x32x16xbf16>
    %11 = vector.shape_cast %10 : vector<1x1x32x16xbf16> to vector<32x16xbf16>
    %cst_15 = arith.constant dense<0.000000e+00> : vector<16x16xf32>
    %12 = tpu.matmul %3, %11, %cst_15 {dimension_numbers = #tpu.dot_dimension_numbers<[1], [0], [0], [1], [0, 0, 1, 1], [], []>} : vector<16x32xbf16>, vector<32x16xbf16>, vector<16x16xf32> -> vector<16x16xf32>
    %13 = vector.shape_cast %6 : vector<16x16xf32> to vector<2x8x16xf32>
    %14 = vector.shape_cast %9 : vector<16x16xf32> to vector<2x8x16xf32>
    %15 = vector.shape_cast %12 : vector<16x16xf32> to vector<2x8x16xf32>
    "tpu.trace_start"() <{level = 10 : i32, message = "bqd,bkd->bqk"}> : () -> ()
    %cst_16 = arith.constant dense<0.000000e+00> : vector<2x8x8xf32>
    %16 = tpu.matmul %13, %14, %cst_16 {dimension_numbers = #tpu.dot_dimension_numbers<[2], [2], [1], [1], [0, 0, 0, 1, 1, 1], [0], [0]>} : vector<2x8x16xf32>, vector<2x8x16xf32>, vector<2x8x8xf32> -> vector<2x8x8xf32>
    "tpu.trace_stop"() : () -> ()
    %cst_17 = arith.constant dense<0xFF800000> : vector<2x8xf32>
    %17 = vector.multi_reduction <maximumf>, %16, %cst_17 [2] : vector<2x8x8xf32> to vector<2x8xf32>
    %18 = vector.shape_cast %17 : vector<2x8xf32> to vector<2x8x1xf32>
    %19 = vector.broadcast %18 : vector<2x8x1xf32> to vector<2x8x8xf32>
    %20 = arith.subf %16, %19 : vector<2x8x8xf32>
    %21 = math.exp %20 : vector<2x8x8xf32>
    %cst_18 = arith.constant dense<0.000000e+00> : vector<2x8xf32>
    %22 = vector.multi_reduction <add>, %21, %cst_18 [2] : vector<2x8x8xf32> to vector<2x8xf32>
    %23 = vector.shape_cast %22 : vector<2x8xf32> to vector<2x8x1xf32>
    %24 = tpu.reciprocal %23 {approx = true} : vector<2x8x1xf32> -> vector<2x8x1xf32>
    %25 = vector.broadcast %24 : vector<2x8x1xf32> to vector<2x8x8xf32>
    %26 = arith.mulf %21, %25 : vector<2x8x8xf32>
    "tpu.trace_start"() <{level = 10 : i32, message = "bqk,bkd->bqd"}> : () -> ()
    %cst_19 = arith.constant dense<0.000000e+00> : vector<2x8x16xf32>
    %27 = tpu.matmul %26, %15, %cst_19 {dimension_numbers = #tpu.dot_dimension_numbers<[2], [1], [1], [2], [0, 0, 0, 1, 1, 2], [0], [0]>} : vector<2x8x8xf32>, vector<2x8x16xf32>, vector<2x8x16xf32> -> vector<2x8x16xf32>
    "tpu.trace_stop"() : () -> ()
    %28 = vector.shape_cast %27 : vector<2x8x16xf32> to vector<16x16xf32>
    %29 = arith.truncf %28 : vector<16x16xf32> to vector<16x16xbf16>
    %c0_20 = arith.constant 0 : index
    %c0_21 = arith.constant 0 : index
    %c0_22 = arith.constant 0 : index
    %c0_23 = arith.constant 0 : index
    %30 = vector.load %arg5[%c0_20, %c0_21, %c0_22, %c0_23] : memref<2x2x16x32xbf16, #tpu.memory_space<vmem>>, vector<1x1x16x32xbf16>
    %31 = vector.shape_cast %30 : vector<1x1x16x32xbf16> to vector<16x32xbf16>
    %cst_24 = arith.constant dense<0.000000e+00> : vector<16x32xf32>
    %32 = tpu.matmul %29, %31, %cst_24 {dimension_numbers = #tpu.dot_dimension_numbers<[1], [0], [0], [1], [0, 0, 1, 1], [], []>} : vector<16x16xbf16>, vector<16x32xbf16>, vector<16x32xf32> -> vector<16x32xf32>
    %33 = arith.addf %2, %32 : vector<16x32xf32>
    %c0_25 = arith.constant 0 : index
    %c1 = arith.constant 1 : index
    %c0_26 = arith.constant 0 : index
    %c0_27 = arith.constant 0 : index
    %34 = vector.load %arg2[%c0_25, %c1, %c0_26, %c0_27] : memref<2x2x32x16xbf16, #tpu.memory_space<vmem>>, vector<1x1x32x16xbf16>
    %35 = vector.shape_cast %34 : vector<1x1x32x16xbf16> to vector<32x16xbf16>
    %cst_28 = arith.constant dense<0.000000e+00> : vector<16x16xf32>
    %36 = tpu.matmul %3, %35, %cst_28 {dimension_numbers = #tpu.dot_dimension_numbers<[1], [0], [0], [1], [0, 0, 1, 1], [], []>} : vector<16x32xbf16>, vector<32x16xbf16>, vector<16x16xf32> -> vector<16x16xf32>
    %c0_29 = arith.constant 0 : index
    %c1_30 = arith.constant 1 : index
    %c0_31 = arith.constant 0 : index
    %c0_32 = arith.constant 0 : index
    %37 = vector.load %arg3[%c0_29, %c1_30, %c0_31, %c0_32] : memref<2x2x32x16xbf16, #tpu.memory_space<vmem>>, vector<1x1x32x16xbf16>
    %38 = vector.shape_cast %37 : vector<1x1x32x16xbf16> to vector<32x16xbf16>
    %cst_33 = arith.constant dense<0.000000e+00> : vector<16x16xf32>
    %39 = tpu.matmul %3, %38, %cst_33 {dimension_numbers = #tpu.dot_dimension_numbers<[1], [0], [0], [1], [0, 0, 1, 1], [], []>} : vector<16x32xbf16>, vector<32x16xbf16>, vector<16x16xf32> -> vector<16x16xf32>
    %c0_34 = arith.constant 0 : index
    %c1_35 = arith.constant 1 : index
    %c0_36 = arith.constant 0 : index
    %c0_37 = arith.constant 0 : index
    %40 = vector.load %arg4[%c0_34, %c1_35, %c0_36, %c0_37] : memref<2x2x32x16xbf16, #tpu.memory_space<vmem>>, vector<1x1x32x16xbf16>
    %41 = vector.shape_cast %40 : vector<1x1x32x16xbf16> to vector<32x16xbf16>
    %cst_38 = arith.constant dense<0.000000e+00> : vector<16x16xf32>
    %42 = tpu.matmul %3, %41, %cst_38 {dimension_numbers = #tpu.dot_dimension_numbers<[1], [0], [0], [1], [0, 0, 1, 1], [], []>} : vector<16x32xbf16>, vector<32x16xbf16>, vector<16x16xf32> -> vector<16x16xf32>
    %43 = vector.shape_cast %36 : vector<16x16xf32> to vector<2x8x16xf32>
    %44 = vector.shape_cast %39 : vector<16x16xf32> to vector<2x8x16xf32>
    %45 = vector.shape_cast %42 : vector<16x16xf32> to vector<2x8x16xf32>
    "tpu.trace_start"() <{level = 10 : i32, message = "bqd,bkd->bqk"}> : () -> ()
    %cst_39 = arith.constant dense<0.000000e+00> : vector<2x8x8xf32>
    %46 = tpu.matmul %43, %44, %cst_39 {dimension_numbers = #tpu.dot_dimension_numbers<[2], [2], [1], [1], [0, 0, 0, 1, 1, 1], [0], [0]>} : vector<2x8x16xf32>, vector<2x8x16xf32>, vector<2x8x8xf32> -> vector<2x8x8xf32>
    "tpu.trace_stop"() : () -> ()
    %cst_40 = arith.constant dense<0xFF800000> : vector<2x8xf32>
    %47 = vector.multi_reduction <maximumf>, %46, %cst_40 [2] : vector<2x8x8xf32> to vector<2x8xf32>
    %48 = vector.shape_cast %47 : vector<2x8xf32> to vector<2x8x1xf32>
    %49 = vector.broadcast %48 : vector<2x8x1xf32> to vector<2x8x8xf32>
    %50 = arith.subf %46, %49 : vector<2x8x8xf32>
    %51 = math.exp %50 : vector<2x8x8xf32>
    %cst_41 = arith.constant dense<0.000000e+00> : vector<2x8xf32>
    %52 = vector.multi_reduction <add>, %51, %cst_41 [2] : vector<2x8x8xf32> to vector<2x8xf32>
    %53 = vector.shape_cast %52 : vector<2x8xf32> to vector<2x8x1xf32>
    %54 = tpu.reciprocal %53 {approx = true} : vector<2x8x1xf32> -> vector<2x8x1xf32>
    %55 = vector.broadcast %54 : vector<2x8x1xf32> to vector<2x8x8xf32>
    %56 = arith.mulf %51, %55 : vector<2x8x8xf32>
    "tpu.trace_start"() <{level = 10 : i32, message = "bqk,bkd->bqd"}> : () -> ()
    %cst_42 = arith.constant dense<0.000000e+00> : vector<2x8x16xf32>
    %57 = tpu.matmul %56, %45, %cst_42 {dimension_numbers = #tpu.dot_dimension_numbers<[2], [1], [1], [2], [0, 0, 0, 1, 1, 2], [0], [0]>} : vector<2x8x8xf32>, vector<2x8x16xf32>, vector<2x8x16xf32> -> vector<2x8x16xf32>
    "tpu.trace_stop"() : () -> ()
    %58 = vector.shape_cast %57 : vector<2x8x16xf32> to vector<16x16xf32>
    %59 = arith.truncf %58 : vector<16x16xf32> to vector<16x16xbf16>
    %c0_43 = arith.constant 0 : index
    %c1_44 = arith.constant 1 : index
    %c0_45 = arith.constant 0 : index
    %c0_46 = arith.constant 0 : index
    %60 = vector.load %arg5[%c0_43, %c1_44, %c0_45, %c0_46] : memref<2x2x16x32xbf16, #tpu.memory_space<vmem>>, vector<1x1x16x32xbf16>
    %61 = vector.shape_cast %60 : vector<1x1x16x32xbf16> to vector<16x32xbf16>
    %cst_47 = arith.constant dense<0.000000e+00> : vector<16x32xf32>
    %62 = tpu.matmul %59, %61, %cst_47 {dimension_numbers = #tpu.dot_dimension_numbers<[1], [0], [0], [1], [0, 0, 1, 1], [], []>} : vector<16x16xbf16>, vector<16x32xbf16>, vector<16x32xf32> -> vector<16x32xf32>
    %63 = arith.addf %33, %62 : vector<16x32xf32>
    %64 = arith.truncf %63 : vector<16x32xf32> to vector<16x32xbf16>
    %c0_48 = arith.constant 0 : index
    %c0_49 = arith.constant 0 : index
    %c0_50 = arith.constant 0 : index
    %65 = vector.load %arg6[%c0_48, %c0_49, %c0_50] : memref<2x32x128xbf16, #tpu.memory_space<vmem>>, vector<1x32x128xbf16>
    %66 = vector.shape_cast %65 : vector<1x32x128xbf16> to vector<32x128xbf16>
    %cst_51 = arith.constant dense<0.000000e+00> : vector<16x128xf32>
    %67 = tpu.matmul %64, %66, %cst_51 {dimension_numbers = #tpu.dot_dimension_numbers<[1], [0], [0], [1], [0, 0, 1, 1], [], []>} : vector<16x32xbf16>, vector<32x128xbf16>, vector<16x128xf32> -> vector<16x128xf32>
    %c0_52 = arith.constant 0 : index
    %c0_53 = arith.constant 0 : index
    %c0_54 = arith.constant 0 : index
    %68 = vector.load %arg7[%c0_52, %c0_53, %c0_54] : memref<2x1x128xf32, #tpu.memory_space<vmem>>, vector<1x1x128xf32>
    %69 = vector.shape_cast %68 : vector<1x1x128xf32> to vector<1x128xf32>
    %70 = vector.broadcast %69 : vector<1x128xf32> to vector<16x128xf32>
    %71 = arith.addf %67, %70 : vector<16x128xf32>
    %cst_55 = arith.constant 5.000000e-01 : f32
    %72 = vector.broadcast %cst_55 : f32 to vector<16x128xf32>
    %73 = arith.mulf %72, %71 : vector<16x128xf32>
    %cst_56 = arith.constant 0.707106769 : f32
    %74 = vector.broadcast %cst_56 : f32 to vector<16x128xf32>
    %75 = arith.mulf %71, %74 : vector<16x128xf32>
    %cst_57 = arith.constant 0.000000e+00 : f32
    %76 = vector.broadcast %cst_57 : f32 to vector<16x128xf32>
    %77 = arith.cmpf oge, %75, %76 : vector<16x128xf32>
    %cst_58 = arith.constant 1.000000e+00 : f32
    %cst_59 = arith.constant -1.000000e+00 : f32
    %78 = vector.broadcast %cst_58 : f32 to vector<16x128xf32>
    %79 = vector.broadcast %cst_59 : f32 to vector<16x128xf32>
    %80 = arith.select %77, %78, %79 : vector<16x128xi1>, vector<16x128xf32>
    %81 = math.absf %75 : vector<16x128xf32>
    %cst_60 = arith.constant 0.327591091 : f32
    %82 = vector.broadcast %cst_60 : f32 to vector<16x128xf32>
    %83 = arith.mulf %82, %81 : vector<16x128xf32>
    %cst_61 = arith.constant 1.000000e+00 : f32
    %84 = vector.broadcast %cst_61 : f32 to vector<16x128xf32>
    %85 = arith.addf %84, %83 : vector<16x128xf32>
    %cst_62 = arith.constant 1.000000e+00 : f32
    %86 = vector.broadcast %cst_62 : f32 to vector<16x128xf32>
    %87 = arith.divf %86, %85 : vector<16x128xf32>
    %cst_63 = arith.constant 1.06140542 : f32
    %88 = vector.broadcast %cst_63 : f32 to vector<16x128xf32>
    %89 = arith.mulf %88, %87 : vector<16x128xf32>
    %cst_64 = arith.constant -1.45315206 : f32
    %90 = vector.broadcast %cst_64 : f32 to vector<16x128xf32>
    %91 = arith.addf %89, %90 : vector<16x128xf32>
    %92 = arith.mulf %91, %87 : vector<16x128xf32>
    %cst_65 = arith.constant 1.42141378 : f32
    %93 = vector.broadcast %cst_65 : f32 to vector<16x128xf32>
    %94 = arith.addf %92, %93 : vector<16x128xf32>
    %95 = arith.mulf %94, %87 : vector<16x128xf32>
    %cst_66 = arith.constant -0.284496725 : f32
    %96 = vector.broadcast %cst_66 : f32 to vector<16x128xf32>
    %97 = arith.addf %95, %96 : vector<16x128xf32>
    %98 = arith.mulf %97, %87 : vector<16x128xf32>
    %cst_67 = arith.constant 0.254829586 : f32
    %99 = vector.broadcast %cst_67 : f32 to vector<16x128xf32>
    %100 = arith.addf %98, %99 : vector<16x128xf32>
    %101 = arith.mulf %100, %87 : vector<16x128xf32>
    %cst_68 = arith.constant 0.000000e+00 : f32
    %102 = vector.broadcast %cst_68 : f32 to vector<16x128xf32>
    %103 = arith.subf %102, %81 : vector<16x128xf32>
    %104 = arith.mulf %103, %81 : vector<16x128xf32>
    %105 = math.exp %104 : vector<16x128xf32>
    %106 = arith.mulf %101, %105 : vector<16x128xf32>
    %cst_69 = arith.constant 1.000000e+00 : f32
    %107 = vector.broadcast %cst_69 : f32 to vector<16x128xf32>
    %108 = arith.subf %107, %106 : vector<16x128xf32>
    %109 = arith.mulf %80, %108 : vector<16x128xf32>
    %cst_70 = arith.constant 1.000000e+00 : f32
    %110 = vector.broadcast %cst_70 : f32 to vector<16x128xf32>
    %111 = arith.addf %110, %109 : vector<16x128xf32>
    %112 = arith.mulf %73, %111 : vector<16x128xf32>
    %113 = arith.truncf %112 : vector<16x128xf32> to vector<16x128xbf16>
    %c0_71 = arith.constant 0 : index
    %c0_72 = arith.constant 0 : index
    %c0_73 = arith.constant 0 : index
    %114 = vector.load %arg8[%c0_71, %c0_72, %c0_73] : memref<2x128x32xbf16, #tpu.memory_space<vmem>>, vector<1x128x32xbf16>
    %115 = vector.shape_cast %114 : vector<1x128x32xbf16> to vector<128x32xbf16>
    %cst_74 = arith.constant dense<0.000000e+00> : vector<16x32xf32>
    %116 = tpu.matmul %113, %115, %cst_74 {dimension_numbers = #tpu.dot_dimension_numbers<[1], [0], [0], [1], [0, 0, 1, 1], [], []>} : vector<16x128xbf16>, vector<128x32xbf16>, vector<16x32xf32> -> vector<16x32xf32>
    %c0_75 = arith.constant 0 : index
    %c0_76 = arith.constant 0 : index
    %c0_77 = arith.constant 0 : index
    %117 = vector.load %arg9[%c0_75, %c0_76, %c0_77] : memref<2x1x32xf32, #tpu.memory_space<vmem>>, vector<1x1x32xf32>
    %118 = vector.shape_cast %117 : vector<1x1x32xf32> to vector<1x32xf32>
    %119 = vector.broadcast %118 : vector<1x32xf32> to vector<16x32xf32>
    %120 = arith.addf %116, %119 : vector<16x32xf32>
    %121 = arith.addf %63, %120 : vector<16x32xf32>
    %122 = arith.truncf %121 : vector<16x32xf32> to vector<16x32xbf16>
    %c1_78 = arith.constant 1 : index
    %c0_79 = arith.constant 0 : index
    %c0_80 = arith.constant 0 : index
    %c0_81 = arith.constant 0 : index
    %123 = vector.load %arg2[%c1_78, %c0_79, %c0_80, %c0_81] : memref<2x2x32x16xbf16, #tpu.memory_space<vmem>>, vector<1x1x32x16xbf16>
    %124 = vector.shape_cast %123 : vector<1x1x32x16xbf16> to vector<32x16xbf16>
    %cst_82 = arith.constant dense<0.000000e+00> : vector<16x16xf32>
    %125 = tpu.matmul %122, %124, %cst_82 {dimension_numbers = #tpu.dot_dimension_numbers<[1], [0], [0], [1], [0, 0, 1, 1], [], []>} : vector<16x32xbf16>, vector<32x16xbf16>, vector<16x16xf32> -> vector<16x16xf32>
    %c1_83 = arith.constant 1 : index
    %c0_84 = arith.constant 0 : index
    %c0_85 = arith.constant 0 : index
    %c0_86 = arith.constant 0 : index
    %126 = vector.load %arg3[%c1_83, %c0_84, %c0_85, %c0_86] : memref<2x2x32x16xbf16, #tpu.memory_space<vmem>>, vector<1x1x32x16xbf16>
    %127 = vector.shape_cast %126 : vector<1x1x32x16xbf16> to vector<32x16xbf16>
    %cst_87 = arith.constant dense<0.000000e+00> : vector<16x16xf32>
    %128 = tpu.matmul %122, %127, %cst_87 {dimension_numbers = #tpu.dot_dimension_numbers<[1], [0], [0], [1], [0, 0, 1, 1], [], []>} : vector<16x32xbf16>, vector<32x16xbf16>, vector<16x16xf32> -> vector<16x16xf32>
    %c1_88 = arith.constant 1 : index
    %c0_89 = arith.constant 0 : index
    %c0_90 = arith.constant 0 : index
    %c0_91 = arith.constant 0 : index
    %129 = vector.load %arg4[%c1_88, %c0_89, %c0_90, %c0_91] : memref<2x2x32x16xbf16, #tpu.memory_space<vmem>>, vector<1x1x32x16xbf16>
    %130 = vector.shape_cast %129 : vector<1x1x32x16xbf16> to vector<32x16xbf16>
    %cst_92 = arith.constant dense<0.000000e+00> : vector<16x16xf32>
    %131 = tpu.matmul %122, %130, %cst_92 {dimension_numbers = #tpu.dot_dimension_numbers<[1], [0], [0], [1], [0, 0, 1, 1], [], []>} : vector<16x32xbf16>, vector<32x16xbf16>, vector<16x16xf32> -> vector<16x16xf32>
    %132 = vector.shape_cast %125 : vector<16x16xf32> to vector<2x8x16xf32>
    %133 = vector.shape_cast %128 : vector<16x16xf32> to vector<2x8x16xf32>
    %134 = vector.shape_cast %131 : vector<16x16xf32> to vector<2x8x16xf32>
    "tpu.trace_start"() <{level = 10 : i32, message = "bqd,bkd->bqk"}> : () -> ()
    %cst_93 = arith.constant dense<0.000000e+00> : vector<2x8x8xf32>
    %135 = tpu.matmul %132, %133, %cst_93 {dimension_numbers = #tpu.dot_dimension_numbers<[2], [2], [1], [1], [0, 0, 0, 1, 1, 1], [0], [0]>} : vector<2x8x16xf32>, vector<2x8x16xf32>, vector<2x8x8xf32> -> vector<2x8x8xf32>
    "tpu.trace_stop"() : () -> ()
    %cst_94 = arith.constant dense<0xFF800000> : vector<2x8xf32>
    %136 = vector.multi_reduction <maximumf>, %135, %cst_94 [2] : vector<2x8x8xf32> to vector<2x8xf32>
    %137 = vector.shape_cast %136 : vector<2x8xf32> to vector<2x8x1xf32>
    %138 = vector.broadcast %137 : vector<2x8x1xf32> to vector<2x8x8xf32>
    %139 = arith.subf %135, %138 : vector<2x8x8xf32>
    %140 = math.exp %139 : vector<2x8x8xf32>
    %cst_95 = arith.constant dense<0.000000e+00> : vector<2x8xf32>
    %141 = vector.multi_reduction <add>, %140, %cst_95 [2] : vector<2x8x8xf32> to vector<2x8xf32>
    %142 = vector.shape_cast %141 : vector<2x8xf32> to vector<2x8x1xf32>
    %143 = tpu.reciprocal %142 {approx = true} : vector<2x8x1xf32> -> vector<2x8x1xf32>
    %144 = vector.broadcast %143 : vector<2x8x1xf32> to vector<2x8x8xf32>
    %145 = arith.mulf %140, %144 : vector<2x8x8xf32>
    "tpu.trace_start"() <{level = 10 : i32, message = "bqk,bkd->bqd"}> : () -> ()
    %cst_96 = arith.constant dense<0.000000e+00> : vector<2x8x16xf32>
    %146 = tpu.matmul %145, %134, %cst_96 {dimension_numbers = #tpu.dot_dimension_numbers<[2], [1], [1], [2], [0, 0, 0, 1, 1, 2], [0], [0]>} : vector<2x8x8xf32>, vector<2x8x16xf32>, vector<2x8x16xf32> -> vector<2x8x16xf32>
    "tpu.trace_stop"() : () -> ()
    %147 = vector.shape_cast %146 : vector<2x8x16xf32> to vector<16x16xf32>
    %148 = arith.truncf %147 : vector<16x16xf32> to vector<16x16xbf16>
    %c1_97 = arith.constant 1 : index
    %c0_98 = arith.constant 0 : index
    %c0_99 = arith.constant 0 : index
    %c0_100 = arith.constant 0 : index
    %149 = vector.load %arg5[%c1_97, %c0_98, %c0_99, %c0_100] : memref<2x2x16x32xbf16, #tpu.memory_space<vmem>>, vector<1x1x16x32xbf16>
    %150 = vector.shape_cast %149 : vector<1x1x16x32xbf16> to vector<16x32xbf16>
    %cst_101 = arith.constant dense<0.000000e+00> : vector<16x32xf32>
    %151 = tpu.matmul %148, %150, %cst_101 {dimension_numbers = #tpu.dot_dimension_numbers<[1], [0], [0], [1], [0, 0, 1, 1], [], []>} : vector<16x16xbf16>, vector<16x32xbf16>, vector<16x32xf32> -> vector<16x32xf32>
    %152 = arith.addf %121, %151 : vector<16x32xf32>
    %c1_102 = arith.constant 1 : index
    %c1_103 = arith.constant 1 : index
    %c0_104 = arith.constant 0 : index
    %c0_105 = arith.constant 0 : index
    %153 = vector.load %arg2[%c1_102, %c1_103, %c0_104, %c0_105] : memref<2x2x32x16xbf16, #tpu.memory_space<vmem>>, vector<1x1x32x16xbf16>
    %154 = vector.shape_cast %153 : vector<1x1x32x16xbf16> to vector<32x16xbf16>
    %cst_106 = arith.constant dense<0.000000e+00> : vector<16x16xf32>
    %155 = tpu.matmul %122, %154, %cst_106 {dimension_numbers = #tpu.dot_dimension_numbers<[1], [0], [0], [1], [0, 0, 1, 1], [], []>} : vector<16x32xbf16>, vector<32x16xbf16>, vector<16x16xf32> -> vector<16x16xf32>
    %c1_107 = arith.constant 1 : index
    %c1_108 = arith.constant 1 : index
    %c0_109 = arith.constant 0 : index
    %c0_110 = arith.constant 0 : index
    %156 = vector.load %arg3[%c1_107, %c1_108, %c0_109, %c0_110] : memref<2x2x32x16xbf16, #tpu.memory_space<vmem>>, vector<1x1x32x16xbf16>
    %157 = vector.shape_cast %156 : vector<1x1x32x16xbf16> to vector<32x16xbf16>
    %cst_111 = arith.constant dense<0.000000e+00> : vector<16x16xf32>
    %158 = tpu.matmul %122, %157, %cst_111 {dimension_numbers = #tpu.dot_dimension_numbers<[1], [0], [0], [1], [0, 0, 1, 1], [], []>} : vector<16x32xbf16>, vector<32x16xbf16>, vector<16x16xf32> -> vector<16x16xf32>
    %c1_112 = arith.constant 1 : index
    %c1_113 = arith.constant 1 : index
    %c0_114 = arith.constant 0 : index
    %c0_115 = arith.constant 0 : index
    %159 = vector.load %arg4[%c1_112, %c1_113, %c0_114, %c0_115] : memref<2x2x32x16xbf16, #tpu.memory_space<vmem>>, vector<1x1x32x16xbf16>
    %160 = vector.shape_cast %159 : vector<1x1x32x16xbf16> to vector<32x16xbf16>
    %cst_116 = arith.constant dense<0.000000e+00> : vector<16x16xf32>
    %161 = tpu.matmul %122, %160, %cst_116 {dimension_numbers = #tpu.dot_dimension_numbers<[1], [0], [0], [1], [0, 0, 1, 1], [], []>} : vector<16x32xbf16>, vector<32x16xbf16>, vector<16x16xf32> -> vector<16x16xf32>
    %162 = vector.shape_cast %155 : vector<16x16xf32> to vector<2x8x16xf32>
    %163 = vector.shape_cast %158 : vector<16x16xf32> to vector<2x8x16xf32>
    %164 = vector.shape_cast %161 : vector<16x16xf32> to vector<2x8x16xf32>
    "tpu.trace_start"() <{level = 10 : i32, message = "bqd,bkd->bqk"}> : () -> ()
    %cst_117 = arith.constant dense<0.000000e+00> : vector<2x8x8xf32>
    %165 = tpu.matmul %162, %163, %cst_117 {dimension_numbers = #tpu.dot_dimension_numbers<[2], [2], [1], [1], [0, 0, 0, 1, 1, 1], [0], [0]>} : vector<2x8x16xf32>, vector<2x8x16xf32>, vector<2x8x8xf32> -> vector<2x8x8xf32>
    "tpu.trace_stop"() : () -> ()
    %cst_118 = arith.constant dense<0xFF800000> : vector<2x8xf32>
    %166 = vector.multi_reduction <maximumf>, %165, %cst_118 [2] : vector<2x8x8xf32> to vector<2x8xf32>
    %167 = vector.shape_cast %166 : vector<2x8xf32> to vector<2x8x1xf32>
    %168 = vector.broadcast %167 : vector<2x8x1xf32> to vector<2x8x8xf32>
    %169 = arith.subf %165, %168 : vector<2x8x8xf32>
    %170 = math.exp %169 : vector<2x8x8xf32>
    %cst_119 = arith.constant dense<0.000000e+00> : vector<2x8xf32>
    %171 = vector.multi_reduction <add>, %170, %cst_119 [2] : vector<2x8x8xf32> to vector<2x8xf32>
    %172 = vector.shape_cast %171 : vector<2x8xf32> to vector<2x8x1xf32>
    %173 = tpu.reciprocal %172 {approx = true} : vector<2x8x1xf32> -> vector<2x8x1xf32>
    %174 = vector.broadcast %173 : vector<2x8x1xf32> to vector<2x8x8xf32>
    %175 = arith.mulf %170, %174 : vector<2x8x8xf32>
    "tpu.trace_start"() <{level = 10 : i32, message = "bqk,bkd->bqd"}> : () -> ()
    %cst_120 = arith.constant dense<0.000000e+00> : vector<2x8x16xf32>
    %176 = tpu.matmul %175, %164, %cst_120 {dimension_numbers = #tpu.dot_dimension_numbers<[2], [1], [1], [2], [0, 0, 0, 1, 1, 2], [0], [0]>} : vector<2x8x8xf32>, vector<2x8x16xf32>, vector<2x8x16xf32> -> vector<2x8x16xf32>
    "tpu.trace_stop"() : () -> ()
    %177 = vector.shape_cast %176 : vector<2x8x16xf32> to vector<16x16xf32>
    %178 = arith.truncf %177 : vector<16x16xf32> to vector<16x16xbf16>
    %c1_121 = arith.constant 1 : index
    %c1_122 = arith.constant 1 : index
    %c0_123 = arith.constant 0 : index
    %c0_124 = arith.constant 0 : index
    %179 = vector.load %arg5[%c1_121, %c1_122, %c0_123, %c0_124] : memref<2x2x16x32xbf16, #tpu.memory_space<vmem>>, vector<1x1x16x32xbf16>
    %180 = vector.shape_cast %179 : vector<1x1x16x32xbf16> to vector<16x32xbf16>
    %cst_125 = arith.constant dense<0.000000e+00> : vector<16x32xf32>
    %181 = tpu.matmul %178, %180, %cst_125 {dimension_numbers = #tpu.dot_dimension_numbers<[1], [0], [0], [1], [0, 0, 1, 1], [], []>} : vector<16x16xbf16>, vector<16x32xbf16>, vector<16x32xf32> -> vector<16x32xf32>
    %182 = arith.addf %152, %181 : vector<16x32xf32>
    %183 = arith.truncf %182 : vector<16x32xf32> to vector<16x32xbf16>
    %c1_126 = arith.constant 1 : index
    %c0_127 = arith.constant 0 : index
    %c0_128 = arith.constant 0 : index
    %184 = vector.load %arg6[%c1_126, %c0_127, %c0_128] : memref<2x32x128xbf16, #tpu.memory_space<vmem>>, vector<1x32x128xbf16>
    %185 = vector.shape_cast %184 : vector<1x32x128xbf16> to vector<32x128xbf16>
    %cst_129 = arith.constant dense<0.000000e+00> : vector<16x128xf32>
    %186 = tpu.matmul %183, %185, %cst_129 {dimension_numbers = #tpu.dot_dimension_numbers<[1], [0], [0], [1], [0, 0, 1, 1], [], []>} : vector<16x32xbf16>, vector<32x128xbf16>, vector<16x128xf32> -> vector<16x128xf32>
    %c1_130 = arith.constant 1 : index
    %c0_131 = arith.constant 0 : index
    %c0_132 = arith.constant 0 : index
    %187 = vector.load %arg7[%c1_130, %c0_131, %c0_132] : memref<2x1x128xf32, #tpu.memory_space<vmem>>, vector<1x1x128xf32>
    %188 = vector.shape_cast %187 : vector<1x1x128xf32> to vector<1x128xf32>
    %189 = vector.broadcast %188 : vector<1x128xf32> to vector<16x128xf32>
    %190 = arith.addf %186, %189 : vector<16x128xf32>
    %cst_133 = arith.constant 5.000000e-01 : f32
    %191 = vector.broadcast %cst_133 : f32 to vector<16x128xf32>
    %192 = arith.mulf %191, %190 : vector<16x128xf32>
    %cst_134 = arith.constant 0.707106769 : f32
    %193 = vector.broadcast %cst_134 : f32 to vector<16x128xf32>
    %194 = arith.mulf %190, %193 : vector<16x128xf32>
    %cst_135 = arith.constant 0.000000e+00 : f32
    %195 = vector.broadcast %cst_135 : f32 to vector<16x128xf32>
    %196 = arith.cmpf oge, %194, %195 : vector<16x128xf32>
    %cst_136 = arith.constant 1.000000e+00 : f32
    %cst_137 = arith.constant -1.000000e+00 : f32
    %197 = vector.broadcast %cst_136 : f32 to vector<16x128xf32>
    %198 = vector.broadcast %cst_137 : f32 to vector<16x128xf32>
    %199 = arith.select %196, %197, %198 : vector<16x128xi1>, vector<16x128xf32>
    %200 = math.absf %194 : vector<16x128xf32>
    %cst_138 = arith.constant 0.327591091 : f32
    %201 = vector.broadcast %cst_138 : f32 to vector<16x128xf32>
    %202 = arith.mulf %201, %200 : vector<16x128xf32>
    %cst_139 = arith.constant 1.000000e+00 : f32
    %203 = vector.broadcast %cst_139 : f32 to vector<16x128xf32>
    %204 = arith.addf %203, %202 : vector<16x128xf32>
    %cst_140 = arith.constant 1.000000e+00 : f32
    %205 = vector.broadcast %cst_140 : f32 to vector<16x128xf32>
    %206 = arith.divf %205, %204 : vector<16x128xf32>
    %cst_141 = arith.constant 1.06140542 : f32
    %207 = vector.broadcast %cst_141 : f32 to vector<16x128xf32>
    %208 = arith.mulf %207, %206 : vector<16x128xf32>
    %cst_142 = arith.constant -1.45315206 : f32
    %209 = vector.broadcast %cst_142 : f32 to vector<16x128xf32>
    %210 = arith.addf %208, %209 : vector<16x128xf32>
    %211 = arith.mulf %210, %206 : vector<16x128xf32>
    %cst_143 = arith.constant 1.42141378 : f32
    %212 = vector.broadcast %cst_143 : f32 to vector<16x128xf32>
    %213 = arith.addf %211, %212 : vector<16x128xf32>
    %214 = arith.mulf %213, %206 : vector<16x128xf32>
    %cst_144 = arith.constant -0.284496725 : f32
    %215 = vector.broadcast %cst_144 : f32 to vector<16x128xf32>
    %216 = arith.addf %214, %215 : vector<16x128xf32>
    %217 = arith.mulf %216, %206 : vector<16x128xf32>
    %cst_145 = arith.constant 0.254829586 : f32
    %218 = vector.broadcast %cst_145 : f32 to vector<16x128xf32>
    %219 = arith.addf %217, %218 : vector<16x128xf32>
    %220 = arith.mulf %219, %206 : vector<16x128xf32>
    %cst_146 = arith.constant 0.000000e+00 : f32
    %221 = vector.broadcast %cst_146 : f32 to vector<16x128xf32>
    %222 = arith.subf %221, %200 : vector<16x128xf32>
    %223 = arith.mulf %222, %200 : vector<16x128xf32>
    %224 = math.exp %223 : vector<16x128xf32>
    %225 = arith.mulf %220, %224 : vector<16x128xf32>
    %cst_147 = arith.constant 1.000000e+00 : f32
    %226 = vector.broadcast %cst_147 : f32 to vector<16x128xf32>
    %227 = arith.subf %226, %225 : vector<16x128xf32>
    %228 = arith.mulf %199, %227 : vector<16x128xf32>
    %cst_148 = arith.constant 1.000000e+00 : f32
    %229 = vector.broadcast %cst_148 : f32 to vector<16x128xf32>
    %230 = arith.addf %229, %228 : vector<16x128xf32>
    %231 = arith.mulf %192, %230 : vector<16x128xf32>
    %232 = arith.truncf %231 : vector<16x128xf32> to vector<16x128xbf16>
    %c1_149 = arith.constant 1 : index
    %c0_150 = arith.constant 0 : index
    %c0_151 = arith.constant 0 : index
    %233 = vector.load %arg8[%c1_149, %c0_150, %c0_151] : memref<2x128x32xbf16, #tpu.memory_space<vmem>>, vector<1x128x32xbf16>
    %234 = vector.shape_cast %233 : vector<1x128x32xbf16> to vector<128x32xbf16>
    %cst_152 = arith.constant dense<0.000000e+00> : vector<16x32xf32>
    %235 = tpu.matmul %232, %234, %cst_152 {dimension_numbers = #tpu.dot_dimension_numbers<[1], [0], [0], [1], [0, 0, 1, 1], [], []>} : vector<16x128xbf16>, vector<128x32xbf16>, vector<16x32xf32> -> vector<16x32xf32>
    %c1_153 = arith.constant 1 : index
    %c0_154 = arith.constant 0 : index
    %c0_155 = arith.constant 0 : index
    %236 = vector.load %arg9[%c1_153, %c0_154, %c0_155] : memref<2x1x32xf32, #tpu.memory_space<vmem>>, vector<1x1x32xf32>
    %237 = vector.shape_cast %236 : vector<1x1x32xf32> to vector<1x32xf32>
    %238 = vector.broadcast %237 : vector<1x32xf32> to vector<16x32xf32>
    %239 = arith.addf %235, %238 : vector<16x32xf32>
    %240 = arith.addf %182, %239 : vector<16x32xf32>
    %241 = arith.truncf %240 : vector<16x32xf32> to vector<16x32xbf16>
    %c0_156 = arith.constant 0 : index
    %c0_157 = arith.constant 0 : index
    %242 = vector.load %arg10[%c0_156, %c0_157] : memref<32x128xbf16, #tpu.memory_space<vmem>>, vector<32x128xbf16>
    %cst_158 = arith.constant dense<0.000000e+00> : vector<16x128xf32>
    %243 = tpu.matmul %241, %242, %cst_158 {dimension_numbers = #tpu.dot_dimension_numbers<[1], [0], [0], [1], [0, 0, 1, 1], [], []>} : vector<16x32xbf16>, vector<32x128xbf16>, vector<16x128xf32> -> vector<16x128xf32>
    %c0_159 = arith.constant 0 : index
    %c0_160 = arith.constant 0 : index
    %244 = vector.load %arg11[%c0_159, %c0_160] : memref<1x128xf32, #tpu.memory_space<vmem>>, vector<1x128xf32>
    %245 = vector.broadcast %244 : vector<1x128xf32> to vector<16x128xf32>
    %246 = arith.addf %243, %245 : vector<16x128xf32>
    %cst_161 = arith.constant dense<0xFF800000> : vector<16xf32>
    %247 = vector.multi_reduction <maximumf>, %246, %cst_161 [1] : vector<16x128xf32> to vector<16xf32>
    %248 = vector.shape_cast %247 : vector<16xf32> to vector<16x1xf32>
    %249 = vector.broadcast %248 : vector<16x1xf32> to vector<16x128xf32>
    %250 = arith.subf %246, %249 : vector<16x128xf32>
    %251 = math.exp %250 : vector<16x128xf32>
    %cst_162 = arith.constant dense<0.000000e+00> : vector<16xf32>
    %252 = vector.multi_reduction <add>, %251, %cst_162 [1] : vector<16x128xf32> to vector<16xf32>
    %253 = vector.shape_cast %252 : vector<16xf32> to vector<16x1xf32>
    %254 = math.log %253 : vector<16x1xf32>
    %255 = vector.broadcast %254 : vector<16x1xf32> to vector<16x128xf32>
    %256 = arith.subf %250, %255 : vector<16x128xf32>
    %257 = vector.shape_cast %256 : vector<16x128xf32> to vector<2x8x128xf32>
    %c0_163 = arith.constant 0 : index
    %c0_164 = arith.constant 0 : index
    %c0_165 = arith.constant 0 : index
    %258 = vector.load %arg12[%c0_163, %c0_164, %c0_165] : memref<2x8x128xf32, #tpu.memory_space<vmem>>, vector<2x8x128xf32>
    tpu.vector_store %arg12[%c0_163, %c0_164, %c0_165], %257 {strides = array<i32>} : memref<2x8x128xf32, #tpu.memory_space<vmem>>, vector<2x8x128xf32>,
    return
  }
  func.func @transform_0(%arg0: i32) -> (i32, i32, i32) {
    %c0_i32 = arith.constant 0 : i32
    %c0_i32_0 = arith.constant 0 : i32
    %c0_i32_1 = arith.constant 0 : i32
    return %arg0, %c0_i32, %c0_i32_0 : i32, i32, i32
  }
  func.func @transform_1(%arg0: i32) -> (i32, i32, i32, i32) {
    %c0_i32 = arith.constant 0 : i32
    %c0_i32_0 = arith.constant 0 : i32
    %c0_i32_1 = arith.constant 0 : i32
    %c0_i32_2 = arith.constant 0 : i32
    %c0_i32_3 = arith.constant 0 : i32
    return %c0_i32, %c0_i32_0, %c0_i32_1, %c0_i32_2 : i32, i32, i32, i32
  }
  func.func @transform_2(%arg0: i32) -> (i32, i32, i32, i32) {
    %c0_i32 = arith.constant 0 : i32
    %c0_i32_0 = arith.constant 0 : i32
    %c0_i32_1 = arith.constant 0 : i32
    %c0_i32_2 = arith.constant 0 : i32
    %c0_i32_3 = arith.constant 0 : i32
    return %c0_i32, %c0_i32_0, %c0_i32_1, %c0_i32_2 : i32, i32, i32, i32
  }
  func.func @transform_3(%arg0: i32) -> (i32, i32, i32, i32) {
    %c0_i32 = arith.constant 0 : i32
    %c0_i32_0 = arith.constant 0 : i32
    %c0_i32_1 = arith.constant 0 : i32
    %c0_i32_2 = arith.constant 0 : i32
    %c0_i32_3 = arith.constant 0 : i32
    return %c0_i32, %c0_i32_0, %c0_i32_1, %c0_i32_2 : i32, i32, i32, i32
  }
  func.func @transform_4(%arg0: i32) -> (i32, i32, i32, i32) {
    %c0_i32 = arith.constant 0 : i32
    %c0_i32_0 = arith.constant 0 : i32
    %c0_i32_1 = arith.constant 0 : i32
    %c0_i32_2 = arith.constant 0 : i32
    %c0_i32_3 = arith.constant 0 : i32
    return %c0_i32, %c0_i32_0, %c0_i32_1, %c0_i32_2 : i32, i32, i32, i32
  }
  func.func @transform_5(%arg0: i32) -> (i32, i32, i32) {
    %c0_i32 = arith.constant 0 : i32
    %c0_i32_0 = arith.constant 0 : i32
    %c0_i32_1 = arith.constant 0 : i32
    %c0_i32_2 = arith.constant 0 : i32
    return %c0_i32, %c0_i32_0, %c0_i32_1 : i32, i32, i32
  }
  func.func @transform_6(%arg0: i32) -> (i32, i32, i32) {
    %c0_i32 = arith.constant 0 : i32
    %c0_i32_0 = arith.constant 0 : i32
    %c0_i32_1 = arith.constant 0 : i32
    %c0_i32_2 = arith.constant 0 : i32
    return %c0_i32, %c0_i32_0, %c0_i32_1 : i32, i32, i32
  }
  func.func @transform_7(%arg0: i32) -> (i32, i32, i32) {
    %c0_i32 = arith.constant 0 : i32
    %c0_i32_0 = arith.constant 0 : i32
    %c0_i32_1 = arith.constant 0 : i32
    %c0_i32_2 = arith.constant 0 : i32
    return %c0_i32, %c0_i32_0, %c0_i32_1 : i32, i32, i32
  }
  func.func @transform_8(%arg0: i32) -> (i32, i32, i32) {
    %c0_i32 = arith.constant 0 : i32
    %c0_i32_0 = arith.constant 0 : i32
    %c0_i32_1 = arith.constant 0 : i32
    %c0_i32_2 = arith.constant 0 : i32
    return %c0_i32, %c0_i32_0, %c0_i32_1 : i32, i32, i32
  }
  func.func @transform_9(%arg0: i32) -> (i32, i32) {
    %c0_i32 = arith.constant 0 : i32
    %c0_i32_0 = arith.constant 0 : i32
    %c0_i32_1 = arith.constant 0 : i32
    return %c0_i32, %c0_i32_0 : i32, i32
  }
  func.func @transform_10(%arg0: i32) -> (i32, i32) {
    %c0_i32 = arith.constant 0 : i32
    %c0_i32_0 = arith.constant 0 : i32
    %c0_i32_1 = arith.constant 0 : i32
    return %c0_i32, %c0_i32_0 : i32, i32
  }
  func.func @transform_11(%arg0: i32) -> (i32, i32, i32) {
    %c0_i32 = arith.constant 0 : i32
    %c0_i32_0 = arith.constant 0 : i32
    %c0_i32_1 = arith.constant 0 : i32
    return %arg0, %c0_i32, %c0_i32_0 : i32, i32, i32
  }
}

</mosaic_0001>

<bundles_post_ra>
// kernel: tpu_custom_call.1
= control target key start
LH: loop header
LB: loop body
LE: loop exit
PB: predicated region body
PF: predicated region fallthrough
CT: control target
= control target key end

     0   :  { %s2329_s0 = inlined_call_operand.vmem [shape: bf16[2,8,32], index: 0, kind: input, shape index: {}]   ;;  %s2330_s1 = inlined_call_operand.vmem [shape: bf16[2,2,32,16], index: 1, kind: input, shape index: {}]   ;;  %s2331_s2 = inlined_call_operand.vmem [shape: bf16[2,2,32,16], index: 2, kind: input, shape index: {}]   ;;  %s2332_s3 = inlined_call_operand.vmem [shape: bf16[2,2,32,16], index: 3, kind: input, shape index: {}]   ;;  %s2333_s4 = inlined_call_operand.vmem [shape: bf16[2,2,16,32], index: 4, kind: input, shape index: {}]   ;;  %s2334_s5 = inlined_call_operand.vmem [shape: bf16[2,32,128], index: 5, kind: input, shape index: {}]   ;;  %s2335_s6 = inlined_call_operand.vmem [shape: f32[2,1,128], index: 6, kind: input, shape index: {}]   ;;  %s2336_s7 = inlined_call_operand.vmem [shape: bf16[2,128,32], index: 7, kind: input, shape index: {}]   ;;  %s2337_s8 = inlined_call_operand.vmem [shape: f32[2,1,32], index: 8, kind: input, shape index: {}]   ;;  %s2338_s9 = inlined_call_operand.vmem [shape: bf16[32,128], index: 9, kind: input, shape index: {}]   ;;  %s2339_s10 = inlined_call_operand.vmem [shape: f32[1,128], index: 10, kind: input, shape index: {}]   ;;  %s2340_s11 = inlined_call_operand.hbm [shape: f32[2,8,128], index: 11, kind: output, shape index: {}]  }
   0x1   :  { %v1824_v0 = vld [vmem:[%s2330_s1 + $0x8] sm:$0xff]  ;;  %v1823_v2 = vld [vmem:[%s2330_s1] sm:$0xff] }
   0x2   :  { %v1826_v1 = vld [vmem:[%s2331_s2 + $0x8] sm:$0xff]  ;;  %v1825_v3 = vld [vmem:[%s2331_s2] sm:$0xff]  ;;  %75 = vmatpush.bf16.msra.mxu0 %v1824_v0 }
   0x3   :  { %105 = vmatpush.bf16.msra.mxu1 %v1826_v1 }
   0x4   :  { %16 = vsyncpa [#allocation3], 0  ;;  %v2043_v4 = vld [vmem:[%s2329_s0] sm:$0xff]  ;;  %vm65_vm0 = vcmask 261120   ;;  %vm143_vm1 = vcmask 130048   ;;  %v1828_v9 = vld [vmem:[%s2332_s3 + $0x8] sm:$0xff] }
   0x5   :  { %135 = vmatpush.bf16.msra.mxu2 %v1828_v9  ;;  %v1827_v10 = vld [vmem:[%s2332_s3] sm:$0xff]  ;;  %vm196_vm2 = vcmask 64512   ;;  %v1831_v26 = vld [vmem:[%s2330_s1 + $0x18] sm:$0xff]  ;;  %v1830_v29 = vld [vmem:[%s2330_s1 + $0x10] sm:$0xff]  ;;  %s1966_s23 = smov 128  }
   0x6   :  { %76 = vmatpush.bf16.msra.mxu0 %v1823_v2  ;;  %v1833_v28 = vld [vmem:[%s2331_s2 + $0x18] sm:$0xff]  ;;  %v1832_v30 = vld [vmem:[%s2331_s2 + $0x10] sm:$0xff]  ;;  %v1829_v37 = vld [vmem:[%s2333_s4] sm:$0xff] }
   0x7   :  { %106 = vmatpush.bf16.msra.mxu1 %v1825_v3  ;;  %v1835_v45 = vld [vmem:[%s2332_s3 + $0x18] sm:$0xff]  ;;  %v1834_v46 = vld [vmem:[%s2332_s3 + $0x10] sm:$0xff] }
   0x9   :  { %1523 = vmatmul.msk.bf16.vlgmr.msra.gmra.mxu0 %vm65_vm0, %v2043_v4  ;;  %136 = vmatpush.bf16.msra.mxu2 %v1827_v10 }
   0xa   :  { %1532 = vmatmul.msk.bf16.vlgmr.msra.gmra.mxu1 %vm65_vm0, %v2043_v4 }
   0xb   :  { %284 = vmatpush.bf16.msrb.mxu1 %v1829_v37  ;;  %v1843_v37 = vld [vmem:[%s2336_s7 + $0x20] sm:$0xff] }
   0xc   :  { %1541 = vmatmul.msk.bf16.vlgmr.msra.gmra.mxu2 %vm65_vm0, %v2043_v4 }
   0xd   :  { %316 = vmatpush.bf16.msrb.mxu2 %v1831_v26 }
  0x11   :  { %317 = vmatpush.bf16.msrb.mxu2 %v1830_v29 }
  0x1c   :  { %1565 = vmatmul.msk.bf16.vlgmr.msrb.gmra.mxu2 %vm65_vm0, %v2043_v4 }
  0x86   :  { %v78_v6 = vpop.f32.mrf.mxu0 }
  0x87   :  { %v108_v5 = vpop.f32.mrf.mxu1 }
  0x88   :  { %1542 = vmatpush.xpose.msk.msra.mxu3 %vm143_vm1, %v108_v5 }
  0x8b   :  { %1543 = vmatmul.msk.f32.vlgmr.msra.gmra.mxu3 %vm143_vm1, %v78_v6 }
  0x8e   :  { %v80_v8 = vpop.f32.mrf.mxu0 }
  0x8f   :  { %v110_v7 = vpop.f32.mrf.mxu1  ;;  %v138_v17 = vpop.f32.mrf.mxu2 }
  0x90   :  { %1544 = vmatpush.xpose.msk.msrb.mxu3 %vm143_vm1, %v110_v7  ;;  %v1836_v7 = vld [vmem:[%s2333_s4 + $0x8] sm:$0xff] }
  0x93   :  { %1545 = vmatmul.msk.f32.vlgmr.msrb.gmra.mxu3 %vm143_vm1, %v80_v8 }
  0x94   :  { %237 = vmatpush.msra.mxu3 %v138_v17 }
  0x96   :  { %347 = vmatpush.bf16.msrb.mxu3 %v1833_v28 }
  0x97   :  { %v140_v27 = vpop.f32.mrf.mxu2 }
  0x98   :  { %260 = vmatpush.msrb.mxu0 %v140_v27  ;;  %v1846_v27 = vld [vmem:[%s2336_s7 + $0x38] sm:$0xff] }
  0x9a   :  { %348 = vmatpush.bf16.msrb.mxu3 %v1832_v30  ;;  %378 = vmatpush.bf16.msra.mxu0 %v1835_v45  ;;  %v1845_v30 = vld [vmem:[%s2336_s7 + $0x30] sm:$0xff] }
  0x9e   :  { %379 = vmatpush.bf16.msra.mxu0 %v1834_v46 }
  0x9f   :  { %v319_v42 = vpop.f32.mrf.mxu2 }
  0xa7   :  { %v321_v44 = vpop.f32.mrf.mxu2 }
 0x10e   :  { %v167_v11 = vpop.f32.mrf.mxu3 }
 0x10f   :  { %v197_v12 = vsel %vm196_vm2, %v167_v11, -inf }
 0x110   :  { %198 = vmax.xlane.f32.xlu0 %v197_v12  ;;  %v1837_v12 = vld [vmem:[%s2334_s5] sm:$0xff] }
 0x116   :  { %v193_v13 = vpop.f32.mrf.mxu3 }
 0x117   :  { %v200_v14 = vsel %vm196_vm2, %v193_v13, -inf }
 0x118   :  { %201 = vmax.xlane.f32.xlu0 %v200_v14 }
 0x183   :  { %v199_v15 = vpop.xlane.xlu0 %198 }
 0x184   :  { %v203_v16 = vsub.f32 %v167_v11, %v199_v15  ;;  %v1838_v11 = vld [vmem:[%s2334_s5 + $0x8] sm:$0xff] }
 0x186   :  { %v205_v18 = vmul.f32 1.442695, %v203_v16 }
 0x188   :  { %1882 = vpow2.f32 %v205_v18 }
 0x18b   :  { %v202_v19 = vpop.xlane.xlu0 %201 }
 0x18c   :  { %v204_v20 = vsub.f32 %v193_v13, %v202_v19  ;;  %v40_v13 = vld [vmem:[%s2329_s0] sm:$0xff]  }
 0x18d   :  { %v42_v15 = vunpack.c.l.bf16 %v40_v13  ;;  %v43_v16 = vunpack.c.h.bf16 %v40_v13 }
 0x18e   :  { %v1883_v21 = vpop.eup %1882  ;;  %v207_v22 = vmul.f32 1.442695, %v204_v20 }
 0x18f   :  { %v209_v23 = vsel %vm196_vm2, %v1883_v21, 0.0 }
 0x190   :  { %1884 = vpow2.f32 %v207_v22  ;;  %210 = vadd.xlane.f32.xlu1 %v209_v23  ;;  %v1877_v23 = vld [vmem:[%s2335_s6] ss:$0 sm:$0xff] }
 0x196   :  { %v1885_v24 = vpop.eup %1884 }
 0x197   :  { %v212_v25 = vsel %vm196_vm2, %v1885_v24, 0.0 }
 0x198   :  { %213 = vadd.xlane.f32.xlu1 %v212_v25 }
 0x203   :  { %v211_v31 = vpop.xlane.xlu1 %210 }
 0x204   :  { %1886 = vrcp.f32 %v211_v31 }
 0x20a   :  { %v1887_v32 = vpop.eup %1886 }
 0x20b   :  { %v217_v33 = vmul.f32 %v1887_v32, %v1883_v21  ;;  %v214_v34 = vpop.xlane.xlu1 %213 }
 0x20c   :  { %1888 = vrcp.f32 %v214_v34  ;;  %v1844_v34 = vld [vmem:[%s2336_s7 + $0x28] sm:$0xff] }
 0x20d   :  { %1546 = vmatmul.msk.f32.vlgmr.msra.gmra.mxu3 %vm196_vm2, %v217_v33 }
 0x212   :  { %v1889_v35 = vpop.eup %1888 }
 0x213   :  { %v218_v36 = vmul.f32 %v1889_v35, %v1885_v24 }
 0x215   :  { %1547 = vmatmul.msk.f32.vlgmr.msrb.gmra.mxu0 %vm196_vm2, %v218_v36  ;;  %1578 = vmatmul.msk.bf16.vlgmr.msrb.gmra.mxu3 %vm65_vm0, %v2043_v4 }
 0x21d   :  { %1591 = vmatmul.msk.bf16.vlgmr.msra.gmra.mxu0 %vm65_vm0, %v2043_v4 }
 0x290   :  { %v239_v38 = vpop.f32.mrf.mxu3 }
 0x292   :  { %v262_v39 = vpop.f32.mrf.mxu0 }
 0x293   :  { %v265_v40 = vpack.c.bf16 %v262_v39, %v239_v38 }
 0x295   :  { %1552 = vmatmul.msk.bf16.vlgmr.msrb.gmra.mxu1 %vm143_vm1, %v265_v40 }
 0x298   :  { %v350_v41 = vpop.f32.mrf.mxu3 }
 0x299   :  { %1592 = vmatpush.xpose.msk.msra.mxu1 %vm143_vm1, %v350_v41 }
 0x29a   :  { %v381_v53 = vpop.f32.mrf.mxu0 }
 0x29b   :  { %478 = vmatpush.msra.mxu3 %v381_v53 }
 0x29d   :  { %526 = vmatpush.bf16.msrb.mxu1 %v1836_v7  ;;  %722 = vmatpush.bf16.msrb.mxu3 %v1846_v27 }
 0x2a0   :  { %v352_v43 = vpop.f32.mrf.mxu3 }
 0x2a1   :  { %1594 = vmatpush.xpose.msk.msra.mxu2 %vm143_vm1, %v352_v43  ;;  %723 = vmatpush.bf16.msrb.mxu3 %v1845_v30 }
 0x2a2   :  { %v383_v0 = vpop.f32.mrf.mxu0 }
 0x2a3   :  { %501 = vmatpush.msrb.mxu0 %v383_v0 }
 0x2a4   :  { %1595 = vmatmul.msk.f32.vlgmr.msra.gmra.mxu2 %vm143_vm1, %v321_v44 }
 0x2a5   :  { %1593 = vmatmul.msk.f32.vlgmr.msra.gmra.mxu1 %vm143_vm1, %v319_v42  ;;  %565 = vmatpush.bf16.msrb.mxu2 %v1838_v11  ;;  %v1842_v42 = vld [vmem:[%s2336_s7 + $0x18] sm:$0xff] }
 0x2a6   :  { %724 = vmatpush.bf16.msrb.mxu3 %v1844_v34 }
 0x2a9   :  { %566 = vmatpush.bf16.msrb.mxu2 %v1837_v12 }
 0x2aa   :  { %725 = vmatpush.bf16.msrb.mxu3 %v1843_v37 }
 0x2ae   :  { %726 = vmatpush.bf16.msrb.mxu3 %v1842_v42 }
 0x312   :  { %v286_v47 = vpop.f32.mrf.mxu1 }
 0x313   :  { %v291_v17 = vadd.f32 %v286_v47, %v42_v15  ;;  %v1841_v47 = vld [vmem:[%s2336_s7 + $0x10] sm:$0xff] }
 0x314   :  { %727 = vmatpush.bf16.msrb.mxu3 %v1841_v47  ;;  %v1848_v47 = vld [vmem:[%s2330_s1 + $0x28] sm:$0xff] }
 0x315   :  { %765 = vmatpush.bf16.msra.mxu0 %v1848_v47 }
 0x31a   :  { %v288_v48 = vpop.f32.mrf.mxu1 }
 0x31b   :  { %v292_v18 = vadd.f32 %v288_v48, %v43_v16 }
 0x322   :  { %v409_v49 = vpop.f32.mrf.mxu1 }
 0x323   :  { %v438_v50 = vsel %vm196_vm2, %v409_v49, -inf }
 0x324   :  { %439 = vmax.xlane.f32.xlu2 %v438_v50 }
 0x327   :  { %v435_v51 = vpop.f32.mrf.mxu2 }
 0x328   :  { %v441_v52 = vsel %vm196_vm2, %v435_v51, -inf }
 0x32c   :  { %442 = vmax.xlane.f32.xlu2 %v441_v52 }
 0x397   :  { %v440_v54 = vpop.xlane.xlu2 %439 }
 0x398   :  { %v444_v55 = vsub.f32 %v409_v49, %v440_v54  ;;  %v1840_v54 = vld [vmem:[%s2336_s7 + $0x8] sm:$0xff] }
 0x399   :  { %728 = vmatpush.bf16.msrb.mxu3 %v1840_v54 }
 0x39a   :  { %v446_v56 = vmul.f32 1.442695, %v444_v55 }
 0x39c   :  { %1890 = vpow2.f32 %v446_v56 }
 0x39f   :  { %v443_v57 = vpop.xlane.xlu2 %442 }
 0x3a0   :  { %v445_v58 = vsub.f32 %v435_v51, %v443_v57 }
 0x3a2   :  { %v1891_v59 = vpop.eup %1890  ;;  %v448_v60 = vmul.f32 1.442695, %v445_v58 }
 0x3a3   :  { %v450_v61 = vsel %vm196_vm2, %v1891_v59, 0.0 }
 0x3a4   :  { %1892 = vpow2.f32 %v448_v60  ;;  %451 = vadd.xlane.f32.xlu0 %v450_v61 }
 0x3aa   :  { %v1893_v62 = vpop.eup %1892 }
 0x3ab   :  { %v453_v63 = vsel %vm196_vm2, %v1893_v62, 0.0 }
 0x3ac   :  { %454 = vadd.xlane.f32.xlu1 %v453_v63 }
 0x417   :  { %v452_v1 = vpop.xlane.xlu0 %451 }
 0x418   :  { %1894 = vrcp.f32 %v452_v1 }
 0x41e   :  { %v1895_v2 = vpop.eup %1894 }
 0x41f   :  { %v458_v3 = vmul.f32 %v1895_v2, %v1891_v59  ;;  %v455_v4 = vpop.xlane.xlu1 %454 }
 0x420   :  { %1896 = vrcp.f32 %v455_v4 }
 0x421   :  { %1596 = vmatmul.msk.f32.vlgmr.msra.gmra.mxu3 %vm196_vm2, %v458_v3 }
 0x426   :  { %v1897_v5 = vpop.eup %1896 }
 0x427   :  { %v459_v6 = vmul.f32 %v1897_v5, %v1893_v62  ;;  %v1839_v62 = vld [vmem:[%s2336_s7] sm:$0xff] }
 0x428   :  { %729 = vmatpush.bf16.msrb.mxu3 %v1839_v62 }
 0x429   :  { %1597 = vmatmul.msk.f32.vlgmr.msrb.gmra.mxu0 %vm196_vm2, %v459_v6 }
 0x4a4   :  { %v480_v8 = vpop.f32.mrf.mxu3 }
 0x4a6   :  { %v503_v9 = vpop.f32.mrf.mxu0 }
 0x4a7   :  { %v506_v10 = vpack.c.bf16 %v503_v9, %v480_v8 }
 0x4a9   :  { %1604 = vmatmul.msk.bf16.vlgmr.msrb.gmra.mxu1 %vm143_vm1, %v506_v10 }
 0x526   :  { %v528_v14 = vpop.f32.mrf.mxu1 }
 0x527   :  { %v2118_v20 = vadd.f32 %v528_v14, %v291_v17 }
 0x52e   :  { %v530_v19 = vpop.f32.mrf.mxu1 }
 0x52f   :  { %v2120_v21 = vadd.f32 %v530_v19, %v292_v18 }
 0x531   :  { %v535_v22 = vpack.c.bf16 %v2120_v21, %v2118_v20 }
 0x533   :  { %1613 = vmatmul.msk.bf16.vlgmr.msrb.gmra.mxu2 %vm65_vm0, %v535_v22 }
 0x5b6   :  { %v568_v24 = vpop.f32.mrf.mxu2 }
 0x5b7   :  { %v2128_v25 = vadd.f32 %v1877_v23, %v568_v24 }
 0x5b9   :  { %v2131_v26 = vmul.f32 0.70710677, %v2128_v25  ;;  %v573_v42 = vmul.f32 0.5, %v2128_v25  ;;  %v1859_v25 = vld [vmem:[%s2332_s3 + $0x38] sm:$0xff] }
 0x5ba   :  { %1069 = vmatpush.bf16.msra.mxu3 %v1859_v25 }
 0x5bb   :  { %v581_v28 = vand.u32 2147483647, %v2131_v26  ;;  %vm577_vm11 = vcmp.ge.f32.partialorder %v2131_v26, 0.0 }
 0x5bd   :  { %v583_v29 = vmul.f32 0.3275911, %v581_v28  ;;  %v635_v56 = vsub.f32 0.0, %v581_v28 }
 0x5be   :  { %v570_v31 = vpop.f32.mrf.mxu2 }
 0x5bf   :  { %v585_v32 = vadd.f32 1.0, %v583_v29  ;;  %v2140_v33 = vadd.f32 %v1877_v23, %v570_v31  ;;  %v637_v0 = vmul.f32 %v635_v56, %v581_v28 }
 0x5c1   :  { %1898 = vrcp.f32 %v585_v32  ;;  %v2146_v35 = vmul.f32 0.70710677, %v2140_v33  ;;  %v598_v44 = vand.u32 2147483648, %v585_v32  ;;  %v596_v46 = vand.u32 2147483647, %v585_v32 }
 0x5c2   :  { %vm592_vm4 = vweird.f32 %v585_v32  ;;  %v639_v6 = vmul.f32 1.442695, %v637_v0  ;;  %v574_v26 = vmul.f32 0.5, %v2140_v33  ;;  %v1847_v33 = vld [vmem:[%s2330_s1 + $0x20] sm:$0xff] }
 0x5c3   :  { %v582_v36 = vand.u32 2147483647, %v2146_v35  ;;  %v599_v49 = vor.u32 1.1754944e-38, %v598_v44  ;;  %vm597_vm6 = vcmp.eq.f32.partialorder %v596_v46, 8.507059e+37  ;;  %vm578_vm12 = vcmp.ge.f32.partialorder %v2146_v35, 0.0  ;;  %v1850_v35 = vld [vmem:[%s2331_s2 + $0x28] sm:$0xff]  ;;  %766 = vmatpush.bf16.msra.mxu0 %v1847_v33 }
 0x5c4   :  { %796 = vmatpush.bf16.msra.mxu1 %v1850_v35 }
 0x5c5   :  { %v584_v38 = vmul.f32 0.3275911, %v582_v36  ;;  %v636_v8 = vsub.f32 0.0, %v582_v36 }
 0x5c7   :  { %v1899_v39 = vpop.eup %1898  ;;  %v586_v41 = vadd.f32 1.0, %v584_v38  ;;  %v638_v13 = vmul.f32 %v636_v8, %v582_v36 }
 0x5c8   :  { %v588_v40 = vmul.f32 %v1899_v39, %v585_v32  ;;  %vm593_vm3 = vweird.f32 %v1899_v39  ;;  %v1964_v32 = vmov -1.0  }
 0x5c9   :  { %1900 = vrcp.f32 %v586_v41  ;;  %vm594_vm5 = vmor %vm592_vm4, %vm593_vm3  ;;  %v613_v59 = vand.u32 2147483648, %v586_v41  ;;  %v611_v61 = vand.u32 2147483647, %v586_v41  ;;  %vm607_vm8 = vweird.f32 %v586_v41 }
 0x5ca   :  { %v589_v43 = vsub.f32 1.0, %v588_v40  ;;  %1902 = vpow2.f32 %v639_v6  ;;  %v641_v18 = vmul.f32 1.442695, %v638_v13  ;;  %v579_v34 = vsel %vm577_vm11, 1.0, %v1964_v32 }
 0x5cb   :  { %v614_v3 = vor.u32 1.1754944e-38, %v613_v59  ;;  %vm612_vm10 = vcmp.eq.f32.partialorder %v611_v61, 8.507059e+37 }
 0x5cc   :  { %v590_v45 = vmul.f32 %v1899_v39, %v589_v43  ;;  %1904 = vpow2.f32 %v641_v18  ;;  %v1857_v18 = vld [vmem:[%s2331_s2 + $0x38] sm:$0xff] }
 0x5ce   :  { %v591_v48 = vadd.f32 %v1899_v39, %v590_v45 }
 0x5cf   :  { %v1901_v50 = vpop.eup %1900 }
 0x5d0   :  { %v595_v51 = vsel %vm594_vm5, %v1899_v39, %v591_v48  ;;  %v603_v53 = vmul.f32 %v1901_v50, %v586_v41  ;;  %vm608_vm7 = vweird.f32 %v1901_v50  ;;  %v1903_v22 = vpop.eup %1902  ;;  %v580_v39 = vsel %vm578_vm12, 1.0, %v1964_v32  ;;  %v1852_v48 = vld [vmem:[%s2332_s3 + $0x28] sm:$0xff] }
 0x5d1   :  { %v600_v52 = vsel %vm597_vm6, %v599_v49, %v595_v51  ;;  %vm609_vm9 = vmor %vm607_vm8, %vm608_vm7  ;;  %827 = vmatpush.bf16.msra.mxu2 %v1852_v48  ;;  %v1849_v49 = vld [vmem:[%s2331_s2 + $0x20] sm:$0xff]  ;;  %v1858_v51 = vld [vmem:[%s2332_s3 + $0x30] sm:$0xff] }
 0x5d2   :  { %v617_v55 = vmul.f32 1.0614054, %v600_v52  ;;  %v604_v57 = vsub.f32 1.0, %v603_v53  ;;  %v1905_v31 = vpop.eup %1904  ;;  %797 = vmatpush.bf16.msra.mxu1 %v1849_v49  ;;  %1070 = vmatpush.bf16.msra.mxu3 %v1858_v51  ;;  %v1878_v53 = vld [vmem:[%s2337_s8] ss:$0 sm:$0xff] }
 0x5d4   :  { %v619_v58 = vadd.f32 -1.4531521, %v617_v55  ;;  %v605_v60 = vmul.f32 %v1901_v50, %v604_v57 }
 0x5d6   :  { %v621_v63 = vmul.f32 %v619_v58, %v600_v52  ;;  %v606_v1 = vadd.f32 %v1901_v50, %v605_v60 }
 0x5d8   :  { %v623_v2 = vadd.f32 1.4214138, %v621_v63  ;;  %v610_v4 = vsel %vm609_vm9, %v1901_v50, %v606_v1  ;;  %v1851_v50 = vld [vmem:[%s2332_s3 + $0x20] sm:$0xff] }
 0x5d9   :  { %v615_v7 = vsel %vm612_vm10, %v614_v3, %v610_v4  ;;  %828 = vmatpush.bf16.msra.mxu2 %v1851_v50 }
 0x5da   :  { %v625_v5 = vmul.f32 %v623_v2, %v600_v52  ;;  %v618_v9 = vmul.f32 1.0614054, %v615_v7 }
 0x5dc   :  { %v627_v10 = vadd.f32 -0.28449672, %v625_v5  ;;  %v620_v11 = vadd.f32 -1.4531521, %v618_v9 }
 0x5de   :  { %v629_v12 = vmul.f32 %v627_v10, %v600_v52  ;;  %v622_v14 = vmul.f32 %v620_v11, %v615_v7 }
 0x5e0   :  { %v631_v15 = vadd.f32 0.2548296, %v629_v12  ;;  %v624_v16 = vadd.f32 1.4214138, %v622_v14 }
 0x5e2   :  { %v633_v17 = vmul.f32 %v631_v15, %v600_v52  ;;  %v626_v19 = vmul.f32 %v624_v16, %v615_v7  ;;  %v1855_v16 = vld [vmem:[%s2330_s1 + $0x38] sm:$0xff] }
 0x5e4   :  { %v643_v23 = vmul.f32 %v1903_v22, %v633_v17  ;;  %v628_v24 = vadd.f32 -0.28449672, %v626_v19  ;;  %v1854_v17 = vld [vmem:[%s2330_s1 + $0x30] sm:$0xff] }
 0x5e5   :  { %v1856_v19 = vld [vmem:[%s2331_s2 + $0x30] sm:$0xff] }
 0x5e6   :  { %v630_v27 = vmul.f32 %v628_v24, %v615_v7  ;;  %v645_v28 = vsub.f32 1.0, %v643_v23 }
 0x5e8   :  { %v632_v29 = vadd.f32 0.2548296, %v630_v27  ;;  %v647_v36 = vmul.f32 %v645_v28, %v579_v34 }
 0x5ea   :  { %v634_v30 = vmul.f32 %v632_v29, %v615_v7  ;;  %v649_v40 = vadd.f32 1.0, %v647_v36 }
 0x5ec   :  { %v644_v37 = vmul.f32 %v1905_v31, %v634_v30  ;;  %v651_v44 = vmul.f32 %v649_v40, %v573_v42  ;;  %v1853_v30 = vld [vmem:[%s2333_s4 + $0x10] sm:$0xff] }
 0x5ee   :  { %v646_v38 = vsub.f32 1.0, %v644_v37 }
 0x5f0   :  { %v648_v41 = vmul.f32 %v646_v38, %v580_v39 }
 0x5f2   :  { %v650_v43 = vadd.f32 1.0, %v648_v41 }
 0x5f4   :  { %v652_v45 = vmul.f32 %v650_v43, %v574_v26 }
 0x5f6   :  { %v653_v46 = vpack.c.bf16 %v652_v45, %v651_v44 }
 0x5f8   :  { %730 = vmatmul.bf16.vlgmr.msrb.gmra.mxu3 %v653_v46 }
 0x67b   :  { %v731_v52 = vpop.f32.mrf.mxu3 }
 0x67c   :  { %v732_v54 = vadd.f32 %v1878_v53, %v731_v52 }
 0x67e   :  { %v2198_v57 = vadd.f32 %v732_v54, %v2118_v20 }
 0x683   :  { %v733_v55 = vpop.f32.mrf.mxu3 }
 0x684   :  { %v734_v56 = vadd.f32 %v1878_v53, %v733_v55 }
 0x686   :  { %v2201_v58 = vadd.f32 %v734_v56, %v2120_v21 }
 0x688   :  { %v738_v59 = vpack.c.bf16 %v2201_v58, %v2198_v57 }
 0x68a   :  { %1658 = vmatmul.msk.bf16.vlgmr.msra.gmra.mxu0 %vm65_vm0, %v738_v59  ;;  %1671 = vmatmul.msk.bf16.vlgmr.msra.gmra.mxu1 %vm65_vm0, %v738_v59 }
 0x68b   :  { %1684 = vmatmul.msk.bf16.vlgmr.msra.gmra.mxu2 %vm65_vm0, %v738_v59  ;;  %1736 = vmatmul.msk.bf16.vlgmr.msra.gmra.mxu3 %vm65_vm0, %v738_v59 }
 0x707   :  { %v799_v60 = vpop.f32.mrf.mxu1  ;;  %v768_v61 = vpop.f32.mrf.mxu0 }
 0x708   :  { %1685 = vmatpush.xpose.msk.msrb.mxu0 %vm143_vm1, %v799_v60 }
 0x70b   :  { %1686 = vmatmul.msk.f32.vlgmr.msrb.gmra.mxu0 %vm143_vm1, %v768_v61  ;;  %v1860_v61 = vld [vmem:[%s2333_s4 + $0x18] sm:$0xff]  ;;  %s1499_s4 = sshll.u32 %s2340_s11, 4  ;;  %s1500_s4 = int_to_ptr.hbm [resolvable:$true] %s1499_s4 }
 0x70e   :  { %v830_v20 = vpop.f32.mrf.mxu2  ;;  %v1072_v21 = vpop.f32.mrf.mxu3 }
 0x70f   :  { %927 = vmatpush.msrb.mxu1 %v830_v20  ;;  %v801_v62 = vpop.f32.mrf.mxu1  ;;  %v770_v63 = vpop.f32.mrf.mxu0 }
 0x710   :  { %1687 = vmatpush.xpose.msk.msra.mxu0 %vm143_vm1, %v801_v62 }
 0x711   :  { %1007 = vmatpush.bf16.msra.mxu1 %v1855_v16 }
 0x713   :  { %1688 = vmatmul.msk.f32.vlgmr.msra.gmra.mxu0 %vm143_vm1, %v770_v63  ;;  %v1862_v63 = vld [vmem:[%s2334_s5 + $0x18] sm:$0xff] }
 0x714   :  { %975 = vmatpush.bf16.msrb.mxu0 %v1853_v30 }
 0x715   :  { %1008 = vmatpush.bf16.msra.mxu1 %v1854_v17  ;;  %v1868_v17 = vld [vmem:[%s2336_s7 + $0x68] sm:$0xff] }
 0x716   :  { %v832_v0 = vpop.f32.mrf.mxu2  ;;  %v1074_v1 = vpop.f32.mrf.mxu3 }
 0x717   :  { %950 = vmatpush.msrb.mxu2 %v832_v0  ;;  %1192 = vmatpush.msrb.mxu3 %v1074_v1  ;;  %v1861_v0 = vld [vmem:[%s2334_s5 + $0x10] sm:$0xff]  ;;  %s1967_s5 = smov 8  }
 0x719   :  { %1038 = vmatpush.bf16.msra.mxu2 %v1857_v18 }
 0x71d   :  { %1039 = vmatpush.bf16.msra.mxu2 %v1856_v19 }
 0x788   :  { %v858_v2 = vpop.f32.mrf.mxu0 }
 0x789   :  { %v887_v3 = vsel %vm196_vm2, %v858_v2, -inf }
 0x78a   :  { %888 = vmax.xlane.f32.xlu0 %v887_v3 }
 0x790   :  { %v884_v4 = vpop.f32.mrf.mxu0 }
 0x791   :  { %v890_v5 = vsel %vm196_vm2, %v884_v4, -inf }
 0x792   :  { %891 = vmax.xlane.f32.xlu2 %v890_v5 }
 0x7fd   :  { %v889_v6 = vpop.xlane.xlu0 %888 }
 0x7fe   :  { %v893_v7 = vsub.f32 %v858_v2, %v889_v6 }
 0x800   :  { %v895_v8 = vmul.f32 1.442695, %v893_v7 }
 0x802   :  { %1906 = vpow2.f32 %v895_v8  ;;  %v1879_v8 = vld [vmem:[%s2335_s6 + $0x1] ss:$0 sm:$0xff] }
 0x805   :  { %v892_v9 = vpop.xlane.xlu2 %891 }
 0x806   :  { %v894_v10 = vsub.f32 %v884_v4, %v892_v9 }
 0x808   :  { %v1907_v11 = vpop.eup %1906  ;;  %v897_v12 = vmul.f32 1.442695, %v894_v10 }
 0x809   :  { %v899_v13 = vsel %vm196_vm2, %v1907_v11, 0.0 }
 0x80a   :  { %1908 = vpow2.f32 %v897_v12  ;;  %900 = vadd.xlane.f32.xlu2 %v899_v13  ;;  %v1869_v13 = vld [vmem:[%s2336_s7 + $0x70] sm:$0xff] }
 0x810   :  { %v1909_v14 = vpop.eup %1908 }
 0x811   :  { %v902_v15 = vsel %vm196_vm2, %v1909_v14, 0.0 }
 0x812   :  { %903 = vadd.xlane.f32.xlu1 %v902_v15 }
 0x87d   :  { %v901_v22 = vpop.xlane.xlu2 %900 }
 0x87e   :  { %1910 = vrcp.f32 %v901_v22  ;;  %v1867_v22 = vld [vmem:[%s2336_s7 + $0x60] sm:$0xff] }
 0x884   :  { %v1911_v23 = vpop.eup %1910 }
 0x885   :  { %v907_v24 = vmul.f32 %v1911_v23, %v1907_v11  ;;  %v904_v27 = vpop.xlane.xlu1 %903 }
 0x886   :  { %1912 = vrcp.f32 %v904_v27 }
 0x887   :  { %1689 = vmatmul.msk.f32.vlgmr.msrb.gmra.mxu1 %vm196_vm2, %v907_v24 }
 0x88c   :  { %v1913_v28 = vpop.eup %1912 }
 0x88d   :  { %v908_v29 = vmul.f32 %v1913_v28, %v1909_v14 }
 0x88f   :  { %1690 = vmatmul.msk.f32.vlgmr.msrb.gmra.mxu2 %vm196_vm2, %v908_v29  ;;  %1710 = vmatmul.msk.bf16.vlgmr.msra.gmra.mxu1 %vm65_vm0, %v738_v59  ;;  %v1866_v29 = vld [vmem:[%s2336_s7 + $0x58] sm:$0xff] }
 0x897   :  { %1723 = vmatmul.msk.bf16.vlgmr.msra.gmra.mxu2 %vm65_vm0, %v738_v59 }
 0x904   :  { %v929_v31 = vpop.f32.mrf.mxu1 }
 0x90c   :  { %v1010_v38 = vpop.f32.mrf.mxu1 }
 0x912   :  { %v952_v34 = vpop.f32.mrf.mxu2 }
 0x913   :  { %v955_v36 = vpack.c.bf16 %v952_v34, %v929_v31 }
 0x914   :  { %v1012_v40 = vpop.f32.mrf.mxu1 }
 0x915   :  { %1697 = vmatmul.msk.bf16.vlgmr.msrb.gmra.mxu0 %vm143_vm1, %v955_v36 }
 0x91a   :  { %v1041_v37 = vpop.f32.mrf.mxu2 }
 0x91b   :  { %1737 = vmatpush.xpose.msk.msra.mxu0 %vm143_vm1, %v1041_v37  ;;  %v1865_v37 = vld [vmem:[%s2336_s7 + $0x50] sm:$0xff] }
 0x91f   :  { %1169 = vmatpush.msrb.mxu0 %v1072_v21 }
 0x922   :  { %v1043_v39 = vpop.f32.mrf.mxu2 }
 0x923   :  { %1739 = vmatpush.xpose.msk.msrb.mxu1 %vm143_vm1, %v1043_v39 }
 0x925   :  { %1738 = vmatmul.msk.f32.vlgmr.msra.gmra.mxu0 %vm143_vm1, %v1010_v38 }
 0x926   :  { %1740 = vmatmul.msk.f32.vlgmr.msrb.gmra.mxu1 %vm143_vm1, %v1012_v40  ;;  %1217 = vmatpush.bf16.msra.mxu0 %v1860_v61 }
 0x927   :  { %1258 = vmatpush.bf16.msra.mxu1 %v1862_v63 }
 0x92b   :  { %1259 = vmatpush.bf16.msra.mxu1 %v1861_v0 }
 0x992   :  { %v977_v41 = vpop.f32.mrf.mxu0 }
 0x993   :  { %v982_v2 = vadd.f32 %v977_v41, %v2198_v57 }
 0x99a   :  { %v979_v42 = vpop.f32.mrf.mxu0 }
 0x99b   :  { %v983_v3 = vadd.f32 %v979_v42, %v2201_v58  ;;  %v1870_v58 = vld [vmem:[%s2336_s7 + $0x78] sm:$0xff] }
 0x99c   :  { %1417 = vmatpush.bf16.msrb.mxu2 %v1870_v58 }
 0x9a0   :  { %1418 = vmatpush.bf16.msrb.mxu2 %v1869_v13 }
 0x9a2   :  { %v1100_v26 = vpop.f32.mrf.mxu0 }
 0x9a3   :  { %v1126_v43 = vpop.f32.mrf.mxu1  ;;  %v1129_v44 = vsel %vm196_vm2, %v1100_v26, -inf }
 0x9a4   :  { %1130 = vmax.xlane.f32.xlu1 %v1129_v44  ;;  %v1132_v45 = vsel %vm196_vm2, %v1126_v43, -inf  ;;  %1419 = vmatpush.bf16.msrb.mxu2 %v1868_v17 }
 0x9a5   :  { %1133 = vmax.xlane.f32.xlu0 %v1132_v45 }
 0x9a8   :  { %1420 = vmatpush.bf16.msrb.mxu2 %v1867_v22 }
 0x9ac   :  { %1421 = vmatpush.bf16.msrb.mxu2 %v1866_v29 }
 0x9b0   :  { %1422 = vmatpush.bf16.msrb.mxu2 %v1865_v37  ;;  %v1872_v37 = vld [vmem:[%s2338_s9 + $0x8] sm:$0xff] }
 0x9b1   :  { %1463 = vmatpush.bf16.msra.mxu3 %v1872_v37 }
 0xa17   :  { %v1131_v46 = vpop.xlane.xlu1 %1130 }
 0xa18   :  { %v1135_v47 = vsub.f32 %v1100_v26, %v1131_v46  ;;  %v1134_v35 = vpop.xlane.xlu0 %1133 }
 0xa19   :  { %v1136_v48 = vsub.f32 %v1126_v43, %v1134_v35  ;;  %v1864_v43 = vld [vmem:[%s2336_s7 + $0x48] sm:$0xff] }
 0xa1a   :  { %v1137_v25 = vmul.f32 1.442695, %v1135_v47  ;;  %1423 = vmatpush.bf16.msrb.mxu2 %v1864_v43 }
 0xa1b   :  { %v1139_v33 = vmul.f32 1.442695, %v1136_v48 }
 0xa1c   :  { %1914 = vpow2.f32 %v1137_v25 }
 0xa1d   :  { %1916 = vpow2.f32 %v1139_v33  ;;  %v1863_v33 = vld [vmem:[%s2336_s7 + $0x40] sm:$0xff] }
 0xa1e   :  { %1424 = vmatpush.bf16.msrb.mxu2 %v1863_v33 }
 0xa22   :  { %v1915_v49 = vpop.eup %1914 }
 0xa23   :  { %v1917_v50 = vpop.eup %1916  ;;  %v1141_v51 = vsel %vm196_vm2, %v1915_v49, 0.0 }
 0xa24   :  { %1142 = vadd.xlane.f32.xlu0 %v1141_v51  ;;  %v1144_v52 = vsel %vm196_vm2, %v1917_v50, 0.0 }
 0xa25   :  { %1145 = vadd.xlane.f32.xlu2 %v1144_v52 }
 0xa97   :  { %v1143_v53 = vpop.xlane.xlu0 %1142 }
 0xa98   :  { %1918 = vrcp.f32 %v1143_v53  ;;  %v1146_v54 = vpop.xlane.xlu2 %1145 }
 0xa99   :  { %1920 = vrcp.f32 %v1146_v54 }
 0xa9e   :  { %v1919_v55 = vpop.eup %1918 }
 0xa9f   :  { %v1921_v56 = vpop.eup %1920  ;;  %v1149_v59 = vmul.f32 %v1919_v55, %v1915_v49 }
 0xaa0   :  { %v1150_v60 = vmul.f32 %v1921_v56, %v1917_v50 }
 0xaa1   :  { %1741 = vmatmul.msk.f32.vlgmr.msrb.gmra.mxu0 %vm196_vm2, %v1149_v59 }
 0xaa2   :  { %1742 = vmatmul.msk.f32.vlgmr.msrb.gmra.mxu3 %vm196_vm2, %v1150_v60 }
 0xb1e   :  { %v1171_v20 = vpop.f32.mrf.mxu0 }
 0xb25   :  { %v1194_v21 = vpop.f32.mrf.mxu3 }
 0xb26   :  { %v1197_v62 = vpack.c.bf16 %v1194_v21, %v1171_v20 }
 0xb28   :  { %1749 = vmatmul.msk.bf16.vlgmr.msra.gmra.mxu0 %vm143_vm1, %v1197_v62 }
 0xba5   :  { %v1219_v1 = vpop.f32.mrf.mxu0 }
 0xba6   :  { %v2259_v5 = vadd.f32 %v1219_v1, %v982_v2 }
 0xbad   :  { %v1221_v4 = vpop.f32.mrf.mxu0 }
 0xbae   :  { %v2261_v6 = vadd.f32 %v1221_v4, %v983_v3 }
 0xbb0   :  { %v1226_v7 = vpack.c.bf16 %v2261_v6, %v2259_v5 }
 0xbb2   :  { %1763 = vmatmul.msk.bf16.vlgmr.msra.gmra.mxu1 %vm65_vm0, %v1226_v7 }
 0xc2f   :  { %v1261_v9 = vpop.f32.mrf.mxu1 }
 0xc30   :  { %v2269_v10 = vadd.f32 %v1879_v8, %v1261_v9 }
 0xc32   :  { %v2272_v57 = vmul.f32 0.70710677, %v2269_v10  ;;  %v1266_v29 = vmul.f32 0.5, %v2269_v10  ;;  %v1880_v10 = vld [vmem:[%s2337_s8 + $0x1] ss:$0 sm:$0xff]  ;;  %s1965_s8 = smov [#allocation2]  }
 0xc34   :  { %v1274_v11 = vand.u32 2147483647, %v2272_v57  ;;  %vm1270_vm6 = vcmp.ge.f32.partialorder %v2272_v57, 0.0 }
 0xc35   :  { %v1272_v17 = vsel %vm1270_vm6, 1.0, %v1964_v32 }
 0xc36   :  { %v1276_v12 = vmul.f32 0.3275911, %v1274_v11  ;;  %v1328_v45 = vsub.f32 0.0, %v1274_v11 }
 0xc37   :  { %v1263_v14 = vpop.f32.mrf.mxu1 }
 0xc38   :  { %v1278_v15 = vadd.f32 1.0, %v1276_v12  ;;  %v2281_v16 = vadd.f32 %v1879_v8, %v1263_v14  ;;  %v1330_v50 = vmul.f32 %v1328_v45, %v1274_v11 }
 0xc3a   :  { %1922 = vrcp.f32 %v1278_v15  ;;  %v2287_v18 = vmul.f32 0.70710677, %v2281_v16  ;;  %v1291_v31 = vand.u32 2147483648, %v1278_v15  ;;  %v1289_v36 = vand.u32 2147483647, %v1278_v15 }
 0xc3b   :  { %vm1285_vm14 = vweird.f32 %v1278_v15  ;;  %v1332_v56 = vmul.f32 1.442695, %v1330_v50 }
 0xc3c   :  { %v1275_v19 = vand.u32 2147483647, %v2287_v18  ;;  %v1292_v39 = vor.u32 1.1754944e-38, %v1291_v31  ;;  %vm1290_vm1 = vcmp.eq.f32.partialorder %v1289_v36, 8.507059e+37  ;;  %vm1271_vm7 = vcmp.ge.f32.partialorder %v2287_v18, 0.0 }
 0xc3e   :  { %v1277_v23 = vmul.f32 0.3275911, %v1275_v19  ;;  %v1329_v60 = vsub.f32 0.0, %v1275_v19 }
 0xc40   :  { %v1923_v24 = vpop.eup %1922  ;;  %v1279_v28 = vadd.f32 1.0, %v1277_v23  ;;  %v1331_v63 = vmul.f32 %v1329_v60, %v1275_v19 }
 0xc41   :  { %v1281_v27 = vmul.f32 %v1923_v24, %v1278_v15  ;;  %vm1286_vm13 = vweird.f32 %v1923_v24 }
 0xc42   :  { %1924 = vrcp.f32 %v1279_v28  ;;  %vm1287_vm15 = vmor %vm1285_vm14, %vm1286_vm13  ;;  %v1306_v35 = vand.u32 2147483648, %v1279_v28  ;;  %v1304_v25 = vand.u32 2147483647, %v1279_v28  ;;  %vm1300_vm3 = vweird.f32 %v1279_v28 }
 0xc43   :  { %v1282_v30 = vsub.f32 1.0, %v1281_v27  ;;  %1926 = vpow2.f32 %v1332_v56  ;;  %v1334_v4 = vmul.f32 1.442695, %v1331_v63 }
 0xc44   :  { %v1307_v53 = vor.u32 1.1754944e-38, %v1306_v35  ;;  %vm1305_vm5 = vcmp.eq.f32.partialorder %v1304_v25, 8.507059e+37 }
 0xc45   :  { %v1283_v34 = vmul.f32 %v1923_v24, %v1282_v30  ;;  %1928 = vpow2.f32 %v1334_v4  ;;  %v1267_v30 = vmul.f32 0.5, %v2281_v16 }
 0xc47   :  { %v1284_v38 = vadd.f32 %v1923_v24, %v1283_v34 }
 0xc48   :  { %v1925_v40 = vpop.eup %1924 }
 0xc49   :  { %v1288_v41 = vsel %vm1287_vm15, %v1923_v24, %v1284_v38  ;;  %v1296_v26 = vmul.f32 %v1925_v40, %v1279_v28  ;;  %vm1301_vm2 = vweird.f32 %v1925_v40  ;;  %v1927_v8 = vpop.eup %1926  ;;  %v1273_v24 = vsel %vm1271_vm7, 1.0, %v1964_v32  ;;  %v1871_v32 = vld [vmem:[%s2338_s9] sm:$0xff]  ;;  %s1497_s9 = sshll.u32 %s1965_s8, 4  ;;  %s1498_s9 = int_to_ptr.vmem [resolvable:$true] %s1497_s9 }
 0xc4a   :  { %v1293_v42 = vsel %vm1290_vm1, %v1292_v39, %v1288_v41  ;;  %vm1302_vm4 = vmor %vm1300_vm3, %vm1301_vm2  ;;  %1464 = vmatpush.bf16.msra.mxu3 %v1871_v32 }
 0xc4b   :  { %v1310_v44 = vmul.f32 1.0614054, %v1293_v42  ;;  %v1297_v46 = vsub.f32 1.0, %v1296_v26  ;;  %v1929_v15 = vpop.eup %1928  ;;  %v1881_v26 = vld [vmem:[%s2339_s10] ss:$0 sm:$0xff] }
 0xc4d   :  { %v1312_v47 = vadd.f32 -1.4531521, %v1310_v44  ;;  %v1298_v48 = vmul.f32 %v1925_v40, %v1297_v46 }
 0xc4f   :  { %v1314_v49 = vmul.f32 %v1312_v47, %v1293_v42  ;;  %v1299_v51 = vadd.f32 %v1925_v40, %v1298_v48 }
 0xc51   :  { %v1316_v52 = vadd.f32 1.4214138, %v1314_v49  ;;  %v1303_v54 = vsel %vm1302_vm4, %v1925_v40, %v1299_v51 }
 0xc52   :  { %v1308_v59 = vsel %vm1305_vm5, %v1307_v53, %v1303_v54 }
 0xc53   :  { %v1318_v55 = vmul.f32 %v1316_v52, %v1293_v42  ;;  %v1311_v61 = vmul.f32 1.0614054, %v1308_v59 }
 0xc55   :  { %v1320_v20 = vadd.f32 -0.28449672, %v1318_v55  ;;  %v1313_v21 = vadd.f32 -1.4531521, %v1311_v61 }
 0xc57   :  { %v1322_v62 = vmul.f32 %v1320_v20, %v1293_v42  ;;  %v1315_v0 = vmul.f32 %v1313_v21, %v1308_v59 }
 0xc59   :  { %v1324_v1 = vadd.f32 0.2548296, %v1322_v62  ;;  %v1317_v2 = vadd.f32 1.4214138, %v1315_v0 }
 0xc5b   :  { %v1326_v3 = vmul.f32 %v1324_v1, %v1293_v42  ;;  %v1319_v7 = vmul.f32 %v1317_v2, %v1308_v59 }
 0xc5d   :  { %v1336_v9 = vmul.f32 %v1927_v8, %v1326_v3  ;;  %v1321_v58 = vadd.f32 -0.28449672, %v1319_v7 }
 0xc5f   :  { %v1323_v11 = vmul.f32 %v1321_v58, %v1308_v59  ;;  %v1338_v12 = vsub.f32 1.0, %v1336_v9 }
 0xc61   :  { %v1325_v13 = vadd.f32 0.2548296, %v1323_v11  ;;  %v1340_v19 = vmul.f32 %v1338_v12, %v1272_v17 }
 0xc63   :  { %v1327_v14 = vmul.f32 %v1325_v13, %v1308_v59  ;;  %v1342_v27 = vadd.f32 1.0, %v1340_v19 }
 0xc65   :  { %v1337_v22 = vmul.f32 %v1929_v15, %v1327_v14  ;;  %v1344_v31 = vmul.f32 %v1342_v27, %v1266_v29 }
 0xc67   :  { %v1339_v23 = vsub.f32 1.0, %v1337_v22 }
 0xc69   :  { %v1341_v28 = vmul.f32 %v1339_v23, %v1273_v24 }
 0xc6b   :  { %v1343_v57 = vadd.f32 1.0, %v1341_v28 }
 0xc6d   :  { %v1345_v34 = vmul.f32 %v1343_v57, %v1267_v30 }
 0xc6f   :  { %v1346_v36 = vpack.c.bf16 %v1345_v34, %v1344_v31 }
 0xc71   :  { %1425 = vmatmul.bf16.vlgmr.msrb.gmra.mxu2 %v1346_v36 }
 0xcf4   :  { %v1426_v18 = vpop.f32.mrf.mxu2 }
 0xcf5   :  { %v1427_v16 = vadd.f32 %v1880_v10, %v1426_v18 }
 0xcf7   :  { %v1431_v40 = vadd.f32 %v1427_v16, %v2259_v5 }
 0xcfc   :  { %v1428_v38 = vpop.f32.mrf.mxu2 }
 0xcfd   :  { %v1429_v39 = vadd.f32 %v1880_v10, %v1428_v38 }
 0xcff   :  { %v1432_v41 = vadd.f32 %v1429_v39, %v2261_v6 }
 0xd01   :  { %v1433_v42 = vpack.c.bf16 %v1432_v41, %v1431_v40 }
 0xd03   :  { %1821 = vmatmul.msk.bf16.vlgmr.msra.gmra.mxu3 %vm65_vm0, %v1433_v42 }
 0xd86   :  { %v1466_v43 = vpop.f32.mrf.mxu3 }
 0xd87   :  { %v1467_v44 = vadd.f32 %v1881_v26, %v1466_v43 }
 0xd89   :  { %1471 = vmax.xlane.f32.xlu1 %v1467_v44 }
 0xd8e   :  { %v1468_v45 = vpop.f32.mrf.mxu3 }
 0xd8f   :  { %v1469_v46 = vadd.f32 %v1881_v26, %v1468_v45 }
 0xd91   :  { %1473 = vmax.xlane.f32.xlu2 %v1469_v46 }
 0xdfc   :  { %v1472_v47 = vpop.xlane.xlu1 %1471 }
 0xdfd   :  { %v1475_v35 = vsub.f32 %v1467_v44, %v1472_v47 }
 0xdff   :  { %v1477_v48 = vmul.f32 1.442695, %v1475_v35 }
 0xe01   :  { %1930 = vpow2.f32 %v1477_v48 }
 0xe04   :  { %v1474_v5 = vpop.xlane.xlu2 %1473 }
 0xe05   :  { %v1476_v25 = vsub.f32 %v1469_v46, %v1474_v5 }
 0xe07   :  { %v1931_v6 = vpop.eup %1930  ;;  %v1479_v33 = vmul.f32 1.442695, %v1476_v25 }
 0xe08   :  { %1481 = vadd.xlane.f32.xlu0 %v1931_v6 }
 0xe09   :  { %1932 = vpow2.f32 %v1479_v33 }
 0xe0f   :  { %v1933_v49 = vpop.eup %1932 }
 0xe10   :  { %1483 = vadd.xlane.f32.xlu1 %v1933_v49 }
 0xe7b   :  { %v1482_v50 = vpop.xlane.xlu0 %1481 }
 0xe7c   :  { %1934 = vlog2.f32 %v1482_v50 }
 0xe82   :  { %v1935_v51 = vpop.eup %1934 }
 0xe83   :  { %v1486_v52 = vmul.f32 0.6931472, %v1935_v51  ;;  %v1484_v53 = vpop.xlane.xlu1 %1483 }
 0xe84   :  { %1936 = vlog2.f32 %v1484_v53 }
 0xe85   :  { %v1489_v54 = vsub.f32 %v1475_v35, %v1486_v52 }
 0xe87   :  { %1491 = vst [vmem:[#allocation2] sm:$0xff] %v1489_v54 }
 0xe8a   :  { %v1937_v55 = vpop.eup %1936 }
 0xe8b   :  { %v1488_v56 = vmul.f32 0.6931472, %v1937_v55 }
 0xe8d   :  { %v1490_v59 = vsub.f32 %v1476_v25, %v1488_v56 }
 0xe8f   :  { %1492 = vst [vmem:[#allocation2 + $0x8] sm:$0xff] %v1490_v59 }
 0xe90   :  { %1505 = dma.vmem_to_hbm [thread:$0]  %s1498_s9, 256, %s1500_s4, [#allocation3], %s1966_s23, %s1966_s23, %s1967_s5  }
 0xe91   :  { %1962 = dma.done.wait [#allocation3], 256  }
 0xe92   :  { %1963 = vsyncadd [#allocation3], 4294967040 }
 0xe93   :  { %1510 = vsyncpa [#allocation3], 1 }

// kernel: tpu_custom_call.1
= control target key start
LH: loop header
LB: loop body
LE: loop exit
PB: predicated region body
PF: predicated region fallthrough
CT: control target
= control target key end

     0   :  { %s2329_s0 = inlined_call_operand.vmem [shape: bf16[2,8,32], index: 0, kind: input, shape index: {}]   ;;  %s2330_s1 = inlined_call_operand.vmem [shape: bf16[2,2,32,16], index: 1, kind: input, shape index: {}]   ;;  %s2331_s2 = inlined_call_operand.vmem [shape: bf16[2,2,32,16], index: 2, kind: input, shape index: {}]   ;;  %s2332_s3 = inlined_call_operand.vmem [shape: bf16[2,2,32,16], index: 3, kind: input, shape index: {}]   ;;  %s2333_s4 = inlined_call_operand.vmem [shape: bf16[2,2,16,32], index: 4, kind: input, shape index: {}]   ;;  %s2334_s5 = inlined_call_operand.vmem [shape: bf16[2,32,128], index: 5, kind: input, shape index: {}]   ;;  %s2335_s6 = inlined_call_operand.vmem [shape: f32[2,1,128], index: 6, kind: input, shape index: {}]   ;;  %s2336_s7 = inlined_call_operand.vmem [shape: bf16[2,128,32], index: 7, kind: input, shape index: {}]   ;;  %s2337_s8 = inlined_call_operand.vmem [shape: f32[2,1,32], index: 8, kind: input, shape index: {}]   ;;  %s2338_s9 = inlined_call_operand.vmem [shape: bf16[32,128], index: 9, kind: input, shape index: {}]   ;;  %s2339_s10 = inlined_call_operand.vmem [shape: f32[1,128], index: 10, kind: input, shape index: {}]   ;;  %s2340_s11 = inlined_call_operand.hbm [shape: f32[2,8,128], index: 11, kind: output, shape index: {}]  }
   0x1   :  { %v1824_v0 = vld [vmem:[%s2330_s1 + $0x8] sm:$0xff]  ;;  %v1823_v2 = vld [vmem:[%s2330_s1] sm:$0xff] }
   0x2   :  { %v1826_v1 = vld [vmem:[%s2331_s2 + $0x8] sm:$0xff]  ;;  %v1825_v3 = vld [vmem:[%s2331_s2] sm:$0xff]  ;;  %75 = vmatpush.bf16.msra.mxu0 %v1824_v0 }
   0x3   :  { %105 = vmatpush.bf16.msra.mxu1 %v1826_v1 }
   0x4   :  { %16 = vsyncpa [#allocation3], 0  ;;  %v2043_v4 = vld [vmem:[%s2329_s0] sm:$0xff]  ;;  %vm65_vm0 = vcmask 261120   ;;  %vm143_vm1 = vcmask 130048   ;;  %v1828_v9 = vld [vmem:[%s2332_s3 + $0x8] sm:$0xff] }
   0x5   :  { %135 = vmatpush.bf16.msra.mxu2 %v1828_v9  ;;  %v1827_v10 = vld [vmem:[%s2332_s3] sm:$0xff]  ;;  %vm196_vm2 = vcmask 64512   ;;  %v1831_v26 = vld [vmem:[%s2330_s1 + $0x18] sm:$0xff]  ;;  %v1830_v29 = vld [vmem:[%s2330_s1 + $0x10] sm:$0xff]  ;;  %s1966_s23 = smov 128  }
   0x6   :  { %76 = vmatpush.bf16.msra.mxu0 %v1823_v2  ;;  %v1833_v28 = vld [vmem:[%s2331_s2 + $0x18] sm:$0xff]  ;;  %v1832_v30 = vld [vmem:[%s2331_s2 + $0x10] sm:$0xff]  ;;  %v1829_v37 = vld [vmem:[%s2333_s4] sm:$0xff] }
   0x7   :  { %106 = vmatpush.bf16.msra.mxu1 %v1825_v3  ;;  %v1835_v45 = vld [vmem:[%s2332_s3 + $0x18] sm:$0xff]  ;;  %v1834_v46 = vld [vmem:[%s2332_s3 + $0x10] sm:$0xff] }
   0x9   :  { %1523 = vmatmul.msk.bf16.vlgmr.msra.gmra.mxu0 %vm65_vm0, %v2043_v4  ;;  %136 = vmatpush.bf16.msra.mxu2 %v1827_v10 }
   0xa   :  { %1532 = vmatmul.msk.bf16.vlgmr.msra.gmra.mxu1 %vm65_vm0, %v2043_v4 }
   0xb   :  { %284 = vmatpush.bf16.msrb.mxu1 %v1829_v37  ;;  %v1843_v37 = vld [vmem:[%s2336_s7 + $0x20] sm:$0xff] }
   0xc   :  { %1541 = vmatmul.msk.bf16.vlgmr.msra.gmra.mxu2 %vm65_vm0, %v2043_v4 }
   0xd   :  { %316 = vmatpush.bf16.msrb.mxu2 %v1831_v26 }
  0x11   :  { %317 = vmatpush.bf16.msrb.mxu2 %v1830_v29 }
  0x1c   :  { %1565 = vmatmul.msk.bf16.vlgmr.msrb.gmra.mxu2 %vm65_vm0, %v2043_v4 }
  0x86   :  { %v78_v6 = vpop.f32.mrf.mxu0 }
  0x87   :  { %v108_v5 = vpop.f32.mrf.mxu1 }
  0x88   :  { %1542 = vmatpush.xpose.msk.msra.mxu3 %vm143_vm1, %v108_v5 }
  0x8b   :  { %1543 = vmatmul.msk.f32.vlgmr.msra.gmra.mxu3 %vm143_vm1, %v78_v6 }
  0x8e   :  { %v80_v8 = vpop.f32.mrf.mxu0 }
  0x8f   :  { %v110_v7 = vpop.f32.mrf.mxu1  ;;  %v138_v17 = vpop.f32.mrf.mxu2 }
  0x90   :  { %1544 = vmatpush.xpose.msk.msrb.mxu3 %vm143_vm1, %v110_v7  ;;  %v1836_v7 = vld [vmem:[%s2333_s4 + $0x8] sm:$0xff] }
  0x93   :  { %1545 = vmatmul.msk.f32.vlgmr.msrb.gmra.mxu3 %vm143_vm1, %v80_v8 }
  0x94   :  { %237 = vmatpush.msra.mxu3 %v138_v17 }
  0x96   :  { %347 = vmatpush.bf16.msrb.mxu3 %v1833_v28 }
  0x97   :  { %v140_v27 = vpop.f32.mrf.mxu2 }
  0x98   :  { %260 = vmatpush.msrb.mxu0 %v140_v27  ;;  %v1846_v27 = vld [vmem:[%s2336_s7 + $0x38] sm:$0xff] }
  0x9a   :  { %348 = vmatpush.bf16.msrb.mxu3 %v1832_v30  ;;  %378 = vmatpush.bf16.msra.mxu0 %v1835_v45  ;;  %v1845_v30 = vld [vmem:[%s2336_s7 + $0x30] sm:$0xff] }
  0x9e   :  { %379 = vmatpush.bf16.msra.mxu0 %v1834_v46 }
  0x9f   :  { %v319_v42 = vpop.f32.mrf.mxu2 }
  0xa7   :  { %v321_v44 = vpop.f32.mrf.mxu2 }
 0x10e   :  { %v167_v11 = vpop.f32.mrf.mxu3 }
 0x10f   :  { %v197_v12 = vsel %vm196_vm2, %v167_v11, -inf }
 0x110   :  { %198 = vmax.xlane.f32.xlu0 %v197_v12  ;;  %v1837_v12 = vld [vmem:[%s2334_s5] sm:$0xff] }
 0x116   :  { %v193_v13 = vpop.f32.mrf.mxu3 }
 0x117   :  { %v200_v14 = vsel %vm196_vm2, %v193_v13, -inf }
 0x118   :  { %201 = vmax.xlane.f32.xlu0 %v200_v14 }
 0x183   :  { %v199_v15 = vpop.xlane.xlu0 %198 }
 0x184   :  { %v203_v16 = vsub.f32 %v167_v11, %v199_v15  ;;  %v1838_v11 = vld [vmem:[%s2334_s5 + $0x8] sm:$0xff] }
 0x186   :  { %v205_v18 = vmul.f32 1.442695, %v203_v16 }
 0x188   :  { %1882 = vpow2.f32 %v205_v18 }
 0x18b   :  { %v202_v19 = vpop.xlane.xlu0 %201 }
 0x18c   :  { %v204_v20 = vsub.f32 %v193_v13, %v202_v19  ;;  %v40_v13 = vld [vmem:[%s2329_s0] sm:$0xff]  }
 0x18d   :  { %v42_v15 = vunpack.c.l.bf16 %v40_v13  ;;  %v43_v16 = vunpack.c.h.bf16 %v40_v13 }
 0x18e   :  { %v1883_v21 = vpop.eup %1882  ;;  %v207_v22 = vmul.f32 1.442695, %v204_v20 }
 0x18f   :  { %v209_v23 = vsel %vm196_vm2, %v1883_v21, 0.0 }
 0x190   :  { %1884 = vpow2.f32 %v207_v22  ;;  %210 = vadd.xlane.f32.xlu1 %v209_v23  ;;  %v1877_v23 = vld [vmem:[%s2335_s6] ss:$0 sm:$0xff] }
 0x196   :  { %v1885_v24 = vpop.eup %1884 }
 0x197   :  { %v212_v25 = vsel %vm196_vm2, %v1885_v24, 0.0 }
 0x198   :  { %213 = vadd.xlane.f32.xlu1 %v212_v25 }
 0x203   :  { %v211_v31 = vpop.xlane.xlu1 %210 }
 0x204   :  { %1886 = vrcp.f32 %v211_v31 }
 0x20a   :  { %v1887_v32 = vpop.eup %1886 }
 0x20b   :  { %v217_v33 = vmul.f32 %v1887_v32, %v1883_v21  ;;  %v214_v34 = vpop.xlane.xlu1 %213 }
 0x20c   :  { %1888 = vrcp.f32 %v214_v34  ;;  %v1844_v34 = vld [vmem:[%s2336_s7 + $0x28] sm:$0xff] }
 0x20d   :  { %1546 = vmatmul.msk.f32.vlgmr.msra.gmra.mxu3 %vm196_vm2, %v217_v33 }
 0x212   :  { %v1889_v35 = vpop.eup %1888 }
 0x213   :  { %v218_v36 = vmul.f32 %v1889_v35, %v1885_v24 }
 0x215   :  { %1547 = vmatmul.msk.f32.vlgmr.msrb.gmra.mxu0 %vm196_vm2, %v218_v36  ;;  %1578 = vmatmul.msk.bf16.vlgmr.msrb.gmra.mxu3 %vm65_vm0, %v2043_v4 }
 0x21d   :  { %1591 = vmatmul.msk.bf16.vlgmr.msra.gmra.mxu0 %vm65_vm0, %v2043_v4 }
 0x290   :  { %v239_v38 = vpop.f32.mrf.mxu3 }
 0x292   :  { %v262_v39 = vpop.f32.mrf.mxu0 }
 0x293   :  { %v265_v40 = vpack.c.bf16 %v262_v39, %v239_v38 }
 0x295   :  { %1552 = vmatmul.msk.bf16.vlgmr.msrb.gmra.mxu1 %vm143_vm1, %v265_v40 }
 0x298   :  { %v350_v41 = vpop.f32.mrf.mxu3 }
 0x299   :  { %1592 = vmatpush.xpose.msk.msra.mxu1 %vm143_vm1, %v350_v41 }
 0x29a   :  { %v381_v53 = vpop.f32.mrf.mxu0 }
 0x29b   :  { %478 = vmatpush.msra.mxu3 %v381_v53 }
 0x29d   :  { %526 = vmatpush.bf16.msrb.mxu1 %v1836_v7  ;;  %722 = vmatpush.bf16.msrb.mxu3 %v1846_v27 }
 0x2a0   :  { %v352_v43 = vpop.f32.mrf.mxu3 }
 0x2a1   :  { %1594 = vmatpush.xpose.msk.msra.mxu2 %vm143_vm1, %v352_v43  ;;  %723 = vmatpush.bf16.msrb.mxu3 %v1845_v30 }
 0x2a2   :  { %v383_v0 = vpop.f32.mrf.mxu0 }
 0x2a3   :  { %501 = vmatpush.msrb.mxu0 %v383_v0 }
 0x2a4   :  { %1595 = vmatmul.msk.f32.vlgmr.msra.gmra.mxu2 %vm143_vm1, %v321_v44 }
 0x2a5   :  { %1593 = vmatmul.msk.f32.vlgmr.msra.gmra.mxu1 %vm143_vm1, %v319_v42  ;;  %565 = vmatpush.bf16.msrb.mxu2 %v1838_v11  ;;  %v1842_v42 = vld [vmem:[%s2336_s7 + $0x18] sm:$0xff] }
 0x2a6   :  { %724 = vmatpush.bf16.msrb.mxu3 %v1844_v34 }
 0x2a9   :  { %566 = vmatpush.bf16.msrb.mxu2 %v1837_v12 }
 0x2aa   :  { %725 = vmatpush.bf16.msrb.mxu3 %v1843_v37 }
 0x2ae   :  { %726 = vmatpush.bf16.msrb.mxu3 %v1842_v42 }
 0x312   :  { %v286_v47 = vpop.f32.mrf.mxu1 }
 0x313   :  { %v291_v17 = vadd.f32 %v286_v47, %v42_v15  ;;  %v1841_v47 = vld [vmem:[%s2336_s7 + $0x10] sm:$0xff] }
 0x314   :  { %727 = vmatpush.bf16.msrb.mxu3 %v1841_v47  ;;  %v1848_v47 = vld [vmem:[%s2330_s1 + $0x28] sm:$0xff] }
 0x315   :  { %765 = vmatpush.bf16.msra.mxu0 %v1848_v47 }
 0x31a   :  { %v288_v48 = vpop.f32.mrf.mxu1 }
 0x31b   :  { %v292_v18 = vadd.f32 %v288_v48, %v43_v16 }
 0x322   :  { %v409_v49 = vpop.f32.mrf.mxu1 }
 0x323   :  { %v438_v50 = vsel %vm196_vm2, %v409_v49, -inf }
 0x324   :  { %439 = vmax.xlane.f32.xlu2 %v438_v50 }
 0x327   :  { %v435_v51 = vpop.f32.mrf.mxu2 }
 0x328   :  { %v441_v52 = vsel %vm196_vm2, %v435_v51, -inf }
 0x32c   :  { %442 = vmax.xlane.f32.xlu2 %v441_v52 }
 0x397   :  { %v440_v54 = vpop.xlane.xlu2 %439 }
 0x398   :  { %v444_v55 = vsub.f32 %v409_v49, %v440_v54  ;;  %v1840_v54 = vld [vmem:[%s2336_s7 + $0x8] sm:$0xff] }
 0x399   :  { %728 = vmatpush.bf16.msrb.mxu3 %v1840_v54 }
 0x39a   :  { %v446_v56 = vmul.f32 1.442695, %v444_v55 }
 0x39c   :  { %1890 = vpow2.f32 %v446_v56 }
 0x39f   :  { %v443_v57 = vpop.xlane.xlu2 %442 }
 0x3a0   :  { %v445_v58 = vsub.f32 %v435_v51, %v443_v57 }
 0x3a2   :  { %v1891_v59 = vpop.eup %1890  ;;  %v448_v60 = vmul.f32 1.442695, %v445_v58 }
 0x3a3   :  { %v450_v61 = vsel %vm196_vm2, %v1891_v59, 0.0 }
 0x3a4   :  { %1892 = vpow2.f32 %v448_v60  ;;  %451 = vadd.xlane.f32.xlu0 %v450_v61 }
 0x3aa   :  { %v1893_v62 = vpop.eup %1892 }
 0x3ab   :  { %v453_v63 = vsel %vm196_vm2, %v1893_v62, 0.0 }
 0x3ac   :  { %454 = vadd.xlane.f32.xlu1 %v453_v63 }
 0x417   :  { %v452_v1 = vpop.xlane.xlu0 %451 }
 0x418   :  { %1894 = vrcp.f32 %v452_v1 }
 0x41e   :  { %v1895_v2 = vpop.eup %1894 }
 0x41f   :  { %v458_v3 = vmul.f32 %v1895_v2, %v1891_v59  ;;  %v455_v4 = vpop.xlane.xlu1 %454 }
 0x420   :  { %1896 = vrcp.f32 %v455_v4 }
 0x421   :  { %1596 = vmatmul.msk.f32.vlgmr.msra.gmra.mxu3 %vm196_vm2, %v458_v3 }
 0x426   :  { %v1897_v5 = vpop.eup %1896 }
 0x427   :  { %v459_v6 = vmul.f32 %v1897_v5, %v1893_v62  ;;  %v1839_v62 = vld [vmem:[%s2336_s7] sm:$0xff] }
 0x428   :  { %729 = vmatpush.bf16.msrb.mxu3 %v1839_v62 }
 0x429   :  { %1597 = vmatmul.msk.f32.vlgmr.msrb.gmra.mxu0 %vm196_vm2, %v459_v6 }
 0x4a4   :  { %v480_v8 = vpop.f32.mrf.mxu3 }
 0x4a6   :  { %v503_v9 = vpop.f32.mrf.mxu0 }
 0x4a7   :  { %v506_v10 = vpack.c.bf16 %v503_v9, %v480_v8 }
 0x4a9   :  { %1604 = vmatmul.msk.bf16.vlgmr.msrb.gmra.mxu1 %vm143_vm1, %v506_v10 }
 0x526   :  { %v528_v14 = vpop.f32.mrf.mxu1 }
 0x527   :  { %v2118_v20 = vadd.f32 %v528_v14, %v291_v17 }
 0x52e   :  { %v530_v19 = vpop.f32.mrf.mxu1 }
 0x52f   :  { %v2120_v21 = vadd.f32 %v530_v19, %v292_v18 }
 0x531   :  { %v535_v22 = vpack.c.bf16 %v2120_v21, %v2118_v20 }
 0x533   :  { %1613 = vmatmul.msk.bf16.vlgmr.msrb.gmra.mxu2 %vm65_vm0, %v535_v22 }
 0x5b6   :  { %v568_v24 = vpop.f32.mrf.mxu2 }
 0x5b7   :  { %v2128_v25 = vadd.f32 %v1877_v23, %v568_v24 }
 0x5b9   :  { %v2131_v26 = vmul.f32 0.70710677, %v2128_v25  ;;  %v573_v42 = vmul.f32 0.5, %v2128_v25  ;;  %v1859_v25 = vld [vmem:[%s2332_s3 + $0x38] sm:$0xff] }
 0x5ba   :  { %1069 = vmatpush.bf16.msra.mxu3 %v1859_v25 }
 0x5bb   :  { %v581_v28 = vand.u32 2147483647, %v2131_v26  ;;  %vm577_vm11 = vcmp.ge.f32.partialorder %v2131_v26, 0.0 }
 0x5bd   :  { %v583_v29 = vmul.f32 0.3275911, %v581_v28  ;;  %v635_v56 = vsub.f32 0.0, %v581_v28 }
 0x5be   :  { %v570_v31 = vpop.f32.mrf.mxu2 }
 0x5bf   :  { %v585_v32 = vadd.f32 1.0, %v583_v29  ;;  %v2140_v33 = vadd.f32 %v1877_v23, %v570_v31  ;;  %v637_v0 = vmul.f32 %v635_v56, %v581_v28 }
 0x5c1   :  { %1898 = vrcp.f32 %v585_v32  ;;  %v2146_v35 = vmul.f32 0.70710677, %v2140_v33  ;;  %v598_v44 = vand.u32 2147483648, %v585_v32  ;;  %v596_v46 = vand.u32 2147483647, %v585_v32 }
 0x5c2   :  { %vm592_vm4 = vweird.f32 %v585_v32  ;;  %v639_v6 = vmul.f32 1.442695, %v637_v0  ;;  %v574_v26 = vmul.f32 0.5, %v2140_v33  ;;  %v1847_v33 = vld [vmem:[%s2330_s1 + $0x20] sm:$0xff] }
 0x5c3   :  { %v582_v36 = vand.u32 2147483647, %v2146_v35  ;;  %v599_v49 = vor.u32 1.1754944e-38, %v598_v44  ;;  %vm597_vm6 = vcmp.eq.f32.partialorder %v596_v46, 8.507059e+37  ;;  %vm578_vm12 = vcmp.ge.f32.partialorder %v2146_v35, 0.0  ;;  %v1850_v35 = vld [vmem:[%s2331_s2 + $0x28] sm:$0xff]  ;;  %766 = vmatpush.bf16.msra.mxu0 %v1847_v33 }
 0x5c4   :  { %796 = vmatpush.bf16.msra.mxu1 %v1850_v35 }
 0x5c5   :  { %v584_v38 = vmul.f32 0.3275911, %v582_v36  ;;  %v636_v8 = vsub.f32 0.0, %v582_v36 }
 0x5c7   :  { %v1899_v39 = vpop.eup %1898  ;;  %v586_v41 = vadd.f32 1.0, %v584_v38  ;;  %v638_v13 = vmul.f32 %v636_v8, %v582_v36 }
 0x5c8   :  { %v588_v40 = vmul.f32 %v1899_v39, %v585_v32  ;;  %vm593_vm3 = vweird.f32 %v1899_v39  ;;  %v1964_v32 = vmov -1.0  }
 0x5c9   :  { %1900 = vrcp.f32 %v586_v41  ;;  %vm594_vm5 = vmor %vm592_vm4, %vm593_vm3  ;;  %v613_v59 = vand.u32 2147483648, %v586_v41  ;;  %v611_v61 = vand.u32 2147483647, %v586_v41  ;;  %vm607_vm8 = vweird.f32 %v586_v41 }
 0x5ca   :  { %v589_v43 = vsub.f32 1.0, %v588_v40  ;;  %1902 = vpow2.f32 %v639_v6  ;;  %v641_v18 = vmul.f32 1.442695, %v638_v13  ;;  %v579_v34 = vsel %vm577_vm11, 1.0, %v1964_v32 }
 0x5cb   :  { %v614_v3 = vor.u32 1.1754944e-38, %v613_v59  ;;  %vm612_vm10 = vcmp.eq.f32.partialorder %v611_v61, 8.507059e+37 }
 0x5cc   :  { %v590_v45 = vmul.f32 %v1899_v39, %v589_v43  ;;  %1904 = vpow2.f32 %v641_v18  ;;  %v1857_v18 = vld [vmem:[%s2331_s2 + $0x38] sm:$0xff] }
 0x5ce   :  { %v591_v48 = vadd.f32 %v1899_v39, %v590_v45 }
 0x5cf   :  { %v1901_v50 = vpop.eup %1900 }
 0x5d0   :  { %v595_v51 = vsel %vm594_vm5, %v1899_v39, %v591_v48  ;;  %v603_v53 = vmul.f32 %v1901_v50, %v586_v41  ;;  %vm608_vm7 = vweird.f32 %v1901_v50  ;;  %v1903_v22 = vpop.eup %1902  ;;  %v580_v39 = vsel %vm578_vm12, 1.0, %v1964_v32  ;;  %v1852_v48 = vld [vmem:[%s2332_s3 + $0x28] sm:$0xff] }
 0x5d1   :  { %v600_v52 = vsel %vm597_vm6, %v599_v49, %v595_v51  ;;  %vm609_vm9 = vmor %vm607_vm8, %vm608_vm7  ;;  %827 = vmatpush.bf16.msra.mxu2 %v1852_v48  ;;  %v1849_v49 = vld [vmem:[%s2331_s2 + $0x20] sm:$0xff]  ;;  %v1858_v51 = vld [vmem:[%s2332_s3 + $0x30] sm:$0xff] }
 0x5d2   :  { %v617_v55 = vmul.f32 1.0614054, %v600_v52  ;;  %v604_v57 = vsub.f32 1.0, %v603_v53  ;;  %v1905_v31 = vpop.eup %1904  ;;  %797 = vmatpush.bf16.msra.mxu1 %v1849_v49  ;;  %1070 = vmatpush.bf16.msra.mxu3 %v1858_v51  ;;  %v1878_v53 = vld [vmem:[%s2337_s8] ss:$0 sm:$0xff] }
 0x5d4   :  { %v619_v58 = vadd.f32 -1.4531521, %v617_v55  ;;  %v605_v60 = vmul.f32 %v1901_v50, %v604_v57 }
 0x5d6   :  { %v621_v63 = vmul.f32 %v619_v58, %v600_v52  ;;  %v606_v1 = vadd.f32 %v1901_v50, %v605_v60 }
 0x5d8   :  { %v623_v2 = vadd.f32 1.4214138, %v621_v63  ;;  %v610_v4 = vsel %vm609_vm9, %v1901_v50, %v606_v1  ;;  %v1851_v50 = vld [vmem:[%s2332_s3 + $0x20] sm:$0xff] }
 0x5d9   :  { %v615_v7 = vsel %vm612_vm10, %v614_v3, %v610_v4  ;;  %828 = vmatpush.bf16.msra.mxu2 %v1851_v50 }
 0x5da   :  { %v625_v5 = vmul.f32 %v623_v2, %v600_v52  ;;  %v618_v9 = vmul.f32 1.0614054, %v615_v7 }
 0x5dc   :  { %v627_v10 = vadd.f32 -0.28449672, %v625_v5  ;;  %v620_v11 = vadd.f32 -1.4531521, %v618_v9 }
 0x5de   :  { %v629_v12 = vmul.f32 %v627_v10, %v600_v52  ;;  %v622_v14 = vmul.f32 %v620_v11, %v615_v7 }
 0x5e0   :  { %v631_v15 = vadd.f32 0.2548296, %v629_v12  ;;  %v624_v16 = vadd.f32 1.4214138, %v622_v14 }
 0x5e2   :  { %v633_v17 = vmul.f32 %v631_v15, %v600_v52  ;;  %v626_v19 = vmul.f32 %v624_v16, %v615_v7  ;;  %v1855_v16 = vld [vmem:[%s2330_s1 + $0x38] sm:$0xff] }
 0x5e4   :  { %v643_v23 = vmul.f32 %v1903_v22, %v633_v17  ;;  %v628_v24 = vadd.f32 -0.28449672, %v626_v19  ;;  %v1854_v17 = vld [vmem:[%s2330_s1 + $0x30] sm:$0xff] }
 0x5e5   :  { %v1856_v19 = vld [vmem:[%s2331_s2 + $0x30] sm:$0xff] }
 0x5e6   :  { %v630_v27 = vmul.f32 %v628_v24, %v615_v7  ;;  %v645_v28 = vsub.f32 1.0, %v643_v23 }
 0x5e8   :  { %v632_v29 = vadd.f32 0.2548296, %v630_v27  ;;  %v647_v36 = vmul.f32 %v645_v28, %v579_v34 }
 0x5ea   :  { %v634_v30 = vmul.f32 %v632_v29, %v615_v7  ;;  %v649_v40 = vadd.f32 1.0, %v647_v36 }
 0x5ec   :  { %v644_v37 = vmul.f32 %v1905_v31, %v634_v30  ;;  %v651_v44 = vmul.f32 %v649_v40, %v573_v42  ;;  %v1853_v30 = vld [vmem:[%s2333_s4 + $0x10] sm:$0xff] }
 0x5ee   :  { %v646_v38 = vsub.f32 1.0, %v644_v37 }
 0x5f0   :  { %v648_v41 = vmul.f32 %v646_v38, %v580_v39 }
 0x5f2   :  { %v650_v43 = vadd.f32 1.0, %v648_v41 }
 0x5f4   :  { %v652_v45 = vmul.f32 %v650_v43, %v574_v26 }
 0x5f6   :  { %v653_v46 = vpack.c.bf16 %v652_v45, %v651_v44 }
 0x5f8   :  { %730 = vmatmul.bf16.vlgmr.msrb.gmra.mxu3 %v653_v46 }
 0x67b   :  { %v731_v52 = vpop.f32.mrf.mxu3 }
 0x67c   :  { %v732_v54 = vadd.f32 %v1878_v53, %v731_v52 }
 0x67e   :  { %v2198_v57 = vadd.f32 %v732_v54, %v2118_v20 }
 0x683   :  { %v733_v55 = vpop.f32.mrf.mxu3 }
 0x684   :  { %v734_v56 = vadd.f32 %v1878_v53, %v733_v55 }
 0x686   :  { %v2201_v58 = vadd.f32 %v734_v56, %v2120_v21 }
 0x688   :  { %v738_v59 = vpack.c.bf16 %v2201_v58, %v2198_v57 }
 0x68a   :  { %1658 = vmatmul.msk.bf16.vlgmr.msra.gmra.mxu0 %vm65_vm0, %v738_v59  ;;  %1671 = vmatmul.msk.bf16.vlgmr.msra.gmra.mxu1 %vm65_vm0, %v738_v59 }
 0x68b   :  { %1684 = vmatmul.msk.bf16.vlgmr.msra.gmra.mxu2 %vm65_vm0, %v738_v59  ;;  %1736 = vmatmul.msk.bf16.vlgmr.msra.gmra.mxu3 %vm65_vm0, %v738_v59 }
 0x707   :  { %v799_v60 = vpop.f32.mrf.mxu1  ;;  %v768_v61 = vpop.f32.mrf.mxu0 }
 0x708   :  { %1685 = vmatpush.xpose.msk.msrb.mxu0 %vm143_vm1, %v799_v60 }
 0x70b   :  { %1686 = vmatmul.msk.f32.vlgmr.msrb.gmra.mxu0 %vm143_vm1, %v768_v61  ;;  %v1860_v61 = vld [vmem:[%s2333_s4 + $0x18] sm:$0xff]  ;;  %s1499_s4 = sshll.u32 %s2340_s11, 4  ;;  %s1500_s4 = int_to_ptr.hbm [resolvable:$true] %s1499_s4 }
 0x70e   :  { %v830_v20 = vpop.f32.mrf.mxu2  ;;  %v1072_v21 = vpop.f32.mrf.mxu3 }
 0x70f   :  { %927 = vmatpush.msrb.mxu1 %v830_v20  ;;  %v801_v62 = vpop.f32.mrf.mxu1  ;;  %v770_v63 = vpop.f32.mrf.mxu0 }
 0x710   :  { %1687 = vmatpush.xpose.msk.msra.mxu0 %vm143_vm1, %v801_v62 }
 0x711   :  { %1007 = vmatpush.bf16.msra.mxu1 %v1855_v16 }
 0x713   :  { %1688 = vmatmul.msk.f32.vlgmr.msra.gmra.mxu0 %vm143_vm1, %v770_v63  ;;  %v1862_v63 = vld [vmem:[%s2334_s5 + $0x18] sm:$0xff] }
 0x714   :  { %975 = vmatpush.bf16.msrb.mxu0 %v1853_v30 }
 0x715   :  { %1008 = vmatpush.bf16.msra.mxu1 %v1854_v17  ;;  %v1868_v17 = vld [vmem:[%s2336_s7 + $0x68] sm:$0xff] }
 0x716   :  { %v832_v0 = vpop.f32.mrf.mxu2  ;;  %v1074_v1 = vpop.f32.mrf.mxu3 }
 0x717   :  { %950 = vmatpush.msrb.mxu2 %v832_v0  ;;  %1192 = vmatpush.msrb.mxu3 %v1074_v1  ;;  %v1861_v0 = vld [vmem:[%s2334_s5 + $0x10] sm:$0xff]  ;;  %s1967_s5 = smov 8  }
 0x719   :  { %1038 = vmatpush.bf16.msra.mxu2 %v1857_v18 }
 0x71d   :  { %1039 = vmatpush.bf16.msra.mxu2 %v1856_v19 }
 0x788   :  { %v858_v2 = vpop.f32.mrf.mxu0 }
 0x789   :  { %v887_v3 = vsel %vm196_vm2, %v858_v2, -inf }
 0x78a   :  { %888 = vmax.xlane.f32.xlu0 %v887_v3 }
 0x790   :  { %v884_v4 = vpop.f32.mrf.mxu0 }
 0x791   :  { %v890_v5 = vsel %vm196_vm2, %v884_v4, -inf }
 0x792   :  { %891 = vmax.xlane.f32.xlu2 %v890_v5 }
 0x7fd   :  { %v889_v6 = vpop.xlane.xlu0 %888 }
 0x7fe   :  { %v893_v7 = vsub.f32 %v858_v2, %v889_v6 }
 0x800   :  { %v895_v8 = vmul.f32 1.442695, %v893_v7 }
 0x802   :  { %1906 = vpow2.f32 %v895_v8  ;;  %v1879_v8 = vld [vmem:[%s2335_s6 + $0x1] ss:$0 sm:$0xff] }
 0x805   :  { %v892_v9 = vpop.xlane.xlu2 %891 }
 0x806   :  { %v894_v10 = vsub.f32 %v884_v4, %v892_v9 }
 0x808   :  { %v1907_v11 = vpop.eup %1906  ;;  %v897_v12 = vmul.f32 1.442695, %v894_v10 }
 0x809   :  { %v899_v13 = vsel %vm196_vm2, %v1907_v11, 0.0 }
 0x80a   :  { %1908 = vpow2.f32 %v897_v12  ;;  %900 = vadd.xlane.f32.xlu2 %v899_v13  ;;  %v1869_v13 = vld [vmem:[%s2336_s7 + $0x70] sm:$0xff] }
 0x810   :  { %v1909_v14 = vpop.eup %1908 }
 0x811   :  { %v902_v15 = vsel %vm196_vm2, %v1909_v14, 0.0 }
 0x812   :  { %903 = vadd.xlane.f32.xlu1 %v902_v15 }
 0x87d   :  { %v901_v22 = vpop.xlane.xlu2 %900 }
 0x87e   :  { %1910 = vrcp.f32 %v901_v22  ;;  %v1867_v22 = vld [vmem:[%s2336_s7 + $0x60] sm:$0xff] }
 0x884   :  { %v1911_v23 = vpop.eup %1910 }
 0x885   :  { %v907_v24 = vmul.f32 %v1911_v23, %v1907_v11  ;;  %v904_v27 = vpop.xlane.xlu1 %903 }
 0x886   :  { %1912 = vrcp.f32 %v904_v27 }
 0x887   :  { %1689 = vmatmul.msk.f32.vlgmr.msrb.gmra.mxu1 %vm196_vm2, %v907_v24 }
 0x88c   :  { %v1913_v28 = vpop.eup %1912 }
 0x88d   :  { %v908_v29 = vmul.f32 %v1913_v28, %v1909_v14 }
 0x88f   :  { %1690 = vmatmul.msk.f32.vlgmr.msrb.gmra.mxu2 %vm196_vm2, %v908_v29  ;;  %1710 = vmatmul.msk.bf16.vlgmr.msra.gmra.mxu1 %vm65_vm0, %v738_v59  ;;  %v1866_v29 = vld [vmem:[%s2336_s7 + $0x58] sm:$0xff] }
 0x897   :  { %1723 = vmatmul.msk.bf16.vlgmr.msra.gmra.mxu2 %vm65_vm0, %v738_v59 }
 0x904   :  { %v929_v31 = vpop.f32.mrf.mxu1 }
 0x90c   :  { %v1010_v38 = vpop.f32.mrf.mxu1 }
 0x912   :  { %v952_v34 = vpop.f32.mrf.mxu2 }
 0x913   :  { %v955_v36 = vpack.c.bf16 %v952_v34, %v929_v31 }
 0x914   :  { %v1012_v40 = vpop.f32.mrf.mxu1 }
 0x915   :  { %1697 = vmatmul.msk.bf16.vlgmr.msrb.gmra.mxu0 %vm143_vm1, %v955_v36 }
 0x91a   :  { %v1041_v37 = vpop.f32.mrf.mxu2 }
 0x91b   :  { %1737 = vmatpush.xpose.msk.msra.mxu0 %vm143_vm1, %v1041_v37  ;;  %v1865_v37 = vld [vmem:[%s2336_s7 + $0x50] sm:$0xff] }
 0x91f   :  { %1169 = vmatpush.msrb.mxu0 %v1072_v21 }
 0x922   :  { %v1043_v39 = vpop.f32.mrf.mxu2 }
 0x923   :  { %1739 = vmatpush.xpose.msk.msrb.mxu1 %vm143_vm1, %v1043_v39 }
 0x925   :  { %1738 = vmatmul.msk.f32.vlgmr.msra.gmra.mxu0 %vm143_vm1, %v1010_v38 }
 0x926   :  { %1740 = vmatmul.msk.f32.vlgmr.msrb.gmra.mxu1 %vm143_vm1, %v1012_v40  ;;  %1217 = vmatpush.bf16.msra.mxu0 %v1860_v61 }
 0x927   :  { %1258 = vmatpush.bf16.msra.mxu1 %v1862_v63 }
 0x92b   :  { %1259 = vmatpush.bf16.msra.mxu1 %v1861_v0 }
 0x992   :  { %v977_v41 = vpop.f32.mrf.mxu0 }
 0x993   :  { %v982_v2 = vadd.f32 %v977_v41, %v2198_v57 }
 0x99a   :  { %v979_v42 = vpop.f32.mrf.mxu0 }
 0x99b   :  { %v983_v3 = vadd.f32 %v979_v42, %v2201_v58  ;;  %v1870_v58 = vld [vmem:[%s2336_s7 + $0x78] sm:$0xff] }
 0x99c   :  { %1417 = vmatpush.bf16.msrb.mxu2 %v1870_v58 }
 0x9a0   :  { %1418 = vmatpush.bf16.msrb.mxu2 %v1869_v13 }
 0x9a2   :  { %v1100_v26 = vpop.f32.mrf.mxu0 }
 0x9a3   :  { %v1126_v43 = vpop.f32.mrf.mxu1  ;;  %v1129_v44 = vsel %vm196_vm2, %v1100_v26, -inf }
 0x9a4   :  { %1130 = vmax.xlane.f32.xlu1 %v1129_v44  ;;  %v1132_v45 = vsel %vm196_vm2, %v1126_v43, -inf  ;;  %1419 = vmatpush.bf16.msrb.mxu2 %v1868_v17 }
 0x9a5   :  { %1133 = vmax.xlane.f32.xlu0 %v1132_v45 }
 0x9a8   :  { %1420 = vmatpush.bf16.msrb.mxu2 %v1867_v22 }
 0x9ac   :  { %1421 = vmatpush.bf16.msrb.mxu2 %v1866_v29 }
 0x9b0   :  { %1422 = vmatpush.bf16.msrb.mxu2 %v1865_v37  ;;  %v1872_v37 = vld [vmem:[%s2338_s9 + $0x8] sm:$0xff] }
 0x9b1   :  { %1463 = vmatpush.bf16.msra.mxu3 %v1872_v37 }
 0xa17   :  { %v1131_v46 = vpop.xlane.xlu1 %1130 }
 0xa18   :  { %v1135_v47 = vsub.f32 %v1100_v26, %v1131_v46  ;;  %v1134_v35 = vpop.xlane.xlu0 %1133 }
 0xa19   :  { %v1136_v48 = vsub.f32 %v1126_v43, %v1134_v35  ;;  %v1864_v43 = vld [vmem:[%s2336_s7 + $0x48] sm:$0xff] }
 0xa1a   :  { %v1137_v25 = vmul.f32 1.442695, %v1135_v47  ;;  %1423 = vmatpush.bf16.msrb.mxu2 %v1864_v43 }
 0xa1b   :  { %v1139_v33 = vmul.f32 1.442695, %v1136_v48 }
 0xa1c   :  { %1914 = vpow2.f32 %v1137_v25 }
 0xa1d   :  { %1916 = vpow2.f32 %v1139_v33  ;;  %v1863_v33 = vld [vmem:[%s2336_s7 + $0x40] sm:$0xff] }
 0xa1e   :  { %1424 = vmatpush.bf16.msrb.mxu2 %v1863_v33 }
 0xa22   :  { %v1915_v49 = vpop.eup %1914 }
 0xa23   :  { %v1917_v50 = vpop.eup %1916  ;;  %v1141_v51 = vsel %vm196_vm2, %v1915_v49, 0.0 }
 0xa24   :  { %1142 = vadd.xlane.f32.xlu0 %v1141_v51  ;;  %v1144_v52 = vsel %vm196_vm2, %v1917_v50, 0.0 }
 0xa25   :  { %1145 = vadd.xlane.f32.xlu2 %v1144_v52 }
 0xa97   :  { %v1143_v53 = vpop.xlane.xlu0 %1142 }
 0xa98   :  { %1918 = vrcp.f32 %v1143_v53  ;;  %v1146_v54 = vpop.xlane.xlu2 %1145 }
 0xa99   :  { %1920 = vrcp.f32 %v1146_v54 }
 0xa9e   :  { %v1919_v55 = vpop.eup %1918 }
 0xa9f   :  { %v1921_v56 = vpop.eup %1920  ;;  %v1149_v59 = vmul.f32 %v1919_v55, %v1915_v49 }
 0xaa0   :  { %v1150_v60 = vmul.f32 %v1921_v56, %v1917_v50 }
 0xaa1   :  { %1741 = vmatmul.msk.f32.vlgmr.msrb.gmra.mxu0 %vm196_vm2, %v1149_v59 }
 0xaa2   :  { %1742 = vmatmul.msk.f32.vlgmr.msrb.gmra.mxu3 %vm196_vm2, %v1150_v60 }
 0xb1e   :  { %v1171_v20 = vpop.f32.mrf.mxu0 }
 0xb25   :  { %v1194_v21 = vpop.f32.mrf.mxu3 }
 0xb26   :  { %v1197_v62 = vpack.c.bf16 %v1194_v21, %v1171_v20 }
 0xb28   :  { %1749 = vmatmul.msk.bf16.vlgmr.msra.gmra.mxu0 %vm143_vm1, %v1197_v62 }
 0xba5   :  { %v1219_v1 = vpop.f32.mrf.mxu0 }
 0xba6   :  { %v2259_v5 = vadd.f32 %v1219_v1, %v982_v2 }
 0xbad   :  { %v1221_v4 = vpop.f32.mrf.mxu0 }
 0xbae   :  { %v2261_v6 = vadd.f32 %v1221_v4, %v983_v3 }
 0xbb0   :  { %v1226_v7 = vpack.c.bf16 %v2261_v6, %v2259_v5 }
 0xbb2   :  { %1763 = vmatmul.msk.bf16.vlgmr.msra.gmra.mxu1 %vm65_vm0, %v1226_v7 }
 0xc2f   :  { %v1261_v9 = vpop.f32.mrf.mxu1 }
 0xc30   :  { %v2269_v10 = vadd.f32 %v1879_v8, %v1261_v9 }
 0xc32   :  { %v2272_v57 = vmul.f32 0.70710677, %v2269_v10  ;;  %v1266_v29 = vmul.f32 0.5, %v2269_v10  ;;  %v1880_v10 = vld [vmem:[%s2337_s8 + $0x1] ss:$0 sm:$0xff]  ;;  %s1965_s8 = smov [#allocation2]  }
 0xc34   :  { %v1274_v11 = vand.u32 2147483647, %v2272_v57  ;;  %vm1270_vm6 = vcmp.ge.f32.partialorder %v2272_v57, 0.0 }
 0xc35   :  { %v1272_v17 = vsel %vm1270_vm6, 1.0, %v1964_v32 }
 0xc36   :  { %v1276_v12 = vmul.f32 0.3275911, %v1274_v11  ;;  %v1328_v45 = vsub.f32 0.0, %v1274_v11 }
 0xc37   :  { %v1263_v14 = vpop.f32.mrf.mxu1 }
 0xc38   :  { %v1278_v15 = vadd.f32 1.0, %v1276_v12  ;;  %v2281_v16 = vadd.f32 %v1879_v8, %v1263_v14  ;;  %v1330_v50 = vmul.f32 %v1328_v45, %v1274_v11 }
 0xc3a   :  { %1922 = vrcp.f32 %v1278_v15  ;;  %v2287_v18 = vmul.f32 0.70710677, %v2281_v16  ;;  %v1291_v31 = vand.u32 2147483648, %v1278_v15  ;;  %v1289_v36 = vand.u32 2147483647, %v1278_v15 }
 0xc3b   :  { %vm1285_vm14 = vweird.f32 %v1278_v15  ;;  %v1332_v56 = vmul.f32 1.442695, %v1330_v50 }
 0xc3c   :  { %v1275_v19 = vand.u32 2147483647, %v2287_v18  ;;  %v1292_v39 = vor.u32 1.1754944e-38, %v1291_v31  ;;  %vm1290_vm1 = vcmp.eq.f32.partialorder %v1289_v36, 8.507059e+37  ;;  %vm1271_vm7 = vcmp.ge.f32.partialorder %v2287_v18, 0.0 }
 0xc3e   :  { %v1277_v23 = vmul.f32 0.3275911, %v1275_v19  ;;  %v1329_v60 = vsub.f32 0.0, %v1275_v19 }
 0xc40   :  { %v1923_v24 = vpop.eup %1922  ;;  %v1279_v28 = vadd.f32 1.0, %v1277_v23  ;;  %v1331_v63 = vmul.f32 %v1329_v60, %v1275_v19 }
 0xc41   :  { %v1281_v27 = vmul.f32 %v1923_v24, %v1278_v15  ;;  %vm1286_vm13 = vweird.f32 %v1923_v24 }
 0xc42   :  { %1924 = vrcp.f32 %v1279_v28  ;;  %vm1287_vm15 = vmor %vm1285_vm14, %vm1286_vm13  ;;  %v1306_v35 = vand.u32 2147483648, %v1279_v28  ;;  %v1304_v25 = vand.u32 2147483647, %v1279_v28  ;;  %vm1300_vm3 = vweird.f32 %v1279_v28 }
 0xc43   :  { %v1282_v30 = vsub.f32 1.0, %v1281_v27  ;;  %1926 = vpow2.f32 %v1332_v56  ;;  %v1334_v4 = vmul.f32 1.442695, %v1331_v63 }
 0xc44   :  { %v1307_v53 = vor.u32 1.1754944e-38, %v1306_v35  ;;  %vm1305_vm5 = vcmp.eq.f32.partialorder %v1304_v25, 8.507059e+37 }
 0xc45   :  { %v1283_v34 = vmul.f32 %v1923_v24, %v1282_v30  ;;  %1928 = vpow2.f32 %v1334_v4  ;;  %v1267_v30 = vmul.f32 0.5, %v2281_v16 }
 0xc47   :  { %v1284_v38 = vadd.f32 %v1923_v24, %v1283_v34 }
 0xc48   :  { %v1925_v40 = vpop.eup %1924 }
 0xc49   :  { %v1288_v41 = vsel %vm1287_vm15, %v1923_v24, %v1284_v38  ;;  %v1296_v26 = vmul.f32 %v1925_v40, %v1279_v28  ;;  %vm1301_vm2 = vweird.f32 %v1925_v40  ;;  %v1927_v8 = vpop.eup %1926  ;;  %v1273_v24 = vsel %vm1271_vm7, 1.0, %v1964_v32  ;;  %v1871_v32 = vld [vmem:[%s2338_s9] sm:$0xff]  ;;  %s1497_s9 = sshll.u32 %s1965_s8, 4  ;;  %s1498_s9 = int_to_ptr.vmem [resolvable:$true] %s1497_s9 }
 0xc4a   :  { %v1293_v42 = vsel %vm1290_vm1, %v1292_v39, %v1288_v41  ;;  %vm1302_vm4 = vmor %vm1300_vm3, %vm1301_vm2  ;;  %1464 = vmatpush.bf16.msra.mxu3 %v1871_v32 }
 0xc4b   :  { %v1310_v44 = vmul.f32 1.0614054, %v1293_v42  ;;  %v1297_v46 = vsub.f32 1.0, %v1296_v26  ;;  %v1929_v15 = vpop.eup %1928  ;;  %v1881_v26 = vld [vmem:[%s2339_s10] ss:$0 sm:$0xff] }
 0xc4d   :  { %v1312_v47 = vadd.f32 -1.4531521, %v1310_v44  ;;  %v1298_v48 = vmul.f32 %v1925_v40, %v1297_v46 }
 0xc4f   :  { %v1314_v49 = vmul.f32 %v1312_v47, %v1293_v42  ;;  %v1299_v51 = vadd.f32 %v1925_v40, %v1298_v48 }
 0xc51   :  { %v1316_v52 = vadd.f32 1.4214138, %v1314_v49  ;;  %v1303_v54 = vsel %vm1302_vm4, %v1925_v40, %v1299_v51 }
 0xc52   :  { %v1308_v59 = vsel %vm1305_vm5, %v1307_v53, %v1303_v54 }
 0xc53   :  { %v1318_v55 = vmul.f32 %v1316_v52, %v1293_v42  ;;  %v1311_v61 = vmul.f32 1.0614054, %v1308_v59 }
 0xc55   :  { %v1320_v20 = vadd.f32 -0.28449672, %v1318_v55  ;;  %v1313_v21 = vadd.f32 -1.4531521, %v1311_v61 }
 0xc57   :  { %v1322_v62 = vmul.f32 %v1320_v20, %v1293_v42  ;;  %v1315_v0 = vmul.f32 %v1313_v21, %v1308_v59 }
 0xc59   :  { %v1324_v1 = vadd.f32 0.2548296, %v1322_v62  ;;  %v1317_v2 = vadd.f32 1.4214138, %v1315_v0 }
 0xc5b   :  { %v1326_v3 = vmul.f32 %v1324_v1, %v1293_v42  ;;  %v1319_v7 = vmul.f32 %v1317_v2, %v1308_v59 }
 0xc5d   :  { %v1336_v9 = vmul.f32 %v1927_v8, %v1326_v3  ;;  %v1321_v58 = vadd.f32 -0.28449672, %v1319_v7 }
 0xc5f   :  { %v1323_v11 = vmul.f32 %v1321_v58, %v1308_v59  ;;  %v1338_v12 = vsub.f32 1.0, %v1336_v9 }
 0xc61   :  { %v1325_v13 = vadd.f32 0.2548296, %v1323_v11  ;;  %v1340_v19 = vmul.f32 %v1338_v12, %v1272_v17 }
 0xc63   :  { %v1327_v14 = vmul.f32 %v1325_v13, %v1308_v59  ;;  %v1342_v27 = vadd.f32 1.0, %v1340_v19 }
 0xc65   :  { %v1337_v22 = vmul.f32 %v1929_v15, %v1327_v14  ;;  %v1344_v31 = vmul.f32 %v1342_v27, %v1266_v29 }
 0xc67   :  { %v1339_v23 = vsub.f32 1.0, %v1337_v22 }
 0xc69   :  { %v1341_v28 = vmul.f32 %v1339_v23, %v1273_v24 }
 0xc6b   :  { %v1343_v57 = vadd.f32 1.0, %v1341_v28 }
 0xc6d   :  { %v1345_v34 = vmul.f32 %v1343_v57, %v1267_v30 }
 0xc6f   :  { %v1346_v36 = vpack.c.bf16 %v1345_v34, %v1344_v31 }
 0xc71   :  { %1425 = vmatmul.bf16.vlgmr.msrb.gmra.mxu2 %v1346_v36 }
 0xcf4   :  { %v1426_v18 = vpop.f32.mrf.mxu2 }
 0xcf5   :  { %v1427_v16 = vadd.f32 %v1880_v10, %v1426_v18 }
 0xcf7   :  { %v1431_v40 = vadd.f32 %v1427_v16, %v2259_v5 }
 0xcfc   :  { %v1428_v38 = vpop.f32.mrf.mxu2 }
 0xcfd   :  { %v1429_v39 = vadd.f32 %v1880_v10, %v1428_v38 }
 0xcff   :  { %v1432_v41 = vadd.f32 %v1429_v39, %v2261_v6 }
 0xd01   :  { %v1433_v42 = vpack.c.bf16 %v1432_v41, %v1431_v40 }
 0xd03   :  { %1821 = vmatmul.msk.bf16.vlgmr.msra.gmra.mxu3 %vm65_vm0, %v1433_v42 }
 0xd86   :  { %v1466_v43 = vpop.f32.mrf.mxu3 }
 0xd87   :  { %v1467_v44 = vadd.f32 %v1881_v26, %v1466_v43 }
 0xd89   :  { %1471 = vmax.xlane.f32.xlu1 %v1467_v44 }
 0xd8e   :  { %v1468_v45 = vpop.f32.mrf.mxu3 }
 0xd8f   :  { %v1469_v46 = vadd.f32 %v1881_v26, %v1468_v45 }
 0xd91   :  { %1473 = vmax.xlane.f32.xlu2 %v1469_v46 }
 0xdfc   :  { %v1472_v47 = vpop.xlane.xlu1 %1471 }
 0xdfd   :  { %v1475_v35 = vsub.f32 %v1467_v44, %v1472_v47 }
 0xdff   :  { %v1477_v48 = vmul.f32 1.442695, %v1475_v35 }
 0xe01   :  { %1930 = vpow2.f32 %v1477_v48 }
 0xe04   :  { %v1474_v5 = vpop.xlane.xlu2 %1473 }
 0xe05   :  { %v1476_v25 = vsub.f32 %v1469_v46, %v1474_v5 }
 0xe07   :  { %v1931_v6 = vpop.eup %1930  ;;  %v1479_v33 = vmul.f32 1.442695, %v1476_v25 }
 0xe08   :  { %1481 = vadd.xlane.f32.xlu0 %v1931_v6 }
 0xe09   :  { %1932 = vpow2.f32 %v1479_v33 }
 0xe0f   :  { %v1933_v49 = vpop.eup %1932 }
 0xe10   :  { %1483 = vadd.xlane.f32.xlu1 %v1933_v49 }
 0xe7b   :  { %v1482_v50 = vpop.xlane.xlu0 %1481 }
 0xe7c   :  { %1934 = vlog2.f32 %v1482_v50 }
 0xe82   :  { %v1935_v51 = vpop.eup %1934 }
 0xe83   :  { %v1486_v52 = vmul.f32 0.6931472, %v1935_v51  ;;  %v1484_v53 = vpop.xlane.xlu1 %1483 }
 0xe84   :  { %1936 = vlog2.f32 %v1484_v53 }
 0xe85   :  { %v1489_v54 = vsub.f32 %v1475_v35, %v1486_v52 }
 0xe87   :  { %1491 = vst [vmem:[#allocation2] sm:$0xff] %v1489_v54 }
 0xe8a   :  { %v1937_v55 = vpop.eup %1936 }
 0xe8b   :  { %v1488_v56 = vmul.f32 0.6931472, %v1937_v55 }
 0xe8d   :  { %v1490_v59 = vsub.f32 %v1476_v25, %v1488_v56 }
 0xe8f   :  { %1492 = vst [vmem:[#allocation2 + $0x8] sm:$0xff] %v1490_v59 }
 0xe90   :  { %1505 = dma.vmem_to_hbm [thread:$0]  %s1498_s9, 256, %s1500_s4, [#allocation3], %s1966_s23, %s1966_s23, %s1967_s5  }
 0xe91   :  { %1962 = dma.done.wait [#allocation3], 256  }
 0xe92   :  { %1963 = vsyncadd [#allocation3], 4294967040 }
 0xe93   :  { %1510 = vsyncpa [#allocation3], 1 }

</bundles_post_ra>
